<compile_context>
chip_gen: v5e
topology: v5e:2x2
jax: 0.10.0
libtpu: 0.0.40
codegen_flags: <defaults>
</compile_context>

<pallas_src>
import jax
import jax.numpy as jnp
from jax.experimental import pallas as pl
from jax.experimental.pallas import tpu as pltpu


def _round_up(v, m):
    return ((v + m - 1) // m) * m


def _detect_vmem_limit():
    """Per-generation scoped-VMEM limit with ~25% headroom below physical capacity."""
    try:
        cap = int(pltpu.get_tpu_info().vmem_capacity_bytes)
    except Exception:
        cap = 64 * 1024 * 1024          # conservative (v7x-sized) assumption
    return min(96 * 1024 * 1024, (cap * 3) // 4)


_VMEM_LIMIT = _detect_vmem_limit()

_COMPILER_PARAMS = pltpu.CompilerParams(
    dimension_semantics=("parallel", "arbitrary"),   # row tiles shard across TCs
    vmem_limit_bytes=_VMEM_LIMIT,
)


def _select_tiles(n_pad, vmem_limit):
    """Pick (bm, bk).  bm moderate (and >=2 row tiles when possible, for megacore);
    bk as large as the double-buffered int8 A tile budget allows (capped at 4096)."""
    bm = n_pad
    for cand in (1024, 512, 256):
        if n_pad % cand == 0 and n_pad // cand >= 2:
            bm = cand
            break
    budget = vmem_limit // 2             # A stream gets ~half the scoped VMEM
    bk = 256
    mult = 1
    while True:
        cand = 256 * mult
        if cand > n_pad or cand > 4096:
            break
        if n_pad % cand == 0 and 2 * bm * cand <= budget:
            bk = cand
        mult += 1
    bk = min(bk, n_pad)
    return bm, bk


# ---------------------------------------------------------------------------
# Pallas kernels
# ---------------------------------------------------------------------------
def _sage1_kernel(a_ref, xk_ref, xi_ref, dinv_ref, w1l_ref, w1r_ref, b1_ref,
                  h1_ref, acc_ref):
    """Layer 1: h1 = relu((deg_inv * (A @ X)) @ W1l + X @ W1r + b1).

    Grid = (rows // bm, rows // bk).  acc_ref (bm, F0) f32 accumulates A @ X
    across the reduction axis k; exact f32 1/deg scaling, projections, bias and
    relu run in the k == last epilogue.
    """
    k = pl.program_id(1)

    @pl.when(k == 0)
    def _():
        acc_ref[...] = jnp.zeros_like(acc_ref)

    # Dominant N^2 matmul: int8 A upcast in-VMEM, bf16 MXU, f32 accumulation.
    acc_ref[...] += jnp.dot(a_ref[...].astype(jnp.bfloat16), xk_ref[...],
                            preferred_element_type=jnp.float32)

    @pl.when(k == pl.num_programs(1) - 1)
    def _():
        agg = acc_ref[...] * dinv_ref[...]                      # exact f32 mean
        h = (jnp.dot(agg, w1l_ref[...], preferred_element_type=jnp.float32)
             + jnp.dot(xi_ref[...], w1r_ref[...], preferred_element_type=jnp.float32)
             + b1_ref[...])
        h1_ref[...] = jnp.maximum(h, 0.0)                       # f32 output


def _sage2_final_kernel(a_ref, zk_ref, hi_ref, dinv_ref, w2r_ref, b2_ref,
                        lw_ref, lb_ref, o_ref, acc_ref):
    """Layer 2 + final Linear + sigmoid, fused.

    h2  = relu(deg_inv * (A @ z2) + h1 @ W2r + b2)     (z2 = h1 @ W2l, precomputed;
                                                        row scaling commutes with W2l)
    out = sigmoid(h2 @ Wlin + blin)                    (Wlin zero-padded to 128 lanes)
    """
    k = pl.program_id(1)

    @pl.when(k == 0)
    def _():
        acc_ref[...] = jnp.zeros_like(acc_ref)

    acc_ref[...] += jnp.dot(a_ref[...].astype(jnp.bfloat16), zk_ref[...],
                            preferred_element_type=jnp.float32)

    @pl.when(k == pl.num_programs(1) - 1)
    def _():
        h = (acc_ref[...] * dinv_ref[...]
             + jnp.dot(hi_ref[...], w2r_ref[...], preferred_element_type=jnp.float32)
             + b2_ref[...])
        h = jnp.maximum(h, 0.0)
        logits = jnp.dot(h, lw_ref[...], preferred_element_type=jnp.float32) + lb_ref[...]
        o_ref[...] = jax.nn.sigmoid(logits)


# ---------------------------------------------------------------------------
# pallas_call wrappers
# ---------------------------------------------------------------------------
def sage_layer1(a, xk, xi, dinv, w1l, w1r, b1, *, bm, bk):
    n_pad, f0 = xi.shape
    h1 = w1l.shape[1]
    grid = (n_pad // bm, n_pad // bk)

    cost = pl.CostEstimate(
        flops=2 * n_pad * n_pad * f0 + 4 * n_pad * f0 * h1,
        transcendentals=0,
        bytes_accessed=n_pad * n_pad * 1 + n_pad * f0 * (2 + 4) + n_pad * 4
        + 2 * f0 * h1 * 4 + h1 * 4 + n_pad * h1 * 4,
    )

    return pl.pallas_call(
        _sage1_kernel,
        out_shape=jax.ShapeDtypeStruct((n_pad, h1), jnp.float32),
        grid_spec=pltpu.PrefetchScalarGridSpec(
            num_scalar_prefetch=0,
            grid=grid,
            in_specs=[
                pl.BlockSpec((bm, bk), lambda i, k: (i, k)),   # A tile (int8 counts)
                pl.BlockSpec((bk, f0), lambda i, k: (k, 0)),   # X (reduction rows, bf16)
                pl.BlockSpec((bm, f0), lambda i, k: (i, 0)),   # X (root rows, f32)
                pl.BlockSpec((bm, 1), lambda i, k: (i, 0)),    # deg_inv (f32)
                pl.BlockSpec((f0, h1), lambda i, k: (0, 0)),   # W1l
                pl.BlockSpec((f0, h1), lambda i, k: (0, 0)),   # W1r
                pl.BlockSpec((1, h1), lambda i, k: (0, 0)),    # b1
            ],
            out_specs=pl.BlockSpec((bm, h1), lambda i, k: (i, 0)),
            scratch_shapes=[pltpu.VMEM((bm, f0), jnp.float32)],
        ),
        compiler_params=_COMPILER_PARAMS,
        cost_estimate=cost,
    )(a, xk, xi, dinv, w1l, w1r, b1)


def sage_layer2_final(a, z2, h1, dinv, w2r, b2, lw, lb, *, bm, bk):
    n_pad = a.shape[0]
    h1_dim = h1.shape[1]
    h2 = z2.shape[1]
    o_pad = lw.shape[1]
    grid = (n_pad // bm, n_pad // bk)

    cost = pl.CostEstimate(
        flops=2 * n_pad * n_pad * h2 + 2 * n_pad * h1_dim * h2 + 2 * n_pad * h2 * o_pad,
        transcendentals=n_pad * o_pad,
        bytes_accessed=n_pad * n_pad * 1 + n_pad * h2 * 2 + n_pad * h1_dim * 4
        + n_pad * 4 + (h1_dim * h2 + h2 * o_pad) * 4 + (h2 + o_pad) * 4
        + n_pad * o_pad * 4,
    )

    return pl.pallas_call(
        _sage2_final_kernel,
        out_shape=jax.ShapeDtypeStruct((n_pad, o_pad), jnp.float32),
        grid_spec=pltpu.PrefetchScalarGridSpec(
            num_scalar_prefetch=0,
            grid=grid,
            in_specs=[
                pl.BlockSpec((bm, bk), lambda i, k: (i, k)),       # A tile (int8 counts)
                pl.BlockSpec((bk, h2), lambda i, k: (k, 0)),       # z2 (reduction rows, bf16)
                pl.BlockSpec((bm, h1_dim), lambda i, k: (i, 0)),   # h1 (root rows, f32)
                pl.BlockSpec((bm, 1), lambda i, k: (i, 0)),        # deg_inv (f32)
                pl.BlockSpec((h1_dim, h2), lambda i, k: (0, 0)),   # W2r
                pl.BlockSpec((1, h2), lambda i, k: (0, 0)),        # b2
                pl.BlockSpec((h2, o_pad), lambda i, k: (0, 0)),    # Wlin (padded)
                pl.BlockSpec((1, o_pad), lambda i, k: (0, 0)),     # blin (padded)
            ],
            out_specs=pl.BlockSpec((bm, o_pad), lambda i, k: (i, 0)),
            scratch_shapes=[pltpu.VMEM((bm, h2), jnp.float32)],
        ),
        compiler_params=_COMPILER_PARAMS,
        cost_estimate=cost,
    )(a, z2, h1, dinv, w2r, b2, lw, lb)


# ---------------------------------------------------------------------------
# Model glue (adjacency construction + parameters)
# ---------------------------------------------------------------------------
def build_adjacency(edge_index, num_nodes, n_pad):
    """Dense int8 edge-count matrix A[i, j] = #edges j->i (zero-padded) plus the
    exact f32 per-row inverse in-degree (0 for isolated / padded rows)."""
    src = edge_index[0]
    dst = edge_index[1]
    counts = jnp.zeros((n_pad, n_pad), jnp.float32).at[dst, src].add(1.0)
    deg = counts.sum(axis=1, keepdims=True)
    deg_inv = jnp.where(deg > 0.0, 1.0 / jnp.maximum(deg, 1.0), 0.0)
    # Edge multiplicities are tiny in practice; int8 holds counts up to 127.
    return counts.astype(jnp.int8), deg_inv


def init_params(key, in_channels, hidden_channels, hidden_channels2, out_channels):
    """Deterministic synthetic parameter init (shapes match the torch module)."""
    ks = jax.random.split(key, 7)

    def glorot(k, fan_in, fan_out):
        scale = jnp.sqrt(6.0 / (fan_in + fan_out))
        return jax.random.uniform(
            k, (fan_in, fan_out), jnp.float32, minval=-scale, maxval=scale
        )

    return {
        # SAGEConv 1: lin_l (with bias) on aggregated, lin_r (no bias) on root
        "conv1_wl": glorot(ks[0], in_channels, hidden_channels),
        "conv1_wr": glorot(ks[1], in_channels, hidden_channels),
        "conv1_bl": jnp.zeros((1, hidden_channels), jnp.float32),
        # SAGEConv 2
        "conv2_wl": glorot(ks[2], hidden_channels, hidden_channels2),
        "conv2_wr": glorot(ks[3], hidden_channels, hidden_channels2),
        "conv2_bl": jnp.zeros((1, hidden_channels2), jnp.float32),
        # final Linear
        "lin_w": glorot(ks[4], hidden_channels2, out_channels),
        "lin_b": jnp.zeros((1, out_channels), jnp.float32),
    }


def gnn_linear_forward(params, x, edge_index):
    n, f0 = x.shape
    h1 = params["conv1_wl"].shape[1]
    h2 = params["conv2_wl"].shape[1]
    o = params["lin_w"].shape[1]
    o_pad = _round_up(o, 128)                     # lane-dense final store

    # 256-aligned rows (MXU / lane aligned on all generations), asymmetric tiles.
    n_pad = _round_up(n, 256)
    bm, bk = _select_tiles(n_pad, _VMEM_LIMIT)

    a_i8, deg_inv = build_adjacency(edge_index, n, n_pad)

    x_f32 = jnp.zeros((n_pad, f0), jnp.float32).at[:n, :].set(x)
    x_bf16 = x_f32.astype(jnp.bfloat16)           # MXU feed for the N^2 matmul

    w1l = params["conv1_wl"]
    w1r = params["conv1_wr"]
    b1 = params["conv1_bl"]
    w2l = params["conv2_wl"]
    w2r = params["conv2_wr"]
    b2 = params["conv2_bl"]
    lw = jnp.zeros((h2, o_pad), jnp.float32).at[:, :o].set(params["lin_w"])
    lb = jnp.zeros((1, o_pad), jnp.float32).at[:, :o].set(params["lin_b"])

    # Layer 1 (f32 h1), tiny one-off projection in XLA, then layer 2 (+ Linear+sigmoid).
    h1_act = sage_layer1(a_i8, x_bf16, x_f32, deg_inv, w1l, w1r, b1, bm=bm, bk=bk)
    z2 = jnp.dot(h1_act, w2l).astype(jnp.bfloat16)     # (N, H2) pre-projection, once
    out_pad = sage_layer2_final(a_i8, z2, h1_act, deg_inv, w2r, b2, lw, lb, bm=bm, bk=bk)

    return out_pad[:n, :o]


# ---------------------------------------------------------------------------
# Main
# ---------------------------------------------------------------------------
if __name__ == "__main__":
    key = jax.random.PRNGKey(0)
    k_x, k_e, k_p = jax.random.split(key, 3)

    num_nodes = 512           # padded to 512 -> bm=256 (2 row tiles), bk=512
    in_channels = 16
    hidden_channels = 32
    hidden_channels2 = 16
    out_channels = 4
    num_edges = 2048

    x = jax.random.normal(k_x, (num_nodes, in_channels), jnp.float32)
    edge_index = jax.random.randint(k_e, (2, num_edges), 0, num_nodes, jnp.int32)

    params = init_params(k_p, in_channels, hidden_channels, hidden_channels2, out_channels)

    out = jax.jit(gnn_linear_forward)(params, x, edge_index)
    out = jax.block_until_ready(out)

    assert out.shape == (num_nodes, out_channels)
    assert bool(jnp.all(jnp.isfinite(out)))
    assert bool(jnp.all((out >= 0.0) & (out <= 1.0)))  # sigmoid output range

    print("KERNEL_OK")
</pallas_src>

<mosaic_0001>
module attributes {stable_mosaic.version = 11 : i64} {
  func.func @_sage1_kernel(%arg0: i32, %arg1: i32, %arg2: memref<256x512xi8, #tpu.memory_space<vmem>>, %arg3: memref<512x16xbf16, #tpu.memory_space<vmem>>, %arg4: memref<256x16xf32, #tpu.memory_space<vmem>>, %arg5: memref<256x1xf32, #tpu.memory_space<vmem>>, %arg6: memref<16x32xf32, #tpu.memory_space<vmem>>, %arg7: memref<16x32xf32, #tpu.memory_space<vmem>>, %arg8: memref<1x32xf32, #tpu.memory_space<vmem>>, %arg9: memref<256x32xf32, #tpu.memory_space<vmem>>, %arg10: memref<256x16xf32, #tpu.memory_space<vmem>>) attributes {dimension_semantics = [#tpu.dimension_semantics<parallel>, #tpu.dimension_semantics<arbitrary>], iteration_bounds = array<i64: 2, 1>, scalar_prefetch = 0 : i64, scratch_operands = 1 : i64, tpu.core_type = #tpu.core_type<tc>, window_params = [{transform_indices = @transform_0, window_bounds = array<i64: 256, 512>}, {transform_indices = @transform_1, window_bounds = array<i64: 512, 16>}, {transform_indices = @transform_2, window_bounds = array<i64: 256, 16>}, {transform_indices = @transform_3, window_bounds = array<i64: 256, 1>}, {pipeline_mode = #tpu.pipeline_mode<synchronous>, transform_indices = @transform_4, window_bounds = array<i64: 16, 32>}, {pipeline_mode = #tpu.pipeline_mode<synchronous>, transform_indices = @transform_5, window_bounds = array<i64: 16, 32>}, {pipeline_mode = #tpu.pipeline_mode<synchronous>, transform_indices = @transform_6, window_bounds = array<i64: 1, 32>}, {transform_indices = @transform_7, window_bounds = array<i64: 256, 32>}]} {
    %c0_i32 = arith.constant 0 : i32
    %0 = arith.cmpi eq, %arg1, %c0_i32 : i32
    %1 = arith.extui %0 : i1 to i32
    %c0_i32_0 = arith.constant 0 : i32
    %2 = arith.cmpi ne, %1, %c0_i32_0 : i32
    scf.if %2 {
      %cst_10 = arith.constant 0.000000e+00 : f32
      %13 = vector.broadcast %cst_10 : f32 to vector<256x16xf32>
      %c0_11 = arith.constant 0 : index
      %c0_12 = arith.constant 0 : index
      %14 = vector.load %arg10[%c0_11, %c0_12] : memref<256x16xf32, #tpu.memory_space<vmem>>, vector<256x16xf32>
      tpu.vector_store %arg10[%c0_11, %c0_12], %13 {strides = array<i32>} : memref<256x16xf32, #tpu.memory_space<vmem>>, vector<256x16xf32>,
    } else {
    }
    %c0 = arith.constant 0 : index
    %c0_1 = arith.constant 0 : index
    %3 = vector.load %arg10[%c0, %c0_1] : memref<256x16xf32, #tpu.memory_space<vmem>>, vector<256x16xf32>
    %c0_2 = arith.constant 0 : index
    %c0_3 = arith.constant 0 : index
    %4 = vector.load %arg2[%c0_2, %c0_3] : memref<256x512xi8, #tpu.memory_space<vmem>>, vector<256x512xi8>
    %5 = arith.sitofp %4 : vector<256x512xi8> to vector<256x512xbf16>
    %c0_4 = arith.constant 0 : index
    %c0_5 = arith.constant 0 : index
    %6 = vector.load %arg3[%c0_4, %c0_5] : memref<512x16xbf16, #tpu.memory_space<vmem>>, vector<512x16xbf16>
    %cst = arith.constant dense<0.000000e+00> : vector<256x16xf32>
    %7 = tpu.matmul %5, %6, %cst {dimension_numbers = #tpu.dot_dimension_numbers<[1], [0], [0], [1], [0, 0, 1, 1], [], []>} : vector<256x512xbf16>, vector<512x16xbf16>, vector<256x16xf32> -> vector<256x16xf32>
    %8 = arith.addf %3, %7 : vector<256x16xf32>
    %c0_6 = arith.constant 0 : index
    %c0_7 = arith.constant 0 : index
    %9 = vector.load %arg10[%c0_6, %c0_7] : memref<256x16xf32, #tpu.memory_space<vmem>>, vector<256x16xf32>
    tpu.vector_store %arg10[%c0_6, %c0_7], %8 {strides = array<i32>} : memref<256x16xf32, #tpu.memory_space<vmem>>, vector<256x16xf32>,
    %c0_i32_8 = arith.constant 0 : i32
    %10 = arith.cmpi eq, %arg1, %c0_i32_8 : i32
    %11 = arith.extui %10 : i1 to i32
    %c0_i32_9 = arith.constant 0 : i32
    %12 = arith.cmpi ne, %11, %c0_i32_9 : i32
    scf.if %12 {
      %c0_10 = arith.constant 0 : index
      %c0_11 = arith.constant 0 : index
      %13 = vector.load %arg10[%c0_10, %c0_11] : memref<256x16xf32, #tpu.memory_space<vmem>>, vector<256x16xf32>
      %c0_12 = arith.constant 0 : index
      %c0_13 = arith.constant 0 : index
      %14 = vector.load %arg5[%c0_12, %c0_13] : memref<256x1xf32, #tpu.memory_space<vmem>>, vector<256x1xf32>
      %15 = vector.broadcast %14 : vector<256x1xf32> to vector<256x16xf32>
      %16 = arith.mulf %13, %15 : vector<256x16xf32>
      %c0_14 = arith.constant 0 : index
      %c0_15 = arith.constant 0 : index
      %17 = vector.load %arg6[%c0_14, %c0_15] : memref<16x32xf32, #tpu.memory_space<vmem>>, vector<16x32xf32>
      %cst_16 = arith.constant dense<0.000000e+00> : vector<256x32xf32>
      %18 = tpu.matmul %16, %17, %cst_16 {dimension_numbers = #tpu.dot_dimension_numbers<[1], [0], [0], [1], [0, 0, 1, 1], [], []>} : vector<256x16xf32>, vector<16x32xf32>, vector<256x32xf32> -> vector<256x32xf32>
      %c0_17 = arith.constant 0 : index
      %c0_18 = arith.constant 0 : index
      %19 = vector.load %arg4[%c0_17, %c0_18] : memref<256x16xf32, #tpu.memory_space<vmem>>, vector<256x16xf32>
      %c0_19 = arith.constant 0 : index
      %c0_20 = arith.constant 0 : index
      %20 = vector.load %arg7[%c0_19, %c0_20] : memref<16x32xf32, #tpu.memory_space<vmem>>, vector<16x32xf32>
      %cst_21 = arith.constant dense<0.000000e+00> : vector<256x32xf32>
      %21 = tpu.matmul %19, %20, %cst_21 {dimension_numbers = #tpu.dot_dimension_numbers<[1], [0], [0], [1], [0, 0, 1, 1], [], []>} : vector<256x16xf32>, vector<16x32xf32>, vector<256x32xf32> -> vector<256x32xf32>
      %22 = arith.addf %18, %21 : vector<256x32xf32>
      %c0_22 = arith.constant 0 : index
      %c0_23 = arith.constant 0 : index
      %23 = vector.load %arg8[%c0_22, %c0_23] : memref<1x32xf32, #tpu.memory_space<vmem>>, vector<1x32xf32>
      %24 = vector.broadcast %23 : vector<1x32xf32> to vector<256x32xf32>
      %25 = arith.addf %22, %24 : vector<256x32xf32>
      %cst_24 = arith.constant 0.000000e+00 : f32
      %26 = vector.broadcast %cst_24 : f32 to vector<256x32xf32>
      %27 = arith.maximumf %25, %26 : vector<256x32xf32>
      %c0_25 = arith.constant 0 : index
      %c0_26 = arith.constant 0 : index
      %28 = vector.load %arg9[%c0_25, %c0_26] : memref<256x32xf32, #tpu.memory_space<vmem>>, vector<256x32xf32>
      tpu.vector_store %arg9[%c0_25, %c0_26], %27 {strides = array<i32>} : memref<256x32xf32, #tpu.memory_space<vmem>>, vector<256x32xf32>,
    } else {
    }
    return
  }
  func.func @transform_0(%arg0: i32, %arg1: i32) -> (i32, i32) {
    %c0_i32 = arith.constant 0 : i32
    return %arg0, %arg1 : i32, i32
  }
  func.func @transform_1(%arg0: i32, %arg1: i32) -> (i32, i32) {
    %c0_i32 = arith.constant 0 : i32
    %c0_i32_0 = arith.constant 0 : i32
    return %arg1, %c0_i32 : i32, i32
  }
  func.func @transform_2(%arg0: i32, %arg1: i32) -> (i32, i32) {
    %c0_i32 = arith.constant 0 : i32
    %c0_i32_0 = arith.constant 0 : i32
    return %arg0, %c0_i32 : i32, i32
  }
  func.func @transform_3(%arg0: i32, %arg1: i32) -> (i32, i32) {
    %c0_i32 = arith.constant 0 : i32
    %c0_i32_0 = arith.constant 0 : i32
    return %arg0, %c0_i32 : i32, i32
  }
  func.func @transform_4(%arg0: i32, %arg1: i32) -> (i32, i32) {
    %c0_i32 = arith.constant 0 : i32
    %c0_i32_0 = arith.constant 0 : i32
    %c0_i32_1 = arith.constant 0 : i32
    return %c0_i32, %c0_i32_0 : i32, i32
  }
  func.func @transform_5(%arg0: i32, %arg1: i32) -> (i32, i32) {
    %c0_i32 = arith.constant 0 : i32
    %c0_i32_0 = arith.constant 0 : i32
    %c0_i32_1 = arith.constant 0 : i32
    return %c0_i32, %c0_i32_0 : i32, i32
  }
  func.func @transform_6(%arg0: i32, %arg1: i32) -> (i32, i32) {
    %c0_i32 = arith.constant 0 : i32
    %c0_i32_0 = arith.constant 0 : i32
    %c0_i32_1 = arith.constant 0 : i32
    return %c0_i32, %c0_i32_0 : i32, i32
  }
  func.func @transform_7(%arg0: i32, %arg1: i32) -> (i32, i32) {
    %c0_i32 = arith.constant 0 : i32
    %c0_i32_0 = arith.constant 0 : i32
    return %arg0, %c0_i32 : i32, i32
  }
}

module attributes {stable_mosaic.version = 11 : i64} {
  func.func @_sage2_final_kernel(%arg0: i32, %arg1: i32, %arg2: memref<256x512xi8, #tpu.memory_space<vmem>>, %arg3: memref<512x16xbf16, #tpu.memory_space<vmem>>, %arg4: memref<256x32xf32, #tpu.memory_space<vmem>>, %arg5: memref<256x1xf32, #tpu.memory_space<vmem>>, %arg6: memref<32x16xf32, #tpu.memory_space<vmem>>, %arg7: memref<1x16xf32, #tpu.memory_space<vmem>>, %arg8: memref<16x128xf32, #tpu.memory_space<vmem>>, %arg9: memref<1x128xf32, #tpu.memory_space<vmem>>, %arg10: memref<256x128xf32, #tpu.memory_space<vmem>>, %arg11: memref<256x16xf32, #tpu.memory_space<vmem>>) attributes {dimension_semantics = [#tpu.dimension_semantics<parallel>, #tpu.dimension_semantics<arbitrary>], iteration_bounds = array<i64: 2, 1>, scalar_prefetch = 0 : i64, scratch_operands = 1 : i64, tpu.core_type = #tpu.core_type<tc>, window_params = [{transform_indices = @transform_0, window_bounds = array<i64: 256, 512>}, {transform_indices = @transform_1, window_bounds = array<i64: 512, 16>}, {transform_indices = @transform_2, window_bounds = array<i64: 256, 32>}, {transform_indices = @transform_3, window_bounds = array<i64: 256, 1>}, {pipeline_mode = #tpu.pipeline_mode<synchronous>, transform_indices = @transform_4, window_bounds = array<i64: 32, 16>}, {pipeline_mode = #tpu.pipeline_mode<synchronous>, transform_indices = @transform_5, window_bounds = array<i64: 1, 16>}, {pipeline_mode = #tpu.pipeline_mode<synchronous>, transform_indices = @transform_6, window_bounds = array<i64: 16, 128>}, {pipeline_mode = #tpu.pipeline_mode<synchronous>, transform_indices = @transform_7, window_bounds = array<i64: 1, 128>}, {transform_indices = @transform_8, window_bounds = array<i64: 256, 128>}]} {
    %c0_i32 = arith.constant 0 : i32
    %0 = arith.cmpi eq, %arg1, %c0_i32 : i32
    %1 = arith.extui %0 : i1 to i32
    %c0_i32_0 = arith.constant 0 : i32
    %2 = arith.cmpi ne, %1, %c0_i32_0 : i32
    scf.if %2 {
      %cst_10 = arith.constant 0.000000e+00 : f32
      %13 = vector.broadcast %cst_10 : f32 to vector<256x16xf32>
      %c0_11 = arith.constant 0 : index
      %c0_12 = arith.constant 0 : index
      %14 = vector.load %arg11[%c0_11, %c0_12] : memref<256x16xf32, #tpu.memory_space<vmem>>, vector<256x16xf32>
      tpu.vector_store %arg11[%c0_11, %c0_12], %13 {strides = array<i32>} : memref<256x16xf32, #tpu.memory_space<vmem>>, vector<256x16xf32>,
    } else {
    }
    %c0 = arith.constant 0 : index
    %c0_1 = arith.constant 0 : index
    %3 = vector.load %arg11[%c0, %c0_1] : memref<256x16xf32, #tpu.memory_space<vmem>>, vector<256x16xf32>
    %c0_2 = arith.constant 0 : index
    %c0_3 = arith.constant 0 : index
    %4 = vector.load %arg2[%c0_2, %c0_3] : memref<256x512xi8, #tpu.memory_space<vmem>>, vector<256x512xi8>
    %5 = arith.sitofp %4 : vector<256x512xi8> to vector<256x512xbf16>
    %c0_4 = arith.constant 0 : index
    %c0_5 = arith.constant 0 : index
    %6 = vector.load %arg3[%c0_4, %c0_5] : memref<512x16xbf16, #tpu.memory_space<vmem>>, vector<512x16xbf16>
    %cst = arith.constant dense<0.000000e+00> : vector<256x16xf32>
    %7 = tpu.matmul %5, %6, %cst {dimension_numbers = #tpu.dot_dimension_numbers<[1], [0], [0], [1], [0, 0, 1, 1], [], []>} : vector<256x512xbf16>, vector<512x16xbf16>, vector<256x16xf32> -> vector<256x16xf32>
    %8 = arith.addf %3, %7 : vector<256x16xf32>
    %c0_6 = arith.constant 0 : index
    %c0_7 = arith.constant 0 : index
    %9 = vector.load %arg11[%c0_6, %c0_7] : memref<256x16xf32, #tpu.memory_space<vmem>>, vector<256x16xf32>
    tpu.vector_store %arg11[%c0_6, %c0_7], %8 {strides = array<i32>} : memref<256x16xf32, #tpu.memory_space<vmem>>, vector<256x16xf32>,
    %c0_i32_8 = arith.constant 0 : i32
    %10 = arith.cmpi eq, %arg1, %c0_i32_8 : i32
    %11 = arith.extui %10 : i1 to i32
    %c0_i32_9 = arith.constant 0 : i32
    %12 = arith.cmpi ne, %11, %c0_i32_9 : i32
    scf.if %12 {
      %c0_10 = arith.constant 0 : index
      %c0_11 = arith.constant 0 : index
      %13 = vector.load %arg11[%c0_10, %c0_11] : memref<256x16xf32, #tpu.memory_space<vmem>>, vector<256x16xf32>
      %c0_12 = arith.constant 0 : index
      %c0_13 = arith.constant 0 : index
      %14 = vector.load %arg5[%c0_12, %c0_13] : memref<256x1xf32, #tpu.memory_space<vmem>>, vector<256x1xf32>
      %15 = vector.broadcast %14 : vector<256x1xf32> to vector<256x16xf32>
      %16 = arith.mulf %13, %15 : vector<256x16xf32>
      %c0_14 = arith.constant 0 : index
      %c0_15 = arith.constant 0 : index
      %17 = vector.load %arg4[%c0_14, %c0_15] : memref<256x32xf32, #tpu.memory_space<vmem>>, vector<256x32xf32>
      %c0_16 = arith.constant 0 : index
      %c0_17 = arith.constant 0 : index
      %18 = vector.load %arg6[%c0_16, %c0_17] : memref<32x16xf32, #tpu.memory_space<vmem>>, vector<32x16xf32>
      %cst_18 = arith.constant dense<0.000000e+00> : vector<256x16xf32>
      %19 = tpu.matmul %17, %18, %cst_18 {dimension_numbers = #tpu.dot_dimension_numbers<[1], [0], [0], [1], [0, 0, 1, 1], [], []>} : vector<256x32xf32>, vector<32x16xf32>, vector<256x16xf32> -> vector<256x16xf32>
      %20 = arith.addf %16, %19 : vector<256x16xf32>
      %c0_19 = arith.constant 0 : index
      %c0_20 = arith.constant 0 : index
      %21 = vector.load %arg7[%c0_19, %c0_20] : memref<1x16xf32, #tpu.memory_space<vmem>>, vector<1x16xf32>
      %22 = vector.broadcast %21 : vector<1x16xf32> to vector<256x16xf32>
      %23 = arith.addf %20, %22 : vector<256x16xf32>
      %cst_21 = arith.constant 0.000000e+00 : f32
      %24 = vector.broadcast %cst_21 : f32 to vector<256x16xf32>
      %25 = arith.maximumf %23, %24 : vector<256x16xf32>
      %c0_22 = arith.constant 0 : index
      %c0_23 = arith.constant 0 : index
      %26 = vector.load %arg8[%c0_22, %c0_23] : memref<16x128xf32, #tpu.memory_space<vmem>>, vector<16x128xf32>
      %cst_24 = arith.constant dense<0.000000e+00> : vector<256x128xf32>
      %27 = tpu.matmul %25, %26, %cst_24 {dimension_numbers = #tpu.dot_dimension_numbers<[1], [0], [0], [1], [0, 0, 1, 1], [], []>} : vector<256x16xf32>, vector<16x128xf32>, vector<256x128xf32> -> vector<256x128xf32>
      %c0_25 = arith.constant 0 : index
      %c0_26 = arith.constant 0 : index
      %28 = vector.load %arg9[%c0_25, %c0_26] : memref<1x128xf32, #tpu.memory_space<vmem>>, vector<1x128xf32>
      %29 = vector.broadcast %28 : vector<1x128xf32> to vector<256x128xf32>
      %30 = arith.addf %27, %29 : vector<256x128xf32>
      %31 = arith.negf %30 : vector<256x128xf32>
      %32 = math.exp %31 : vector<256x128xf32>
      %cst_27 = arith.constant 1.000000e+00 : f32
      %33 = vector.broadcast %cst_27 : f32 to vector<256x128xf32>
      %34 = arith.addf %33, %32 : vector<256x128xf32>
      %35 = arith.divf %33, %34 : vector<256x128xf32>
      %c0_28 = arith.constant 0 : index
      %c0_29 = arith.constant 0 : index
      %36 = vector.load %arg10[%c0_28, %c0_29] : memref<256x128xf32, #tpu.memory_space<vmem>>, vector<256x128xf32>
      tpu.vector_store %arg10[%c0_28, %c0_29], %35 {strides = array<i32>} : memref<256x128xf32, #tpu.memory_space<vmem>>, vector<256x128xf32>,
    } else {
    }
    return
  }
  func.func @transform_0(%arg0: i32, %arg1: i32) -> (i32, i32) {
    %c0_i32 = arith.constant 0 : i32
    return %arg0, %arg1 : i32, i32
  }
  func.func @transform_1(%arg0: i32, %arg1: i32) -> (i32, i32) {
    %c0_i32 = arith.constant 0 : i32
    %c0_i32_0 = arith.constant 0 : i32
    return %arg1, %c0_i32 : i32, i32
  }
  func.func @transform_2(%arg0: i32, %arg1: i32) -> (i32, i32) {
    %c0_i32 = arith.constant 0 : i32
    %c0_i32_0 = arith.constant 0 : i32
    return %arg0, %c0_i32 : i32, i32
  }
  func.func @transform_3(%arg0: i32, %arg1: i32) -> (i32, i32) {
    %c0_i32 = arith.constant 0 : i32
    %c0_i32_0 = arith.constant 0 : i32
    return %arg0, %c0_i32 : i32, i32
  }
  func.func @transform_4(%arg0: i32, %arg1: i32) -> (i32, i32) {
    %c0_i32 = arith.constant 0 : i32
    %c0_i32_0 = arith.constant 0 : i32
    %c0_i32_1 = arith.constant 0 : i32
    return %c0_i32, %c0_i32_0 : i32, i32
  }
  func.func @transform_5(%arg0: i32, %arg1: i32) -> (i32, i32) {
    %c0_i32 = arith.constant 0 : i32
    %c0_i32_0 = arith.constant 0 : i32
    %c0_i32_1 = arith.constant 0 : i32
    return %c0_i32, %c0_i32_0 : i32, i32
  }
  func.func @transform_6(%arg0: i32, %arg1: i32) -> (i32, i32) {
    %c0_i32 = arith.constant 0 : i32
    %c0_i32_0 = arith.constant 0 : i32
    %c0_i32_1 = arith.constant 0 : i32
    return %c0_i32, %c0_i32_0 : i32, i32
  }
  func.func @transform_7(%arg0: i32, %arg1: i32) -> (i32, i32) {
    %c0_i32 = arith.constant 0 : i32
    %c0_i32_0 = arith.constant 0 : i32
    %c0_i32_1 = arith.constant 0 : i32
    return %c0_i32, %c0_i32_0 : i32, i32
  }
  func.func @transform_8(%arg0: i32, %arg1: i32) -> (i32, i32) {
    %c0_i32 = arith.constant 0 : i32
    %c0_i32_0 = arith.constant 0 : i32
    return %arg0, %c0_i32 : i32, i32
  }
}

</mosaic_0001>

<bundles_post_ra>
// kernel: gnn_linear_forward.2
= control target key start
LH: loop header
LB: loop body
LE: loop exit
PB: predicated region body
PF: predicated region fallthrough
CT: control target
= control target key end

     0   :  { %s2755_s24 = smov 0   ;;  %s2757_s25 = smov 0   ;;  %s3453_s0 = inlined_call_operand.vmem [shape: s8[512,512], index: 0, kind: input, shape index: {}]   ;;  %s3454_s1 = inlined_call_operand.vmem [shape: bf16[512,16], index: 1, kind: input, shape index: {}]   ;;  %s3455_s2 = inlined_call_operand.vmem [shape: f32[512,16], index: 2, kind: input, shape index: {}]   ;;  %s3456_s3 = inlined_call_operand.vmem [shape: f32[512,1], index: 3, kind: input, shape index: {}]   ;;  %s3457_s4 = inlined_call_operand.vmem [shape: f32[16,32], index: 4, kind: input, shape index: {}]   ;;  %s3458_s5 = inlined_call_operand.vmem [shape: f32[16,32], index: 5, kind: input, shape index: {}]   ;;  %s3459_s6 = inlined_call_operand.vmem [shape: f32[1,32], index: 6, kind: input, shape index: {}]   ;;  %s3460_s7 = inlined_call_operand.vmem [shape: f32[512,32], index: 7, kind: output, shape index: {}]  }
   0x1   :  { %s2759_s26 = smov 0  }
   0x2 LB: > { %s29_s27 = sadd.s32 1, %s2707_s25  ;;  %p2406_p0 = scmp.ge.s32.totalorder %s2711_s26, 1  ;;  %s2711_s26 = sphi %s2759_s26, %s17_s26   ;;  %s2707_s25 = sphi %s2757_s25, %s3462_s25   ;;  %s2703_s24 = sphi %s2755_s24, %s3461_s24  }
   0x3   : > { %p31_p1 = scmp.ge.s32.totalorder %s29_s27, 2  ;;  %p291_p2 = scmp.lt.s32.totalorder %s2711_s26, 3 }
   0x5   : > { %s3464_s27 = smov (%p31_p1, %s29_s27), 0  ;;  %p292_p3 = pnand %p2406_p0, %p291_p2 }
   0x6   : > { %s2407_s9 = sshll.u32 (!%p292_p3), %s2703_s24, 3  ;;  %s2410_s17 = sshll.u32 (!%p292_p3), %s2703_s24, 5 }
   0x7   : > { %295 = sbr.rel (%p292_p3) target bundleno = 701 (0x2bd), region = 48  ;;  %p345_p4 = scmp.lt.s32.totalorder (!%p292_p3), %s2407_s9, 15 }
   0x8   : > { %p362_p5 = scmp.lt.s32.totalorder (!%p292_p3), %s2410_s17, 63 }
   0xc   : > { %v2618_v0 = vld [vmem:[%s3454_s1 + $0x38] sm:$0xff]  ;;  %v2617_v2 = vld [vmem:[%s3454_s1 + $0x30] sm:$0xff]  ;;  %v2616_v4 = vld [vmem:[%s3454_s1 + $0x28] sm:$0xff]  ;;  %s3466_s9 = smov (!%p345_p4, %s2407_s9), 15  ;;  %s3468_s17 = smov (!%p362_p5, %s2410_s17), 63  ;;  %v2713_v61 = vmov 0  }
   0xd   : > { %v2626_v1 = vld [vmem:[%s3454_s1 + $0x78] sm:$0xff]  ;;  %2643 = vmatpush.bf16.msra.mxu2 %v2618_v0  ;;  %v2625_v3 = vld [vmem:[%s3454_s1 + $0x70] sm:$0xff]  ;;  %1056 = vmatpush.bf16.msra.mxu0 %v2618_v0  ;;  %v2624_v5 = vld [vmem:[%s3454_s1 + $0x68] sm:$0xff]  ;;  %s2610_s22 = sshll.u32 %s3466_s9, 5  ;;  %s2858_s24 = sshll.u32 %s3468_s17, 3  ;;  %vm383_vm0 = vcmask 130048  }
   0xe   : > { %2651 = vmatpush.bf16.msra.mxu3 %v2626_v1  ;;  %1145 = vmatpush.bf16.msra.mxu1 %v2626_v1  ;;  %v2615_v6 = vld [vmem:[%s3454_s1 + $0x20] sm:$0xff]  ;;  %v2614_v8 = vld [vmem:[%s3454_s1 + $0x18] sm:$0xff]  ;;  %s2809_s11 = scalar_lea.vmem %s3453_s0, %s2610_s22  ;;  %v2613_v10 = vld [vmem:[%s3454_s1 + $0x10] sm:$0xff]  ;;  %s2864_s28 = scalar_lea.vmem %s3456_s3, %s2858_s24  ;;  %vm2258_vm1 = vcmask 261120  }
   0xf   : > { %v2623_v7 = vld [vmem:[%s3454_s1 + $0x60] sm:$0xff]  ;;  %v2622_v9 = vld [vmem:[%s3454_s1 + $0x58] sm:$0xff]  ;;  %v2621_v11 = vld [vmem:[%s3454_s1 + $0x50] sm:$0xff]  ;;  %2685 = vset.pattern.permute.xlu0 %v2713_v61  ;;  %2686 = vset.pattern.permute.xlu1 %v2713_v61  ;;  %s3031_s15 = scalar_lea.vmem %s3455_s2, %s2858_s24  ;;  %s3246_s19 = scalar_lea.vmem %s3460_s7, %s2858_s24 }
  0x10   : > { %v464_v12 = vld [vmem:[%s2809_s11 + $0x80] sm:$0xff]  ;;  %v465_v13 = vld [vmem:[%s2809_s11 + $0x88] sm:$0xff]  ;;  %v2634_v26 = vld [vmem:[%s3454_s1 + $0xb8] sm:$0xff]  ;;  %2687 = vset.pattern.permute.xlu2 %v2713_v61 }
  0x11   : > { %2644 = vmatpush.bf16.msra.mxu2 %v2617_v2  ;;  %1057 = vmatpush.bf16.msra.mxu0 %v2617_v2  ;;  %v544_v14 = vunpack.c.0.s8 %v464_v12  ;;  %v548_v15 = vunpack.c.1.s8 %v464_v12  ;;  %v545_v16 = vunpack.c.0.s8 %v465_v13  ;;  %v549_v17 = vunpack.c.1.s8 %v465_v13  ;;  %v2612_v18 = vld [vmem:[%s3454_s1 + $0x8] sm:$0xff]  ;;  %v2611_v24 = vld [vmem:[%s3454_s1] sm:$0xff]  ;;  %v2642_v27 = vld [vmem:[%s3454_s1 + $0xf8] sm:$0xff] }
  0x12   : > { %2652 = vmatpush.bf16.msra.mxu3 %v2625_v3  ;;  %1146 = vmatpush.bf16.msra.mxu1 %v2625_v3  ;;  %v2620_v19 = vld [vmem:[%s3454_s1 + $0x48] sm:$0xff]  ;;  %v2619_v25 = vld [vmem:[%s3454_s1 + $0x40] sm:$0xff]  ;;  %v2633_v30 = vld [vmem:[%s3454_s1 + $0xb0] sm:$0xff]  ;;  %v552_v34 = vunpack.c.2.s8 %v464_v12  ;;  %v556_v35 = vunpack.c.3.s8 %v464_v12  ;;  %v553_v36 = vunpack.c.2.s8 %v465_v13  ;;  %v557_v37 = vunpack.c.3.s8 %v465_v13 }
  0x13   : > { %v672_v20 = vcvt.s32.f32 %v544_v14  ;;  %v676_v21 = vcvt.s32.f32 %v548_v15  ;;  %v673_v22 = vcvt.s32.f32 %v545_v16  ;;  %v677_v23 = vcvt.s32.f32 %v549_v17  ;;  %v2641_v31 = vld [vmem:[%s3454_s1 + $0xf0] sm:$0xff]  ;;  %v2632_v32 = vld [vmem:[%s3454_s1 + $0xa8] sm:$0xff]  ;;  %v2631_v44 = vld [vmem:[%s3454_s1 + $0xa0] sm:$0xff] }
  0x14   : > { %v2640_v33 = vld [vmem:[%s3454_s1 + $0xe8] sm:$0xff]  ;;  %v680_v38 = vcvt.s32.f32 %v552_v34  ;;  %v684_v39 = vcvt.s32.f32 %v556_v35  ;;  %v681_v40 = vcvt.s32.f32 %v553_v36  ;;  %v685_v41 = vcvt.s32.f32 %v557_v37  ;;  %v2639_v45 = vld [vmem:[%s3454_s1 + $0xe0] sm:$0xff]  ;;  %v2630_v58 = vld [vmem:[%s3454_s1 + $0x98] sm:$0xff] }
  0x15   : > { %2645 = vmatpush.bf16.msra.mxu2 %v2616_v4  ;;  %1058 = vmatpush.bf16.msra.mxu0 %v2616_v4  ;;  %v768_v28 = vpack.c.bf16 %v676_v21, %v672_v20  ;;  %v769_v29 = vpack.c.bf16 %v677_v23, %v673_v22  ;;  %v468_v46 = vld [vmem:[%s2809_s11 + $0xa0] sm:$0xff]  ;;  %v469_v47 = vld [vmem:[%s2809_s11 + $0xa8] sm:$0xff]  ;;  %v2638_v59 = vld [vmem:[%s3454_s1 + $0xd8] sm:$0xff] }
  0x16   : > { %2653 = vmatpush.bf16.msra.mxu3 %v2624_v5  ;;  %1147 = vmatpush.bf16.msra.mxu1 %v2624_v5  ;;  %v772_v42 = vpack.c.bf16 %v684_v39, %v680_v38  ;;  %v773_v43 = vpack.c.bf16 %v685_v41, %v681_v40  ;;  %v560_v48 = vunpack.c.0.s8 %v468_v46  ;;  %v564_v49 = vunpack.c.1.s8 %v468_v46  ;;  %v1512_v60 = vld [vmem:[%s2864_s28] sm:$0xff]  ;;  %v473_v12 = vld [vmem:[%s2809_s11 + $0xc8] sm:$0xff]  ;;  %v1514_v13 = vld [vmem:[%s2864_s28 + $0x10] sm:$0xff] }
  0x17   : > { %v561_v50 = vunpack.c.0.s8 %v469_v47  ;;  %v565_v51 = vunpack.c.1.s8 %v469_v47  ;;  %1546 = vperm.xlu0 %2685, %v1512_v60   ;;  %v568_v62 = vunpack.c.2.s8 %v468_v46  ;;  %v572_v63 = vunpack.c.3.s8 %v468_v46  ;;  %1556 = vperm.xlu1 %2686, %v1514_v13   ;;  %v1524_v38 = vld [vmem:[%s2864_s28 + $0x60] sm:$0xff]  ;;  %v1527_v46 = vld [vmem:[%s2864_s28 + $0x78] sm:$0xff] }
  0x18   : > { %v688_v52 = vcvt.s32.f32 %v560_v48  ;;  %v692_v53 = vcvt.s32.f32 %v564_v49  ;;  %v569_v0 = vunpack.c.2.s8 %v469_v47  ;;  %v573_v1 = vunpack.c.3.s8 %v469_v47  ;;  %v476_v41 = vld [vmem:[%s2809_s11 + $0xe0] sm:$0xff]  ;;  %v449_v48 = vld [vmem:[%s2809_s11 + $0x8] sm:$0xff] }
  0x19   : > { %2646 = vmatpush.bf16.msra.mxu2 %v2615_v6  ;;  %1059 = vmatpush.bf16.msra.mxu0 %v2615_v6  ;;  %v689_v54 = vcvt.s32.f32 %v561_v50  ;;  %v693_v55 = vcvt.s32.f32 %v565_v51  ;;  %v696_v2 = vcvt.s32.f32 %v568_v62  ;;  %v700_v3 = vcvt.s32.f32 %v572_v63  ;;  %v448_v47 = vld [vmem:[%s2809_s11] sm:$0xff]  ;;  %v1525_v63 = vld [vmem:[%s2864_s28 + $0x68] sm:$0xff] }
  0x1a   : > { %2654 = vmatpush.bf16.msra.mxu3 %v2623_v7  ;;  %1148 = vmatpush.bf16.msra.mxu1 %v2623_v7  ;;  %v776_v56 = vpack.c.bf16 %v692_v53, %v688_v52  ;;  %v697_v4 = vcvt.s32.f32 %v569_v0  ;;  %v701_v5 = vcvt.s32.f32 %v573_v1  ;;  %v577_v16 = vunpack.c.0.s8 %v473_v12 }
  0x1b   : > { %v777_v57 = vpack.c.bf16 %v693_v55, %v689_v54  ;;  %v780_v6 = vpack.c.bf16 %v700_v3, %v696_v2  ;;  %v581_v17 = vunpack.c.1.s8 %v473_v12  ;;  %v480_v49 = vunpack.c.0.s8 %v448_v47 }
  0x1c   : > { %v781_v7 = vpack.c.bf16 %v701_v5, %v697_v4  ;;  %v705_v21 = vcvt.s32.f32 %v577_v16  ;;  %v484_v50 = vunpack.c.1.s8 %v448_v47  ;;  %v481_v51 = vunpack.c.0.s8 %v449_v48  ;;  %v1530_v4 = vld [vmem:[%s2864_s28 + $0x90] sm:$0xff] }
  0x1d   : > { %2647 = vmatpush.bf16.msra.mxu2 %v2614_v8  ;;  %1060 = vmatpush.bf16.msra.mxu0 %v2614_v8  ;;  %v2629_v8 = vld [vmem:[%s3454_s1 + $0x90] sm:$0xff]  ;;  %v709_v22 = vcvt.s32.f32 %v581_v17  ;;  %v485_v52 = vunpack.c.1.s8 %v449_v48  ;;  %v592_v53 = vunpack.c.0.s8 %v476_v41  ;;  %v596_v54 = vunpack.c.1.s8 %v476_v41 }
  0x1e   : > { %2655 = vmatpush.bf16.msra.mxu3 %v2622_v9  ;;  %1149 = vmatpush.bf16.msra.mxu1 %v2622_v9  ;;  %v2637_v9 = vld [vmem:[%s3454_s1 + $0xd0] sm:$0xff]  ;;  %v488_v13 = vunpack.c.2.s8 %v448_v47  ;;  %v493_v16 = vunpack.c.3.s8 %v449_v48 }
  0x1f   : > { %v613_v60 = vcvt.s32.f32 %v485_v52  ;;  %v720_v0 = vcvt.s32.f32 %v592_v53  ;;  %v724_v1 = vcvt.s32.f32 %v596_v54 }
  0x21   : > { %2648 = vmatpush.bf16.msra.mxu2 %v2613_v10  ;;  %1061 = vmatpush.bf16.msra.mxu0 %v2613_v10  ;;  %v1513_v10 = vld [vmem:[%s2864_s28 + $0x8] sm:$0xff]  ;;  %v792_v5 = vpack.c.bf16 %v724_v1, %v720_v0 }
  0x22   : > { %2656 = vmatpush.bf16.msra.mxu3 %v2621_v11  ;;  %1150 = vmatpush.bf16.msra.mxu1 %v2621_v11  ;;  %v472_v11 = vld [vmem:[%s2809_s11 + $0xc0] sm:$0xff] }
  0x23   : > { %1551 = vperm.xlu0 %2685, %v1513_v10   ;;  %v576_v14 = vunpack.c.0.s8 %v472_v11  ;;  %v580_v15 = vunpack.c.1.s8 %v472_v11 }
  0x25   : > { %2649 = vmatpush.bf16.msra.mxu2 %v2612_v18  ;;  %1062 = vmatpush.bf16.msra.mxu0 %v2612_v18  ;;  %v1518_v18 = vld [vmem:[%s2864_s28 + $0x30] sm:$0xff]  ;;  %v708_v20 = vcvt.s32.f32 %v580_v15  ;;  %v489_v15 = vunpack.c.2.s8 %v449_v48 }
  0x26   : > { %2657 = vmatpush.bf16.msra.mxu3 %v2620_v19  ;;  %1151 = vmatpush.bf16.msra.mxu1 %v2620_v19  ;;  %v704_v19 = vcvt.s32.f32 %v576_v14  ;;  %v492_v14 = vunpack.c.3.s8 %v448_v47 }
  0x28   : > { %v784_v23 = vpack.c.bf16 %v708_v20, %v704_v19 }
  0x29   : > { %2650 = vmatpush.bf16.msra.mxu2 %v2611_v24  ;;  %1063 = vmatpush.bf16.msra.mxu0 %v2611_v24  ;;  %v785_v24 = vpack.c.bf16 %v709_v22, %v705_v21  ;;  %v616_v21 = vcvt.s32.f32 %v488_v13  ;;  %v620_v22 = vcvt.s32.f32 %v492_v14 }
  0x2a   : > { %2658 = vmatpush.bf16.msra.mxu3 %v2619_v25  ;;  %1152 = vmatpush.bf16.msra.mxu1 %v2619_v25  ;;  %v2628_v25 = vld [vmem:[%s3454_s1 + $0x88] sm:$0xff] }
  0x2b   : > { %1576 = vperm.xlu0 %2685, %v1518_v18  }
  0x2c   : > { %1104 = vmatmul.bf16.vlgmr.msra.gmra.mxu2 %v768_v28  ;;  %v1521_v28 = vld [vmem:[%s2864_s28 + $0x48] sm:$0xff] }
  0x2d   : > { %1234 = vmatpush.bf16.msrb.mxu2 %v2634_v26  ;;  %1193 = vmatmul.bf16.vlgmr.msra.gmra.mxu3 %v769_v29  ;;  %v2636_v26 = vld [vmem:[%s3454_s1 + $0xc8] sm:$0xff]  ;;  %v584_v29 = vunpack.c.2.s8 %v472_v11 }
  0x2e   : > { %1323 = vmatpush.bf16.msrb.mxu3 %v2642_v27  ;;  %v1515_v27 = vld [vmem:[%s2864_s28 + $0x18] sm:$0xff] }
  0x2f   : > { %1561 = vperm.xlu1 %2686, %v1515_v27   ;;  %v712_v34 = vcvt.s32.f32 %v584_v29  ;;  %v1516_v29 = vld [vmem:[%s2864_s28 + $0x20] sm:$0xff] }
  0x30   : > { %1566 = vperm.xlu2 %2687, %v1516_v29   ;;  %v1543_v29 = vld [vmem:[%s2864_s28 + $0xf8] sm:$0xff] }
  0x31   : > { %1235 = vmatpush.bf16.msrb.mxu2 %v2633_v30  ;;  %v588_v30 = vunpack.c.3.s8 %v472_v11  ;;  %v1528_v11 = vld [vmem:[%s2864_s28 + $0x80] sm:$0xff] }
  0x32   : > { %1324 = vmatpush.bf16.msrb.mxu3 %v2641_v31  ;;  %v585_v31 = vunpack.c.2.s8 %v473_v12 }
  0x33   : > { %1591 = vperm.xlu0 %2685, %v1521_v28   ;;  %v716_v35 = vcvt.s32.f32 %v588_v30  ;;  %v1531_v30 = vld [vmem:[%s2864_s28 + $0x98] sm:$0xff] }
  0x34   : > { %v713_v36 = vcvt.s32.f32 %v585_v31  ;;  %v1536_v31 = vld [vmem:[%s2864_s28 + $0xc0] sm:$0xff] }
  0x35   : > { %1236 = vmatpush.bf16.msrb.mxu2 %v2632_v32  ;;  %v589_v32 = vunpack.c.3.s8 %v473_v12  ;;  %v788_v39 = vpack.c.bf16 %v716_v35, %v712_v34  ;;  %v1533_v12 = vld [vmem:[%s2864_s28 + $0xa8] sm:$0xff] }
  0x36   : > { %1325 = vmatpush.bf16.msrb.mxu3 %v2640_v33  ;;  %v1519_v33 = vld [vmem:[%s2864_s28 + $0x38] sm:$0xff] }
  0x37   : > { %v717_v37 = vcvt.s32.f32 %v589_v32  ;;  %1581 = vperm.xlu1 %2686, %v1519_v33   ;;  %v450_v32 = vld [vmem:[%s2809_s11 + $0x10] sm:$0xff]  ;;  %v451_v33 = vld [vmem:[%s2809_s11 + $0x18] sm:$0xff] }
  0x38   : > { %v482_v34 = vunpack.c.0.s8 %v450_v32  ;;  %v486_v35 = vunpack.c.1.s8 %v450_v32 }
  0x39   : > { %1237 = vmatpush.bf16.msrb.mxu2 %v2631_v44  ;;  %v789_v40 = vpack.c.bf16 %v717_v37, %v713_v36  ;;  %v2635_v44 = vld [vmem:[%s3454_s1 + $0xc0] sm:$0xff]  ;;  %v483_v36 = vunpack.c.0.s8 %v451_v33  ;;  %v487_v37 = vunpack.c.1.s8 %v451_v33 }
  0x3a   : > { %1326 = vmatpush.bf16.msrb.mxu3 %v2639_v45  ;;  %v1522_v45 = vld [vmem:[%s2864_s28 + $0x50] sm:$0xff]  ;;  %v610_v47 = vcvt.s32.f32 %v482_v34  ;;  %v614_v48 = vcvt.s32.f32 %v486_v35 }
  0x3b   : > { %1606 = vperm.xlu0 %2685, %v1524_v38   ;;  %v1771_v38 = vld [vmem:[%s3458_s5 + $0x8] sm:$0xff]  ;;  %v615_v52 = vcvt.s32.f32 %v487_v37 }
  0x3c   : > { %1109 = vmatmul.bf16.gmra.mxu2 %v772_v42  ;;  %v477_v42 = vld [vmem:[%s2809_s11 + $0xe8] sm:$0xff]  ;;  %1882 = vmatpush.msrb.mxu0 %v1771_v38 }
  0x3d   : > { %1198 = vmatmul.bf16.gmra.mxu3 %v773_v43  ;;  %1238 = vmatpush.bf16.msrb.mxu2 %v2630_v58  ;;  %v2627_v43 = vld [vmem:[%s3454_s1 + $0x80] sm:$0xff]  ;;  %v593_v55 = vunpack.c.0.s8 %v477_v42  ;;  %v612_v58 = vcvt.s32.f32 %v484_v50  ;;  %v605_v10 = vunpack.c.3.s8 %v477_v42 }
  0x3e   : > { %1327 = vmatpush.bf16.msrb.mxu3 %v2638_v59  ;;  %v609_v59 = vcvt.s32.f32 %v481_v51  ;;  %v611_v51 = vcvt.s32.f32 %v483_v36 }
  0x3f   : > { %1596 = vperm.xlu1 %2686, %v1522_v45   ;;  %v721_v2 = vcvt.s32.f32 %v593_v55  ;;  %v733_v20 = vcvt.s32.f32 %v605_v10 }
  0x40   : > { %v737_v62 = vpack.c.bf16 %v613_v60, %v609_v59  ;;  %v738_v59 = vpack.c.bf16 %v614_v48, %v610_v47  ;;  %v739_v60 = vpack.c.bf16 %v615_v52, %v611_v51 }
  0x41   : > { %1239 = vmatpush.bf16.msrb.mxu2 %v2629_v8  ;;  %v604_v8 = vunpack.c.3.s8 %v476_v41 }
  0x42   : > { %1328 = vmatpush.bf16.msrb.mxu3 %v2637_v9  ;;  %1153 = vmatmul.bf16.vlgmr.msra.gmra.mxu1 %v737_v62  ;;  %v601_v9 = vunpack.c.2.s8 %v477_v42  ;;  %v1537_v62 = vld [vmem:[%s2864_s28 + $0xc8] sm:$0xff] }
  0x43   : > { %1621 = vperm.xlu0 %2685, %v1527_v46   ;;  %v732_v18 = vcvt.s32.f32 %v604_v8  ;;  %v453_v46 = vld [vmem:[%s2809_s11 + $0x28] sm:$0xff]  ;;  %v1540_v8 = vld [vmem:[%s2864_s28 + $0xe0] sm:$0xff] }
  0x44   : > { %v729_v19 = vcvt.s32.f32 %v601_v9  ;;  %v501_v50 = vunpack.c.1.s8 %v453_v46 }
  0x45   : > { %1240 = vmatpush.bf16.msrb.mxu2 %v2628_v25  ;;  %v740_v25 = vpack.c.bf16 %v620_v22, %v616_v21 }
  0x46   : > { %1329 = vmatpush.bf16.msrb.mxu3 %v2636_v26  ;;  %v797_v28 = vpack.c.bf16 %v733_v20, %v729_v19 }
  0x47   : > { %1611 = vperm.xlu1 %2686, %v1525_v63   ;;  %v1542_v63 = vld [vmem:[%s2864_s28 + $0xf0] sm:$0xff] }
  0x49   : > { %1241 = vmatpush.bf16.msrb.mxu2 %v2627_v43  ;;  %v452_v43 = vld [vmem:[%s2809_s11 + $0x20] sm:$0xff] }
  0x4a   : > { %1330 = vmatpush.bf16.msrb.mxu3 %v2635_v44  ;;  %v496_v44 = vunpack.c.0.s8 %v452_v43  ;;  %v500_v45 = vunpack.c.1.s8 %v452_v43  ;;  %v504_v9 = vunpack.c.2.s8 %v452_v43  ;;  %v508_v10 = vunpack.c.3.s8 %v452_v43 }
  0x4b   : > { %1636 = vperm.xlu0 %2685, %v1530_v4   ;;  %v491_v4 = vunpack.c.2.s8 %v451_v33 }
  0x4c   : > { %1114 = vmatmul.bf16.gmra.mxu2 %v776_v56  ;;  %v597_v56 = vunpack.c.1.s8 %v477_v42  ;;  %v1539_v42 = vld [vmem:[%s2864_s28 + $0xd8] sm:$0xff]  ;;  %v624_v53 = vcvt.s32.f32 %v496_v44  ;;  %v628_v54 = vcvt.s32.f32 %v500_v45 }
  0x4d   : > { %1203 = vmatmul.bf16.gmra.mxu3 %v777_v57  ;;  %v608_v57 = vcvt.s32.f32 %v480_v49  ;;  %v497_v49 = vunpack.c.0.s8 %v453_v46 }
  0x4e   : > { %v725_v3 = vcvt.s32.f32 %v597_v56  ;;  %v629_v56 = vcvt.s32.f32 %v501_v50 }
  0x4f   : > { %v736_v61 = vpack.c.bf16 %v612_v58, %v608_v57  ;;  %1626 = vperm.xlu1 %2686, %v1528_v11   ;;  %v625_v55 = vcvt.s32.f32 %v497_v49  ;;  %v744_v57 = vpack.c.bf16 %v628_v54, %v624_v53  ;;  %v505_v11 = vunpack.c.2.s8 %v453_v46 }
  0x51   : > { %1064 = vmatmul.bf16.vlgmr.msra.gmra.mxu0 %v736_v61  ;;  %v745_v58 = vpack.c.bf16 %v629_v56, %v625_v55  ;;  %v1520_v61 = vld [vmem:[%s2864_s28 + $0x40] sm:$0xff]  ;;  %v633_v19 = vcvt.s32.f32 %v505_v11 }
  0x53   : > { %1651 = vperm.xlu0 %2685, %v1533_v12   ;;  %v509_v12 = vunpack.c.3.s8 %v453_v46 }
  0x55   : > { %v637_v20 = vcvt.s32.f32 %v509_v12 }
  0x57   : > { %1641 = vperm.xlu1 %2686, %v1531_v30   ;;  %v749_v22 = vpack.c.bf16 %v637_v20, %v633_v19  ;;  %v454_v30 = vld [vmem:[%s2809_s11 + $0x30] sm:$0xff] }
  0x58   : > { %v498_v34 = vunpack.c.0.s8 %v454_v30  ;;  %v502_v35 = vunpack.c.1.s8 %v454_v30 }
  0x5a   : > { %v626_v46 = vcvt.s32.f32 %v498_v34  ;;  %v630_v47 = vcvt.s32.f32 %v502_v35 }
  0x5b   : > { %1666 = vperm.xlu0 %2685, %v1536_v31   ;;  %v455_v31 = vld [vmem:[%s2809_s11 + $0x38] sm:$0xff] }
  0x5c   : > { %1119 = vmatmul.bf16.gmra.mxu2 %v780_v6  ;;  %v793_v6 = vpack.c.bf16 %v725_v3, %v721_v2  ;;  %v490_v2 = vunpack.c.2.s8 %v450_v32  ;;  %v494_v3 = vunpack.c.3.s8 %v450_v32  ;;  %v499_v36 = vunpack.c.0.s8 %v455_v31 }
  0x5d   : > { %1208 = vmatmul.bf16.gmra.mxu3 %v781_v7  ;;  %v600_v7 = vunpack.c.2.s8 %v476_v41  ;;  %v1534_v41 = vld [vmem:[%s2864_s28 + $0xb0] sm:$0xff]  ;;  %v503_v37 = vunpack.c.1.s8 %v455_v31 }
  0x5e   : > { %v618_v13 = vcvt.s32.f32 %v490_v2  ;;  %v622_v14 = vcvt.s32.f32 %v494_v3  ;;  %v627_v48 = vcvt.s32.f32 %v499_v36  ;;  %v507_v2 = vunpack.c.2.s8 %v455_v31 }
  0x5f   : > { %v728_v17 = vcvt.s32.f32 %v600_v7  ;;  %1656 = vperm.xlu1 %2686, %v1534_v41   ;;  %v1523_v7 = vld [vmem:[%s2864_s28 + $0x58] sm:$0xff]  ;;  %v457_v41 = vld [vmem:[%s2809_s11 + $0x48] sm:$0xff]  ;;  %v631_v49 = vcvt.s32.f32 %v503_v37  ;;  %v511_v3 = vunpack.c.3.s8 %v455_v31  ;;  %v1770_v37 = vld [vmem:[%s3458_s5] sm:$0xff] }
  0x60   : > { %v513_v44 = vunpack.c.0.s8 %v457_v41  ;;  %v517_v45 = vunpack.c.1.s8 %v457_v41  ;;  %1883 = vmatpush.msrb.mxu0 %v1770_v37 }
  0x61   : > { %v796_v27 = vpack.c.bf16 %v732_v18, %v728_v17  ;;  %1069 = vmatmul.bf16.gmra.mxu0 %v740_v25  ;;  %v632_v17 = vcvt.s32.f32 %v504_v9  ;;  %v636_v18 = vcvt.s32.f32 %v508_v10  ;;  %v521_v9 = vunpack.c.2.s8 %v457_v41 }
  0x62   : > { %v641_v52 = vcvt.s32.f32 %v513_v44  ;;  %v645_v53 = vcvt.s32.f32 %v517_v45  ;;  %v525_v10 = vunpack.c.3.s8 %v457_v41  ;;  %v460_v41 = vld [vmem:[%s2809_s11 + $0x60] sm:$0xff] }
  0x63   : > { %1681 = vperm.xlu0 %2685, %v1539_v42   ;;  %v748_v21 = vpack.c.bf16 %v636_v18, %v632_v17  ;;  %v649_v17 = vcvt.s32.f32 %v521_v9  ;;  %v532_v44 = vunpack.c.1.s8 %v460_v41  ;;  %v540_v9 = vunpack.c.3.s8 %v460_v41 }
  0x64   : > { %v753_v55 = vpack.c.bf16 %v645_v53, %v641_v52  ;;  %v653_v18 = vcvt.s32.f32 %v525_v10 }
  0x65   : > { %v660_v52 = vcvt.s32.f32 %v532_v44 }
  0x66   : > { %v757_v20 = vpack.c.bf16 %v653_v18, %v649_v17  ;;  %v668_v17 = vcvt.s32.f32 %v540_v9 }
  0x67   : > { %1671 = vperm.xlu1 %2686, %v1537_v62  }
  0x6b   : > { %1696 = vperm.xlu0 %2685, %v1542_v63  }
  0x6c   : > { %1124 = vmatmul.bf16.gmra.mxu2 %v784_v23  ;;  %v617_v23 = vcvt.s32.f32 %v489_v15  ;;  %v619_v15 = vcvt.s32.f32 %v491_v4 }
  0x6d   : > { %1213 = vmatmul.bf16.gmra.mxu3 %v785_v24  ;;  %v621_v24 = vcvt.s32.f32 %v493_v16 }
  0x6f   : > { %v741_v26 = vpack.c.bf16 %v621_v24, %v617_v23  ;;  %1686 = vperm.xlu1 %2686, %v1540_v8  }
  0x71   : > { %1158 = vmatmul.bf16.gmra.mxu1 %v741_v26  ;;  %1074 = vmatmul.bf16.gmra.mxu0 %v744_v57  ;;  %v742_v26 = vpack.c.bf16 %v622_v14, %v618_v13  ;;  %v635_v13 = vcvt.s32.f32 %v507_v2  ;;  %v639_v14 = vcvt.s32.f32 %v511_v3 }
  0x77   : > { %1701 = vperm.xlu1 %2686, %v1543_v29   ;;  %v459_v29 = vld [vmem:[%s2809_s11 + $0x58] sm:$0xff] }
  0x78   : > { %v515_v34 = vunpack.c.0.s8 %v459_v29  ;;  %v519_v35 = vunpack.c.1.s8 %v459_v29  ;;  %v523_v3 = vunpack.c.2.s8 %v459_v29 }
  0x7c   : > { %1129 = vmatmul.bf16.gmra.mxu2 %v788_v39  ;;  %v1737_v39 = vld [vmem:[%s3457_s4 + $0x8] sm:$0xff] }
  0x7d   : > { %1218 = vmatmul.bf16.gmra.mxu3 %v789_v40  ;;  %v1517_v40 = vld [vmem:[%s2864_s28 + $0x28] sm:$0xff]  ;;  %2091 = vmatpush.msrb.mxu1 %v1737_v39 }
  0x7e   : > { %1571 = vperm.xlu2 %2687, %v1517_v40   ;;  %v1529_v39 = vld [vmem:[%s2864_s28 + $0x88] sm:$0xff]  ;;  %v456_v40 = vld [vmem:[%s2809_s11 + $0x40] sm:$0xff] }
  0x7f   : > { %v512_v42 = vunpack.c.0.s8 %v456_v40  ;;  %v516_v43 = vunpack.c.1.s8 %v456_v40  ;;  %v524_v8 = vunpack.c.3.s8 %v456_v40 }
  0x81   : > { %1163 = vmatmul.bf16.gmra.mxu1 %v745_v58  ;;  %1079 = vmatmul.bf16.gmra.mxu0 %v748_v21  ;;  %v640_v50 = vcvt.s32.f32 %v512_v42  ;;  %v644_v51 = vcvt.s32.f32 %v516_v43  ;;  %v461_v42 = vld [vmem:[%s2809_s11 + $0x68] sm:$0xff]  ;;  %v528_v43 = vunpack.c.0.s8 %v460_v41 }
  0x82   : > { %v529_v45 = vunpack.c.0.s8 %v461_v42  ;;  %v537_v10 = vunpack.c.2.s8 %v461_v42 }
  0x83   : > { %v752_v54 = vpack.c.bf16 %v644_v51, %v640_v50  ;;  %v647_v50 = vcvt.s32.f32 %v519_v35  ;;  %v656_v51 = vcvt.s32.f32 %v528_v43 }
  0x84   : > { %v657_v53 = vcvt.s32.f32 %v529_v45  ;;  %v665_v18 = vcvt.s32.f32 %v537_v10 }
  0x86   : > { %1586 = vperm.xlu2 %2687, %v1520_v61   ;;  %v1532_v61 = vld [vmem:[%s2864_s28 + $0xa0] sm:$0xff] }
  0x8c   : > { %1134 = vmatmul.bf16.gmra.mxu2 %v792_v5  ;;  %v495_v5 = vunpack.c.3.s8 %v451_v33 }
  0x8d   : > { %1223 = vmatmul.bf16.gmra.mxu3 %v793_v6 }
  0x8e   : > { %1601 = vperm.xlu2 %2687, %v1523_v7   ;;  %v623_v16 = vcvt.s32.f32 %v495_v5  ;;  %v1535_v5 = vld [vmem:[%s2864_s28 + $0xb8] sm:$0xff]  ;;  %v520_v7 = vunpack.c.2.s8 %v456_v40  ;;  %v1541_v40 = vld [vmem:[%s2864_s28 + $0xe8] sm:$0xff] }
  0x91   : > { %1168 = vmatmul.bf16.gmra.mxu1 %v749_v22  ;;  %1084 = vmatmul.bf16.gmra.mxu0 %v752_v54 }
  0x9c   : > { %1139 = vmatmul.bf16.gmra.mxu2 %v796_v27  ;;  %v743_v27 = vpack.c.bf16 %v623_v16, %v619_v15  ;;  %v648_v15 = vcvt.s32.f32 %v520_v7  ;;  %v652_v16 = vcvt.s32.f32 %v524_v8  ;;  %v536_v8 = vunpack.c.2.s8 %v460_v41 }
  0x9d   : > { %1228 = vmatmul.bf16.gmra.mxu3 %v797_v28  ;;  %v1526_v28 = vld [vmem:[%s2864_s28 + $0x70] sm:$0xff] }
  0x9e   : > { %1616 = vperm.xlu2 %2687, %v1526_v28   ;;  %v756_v19 = vpack.c.bf16 %v652_v16, %v648_v15  ;;  %v458_v28 = vld [vmem:[%s2809_s11 + $0x50] sm:$0xff]  ;;  %v664_v16 = vcvt.s32.f32 %v536_v8 }
  0x9f   : > { %v526_v2 = vunpack.c.3.s8 %v458_v28 }
  0xa1   : > { %1173 = vmatmul.bf16.gmra.mxu1 %v753_v55  ;;  %1089 = vmatmul.bf16.gmra.mxu0 %v756_v19  ;;  %v760_v55 = vpack.c.bf16 %v660_v52, %v656_v51  ;;  %v2714_v51 = vmov 0.0  }
  0xa2   : > { %384 = vst.msk [vmem:[#allocation2] sm:$0xff] %vm383_vm0, %v2714_v51 }
  0xa3   : > { %385 = vst.msk [vmem:[#allocation2 + $0x8] sm:$0xff] %vm383_vm0, %v2714_v51 }
  0xa4   : > { %386 = vst.msk [vmem:[#allocation2 + $0x10] sm:$0xff] %vm383_vm0, %v2714_v51 }
  0xa5   : > { %387 = vst.msk [vmem:[#allocation2 + $0x18] sm:$0xff] %vm383_vm0, %v2714_v51 }
  0xa6   : > { %1631 = vperm.xlu2 %2687, %v1529_v39   ;;  %v1736_v39 = vld [vmem:[%s3457_s4] sm:$0xff]  ;;  %388 = vst.msk [vmem:[#allocation2 + $0x20] sm:$0xff] %vm383_vm0, %v2714_v51 }
  0xa7   : > { %2092 = vmatpush.msrb.mxu1 %v1736_v39  ;;  %389 = vst.msk [vmem:[#allocation2 + $0x28] sm:$0xff] %vm383_vm0, %v2714_v51 }
  0xa8   : > { %390 = vst.msk [vmem:[#allocation2 + $0x30] sm:$0xff] %vm383_vm0, %v2714_v51 }
  0xa9   : > { %391 = vst.msk [vmem:[#allocation2 + $0x38] sm:$0xff] %vm383_vm0, %v2714_v51 }
  0xaa   : > { %392 = vst.msk [vmem:[#allocation2 + $0x40] sm:$0xff] %vm383_vm0, %v2714_v51 }
  0xab   : > { %393 = vst.msk [vmem:[#allocation2 + $0x48] sm:$0xff] %vm383_vm0, %v2714_v51 }
  0xac   : > { %1242 = vmatmul.bf16.vlgmr.msrb.gmra.mxu2 %v738_v59  ;;  %v746_v59 = vpack.c.bf16 %v630_v47, %v626_v46  ;;  %v533_v46 = vunpack.c.1.s8 %v461_v42  ;;  %394 = vst.msk [vmem:[#allocation2 + $0x50] sm:$0xff] %vm383_vm0, %v2714_v51 }
  0xad   : > { %1331 = vmatmul.bf16.vlgmr.msrb.gmra.mxu3 %v739_v60  ;;  %v747_v60 = vpack.c.bf16 %v631_v49, %v627_v48  ;;  %v643_v49 = vcvt.s32.f32 %v515_v34  ;;  %395 = vst.msk [vmem:[#allocation2 + $0x58] sm:$0xff] %vm383_vm0, %v2714_v51 }
  0xae   : > { %1646 = vperm.xlu2 %2687, %v1532_v61   ;;  %v661_v54 = vcvt.s32.f32 %v533_v46  ;;  %396 = vst.msk [vmem:[#allocation2 + $0x60] sm:$0xff] %vm383_vm0, %v2714_v51 }
  0xaf   : > { %v1105_v0 = vpop.f32.mrf.mxu2  ;;  %397 = vst.msk [vmem:[#allocation2 + $0x68] sm:$0xff] %vm383_vm0, %v2714_v51 }
  0xb0   : > { %v1194_v1 = vpop.f32.mrf.mxu3  ;;  %398 = vst.msk [vmem:[#allocation2 + $0x70] sm:$0xff] %vm383_vm0, %v2714_v51 }
  0xb1   : > { %v2929_v6 = vadd.f32 %v1194_v1, %v1105_v0  ;;  %v506_v0 = vunpack.c.2.s8 %v454_v30  ;;  %v510_v1 = vunpack.c.3.s8 %v454_v30  ;;  %1178 = vmatmul.bf16.gmra.mxu1 %v757_v20  ;;  %1094 = vmatmul.bf16.gmra.mxu0 %v760_v55  ;;  %v764_v20 = vpack.c.bf16 %v668_v17, %v664_v16  ;;  %399 = vst.msk [vmem:[#allocation2 + $0x78] sm:$0xff] %vm383_vm0, %v2714_v51 }
  0xb2   : > { %400 = vst.msk [vmem:[#allocation2 + $0x80] sm:$0xff] %vm383_vm0, %v2714_v51 }
  0xb3   : > { %v634_v11 = vcvt.s32.f32 %v506_v0  ;;  %v638_v12 = vcvt.s32.f32 %v510_v1  ;;  %v522_v1 = vunpack.c.2.s8 %v458_v28  ;;  %401 = vst.msk [vmem:[#allocation2 + $0x88] sm:$0xff] %vm383_vm0, %v2714_v51 }
  0xb4   : > { %402 = vst.msk [vmem:[#allocation2 + $0x90] sm:$0xff] %vm383_vm0, %v2714_v51 }
  0xb5   : > { %403 = vst.msk [vmem:[#allocation2 + $0x98] sm:$0xff] %vm383_vm0, %v2714_v51 }
  0xb6   : > { %1661 = vperm.xlu2 %2687, %v1535_v5   ;;  %v527_v5 = vunpack.c.3.s8 %v459_v29  ;;  %v462_v29 = vld [vmem:[%s2809_s11 + $0x70] sm:$0xff]  ;;  %404 = vst.msk [vmem:[#allocation2 + $0xa0] sm:$0xff] %vm383_vm0, %v2714_v51 }
  0xb7   : > { %v1107_v23 = vpop.f32.mrf.mxu2  ;;  %v534_v35 = vunpack.c.1.s8 %v462_v29  ;;  %v538_v55 = vunpack.c.2.s8 %v462_v29  ;;  %405 = vst.msk [vmem:[#allocation2 + $0xa8] sm:$0xff] %vm383_vm0, %v2714_v51 }
  0xb8   : > { %v1196_v24 = vpop.f32.mrf.mxu3  ;;  %v655_v15 = vcvt.s32.f32 %v527_v5  ;;  %406 = vst.msk [vmem:[#allocation2 + $0xb0] sm:$0xff] %vm383_vm0, %v2714_v51 }
  0xb9   : > { %v2933_v25 = vadd.f32 %v1196_v24, %v1107_v23  ;;  %v750_v24 = vpack.c.bf16 %v638_v12, %v634_v11  ;;  %v541_v11 = vunpack.c.3.s8 %v461_v42  ;;  %v650_v12 = vcvt.s32.f32 %v522_v1  ;;  %407 = vst.msk [vmem:[#allocation2 + $0xb8] sm:$0xff] %vm383_vm0, %v2714_v51 }
  0xba   : > { %v662_v42 = vcvt.s32.f32 %v534_v35  ;;  %408 = vst.msk [vmem:[#allocation2 + $0xc0] sm:$0xff] %vm383_vm0, %v2714_v51  ;;  %v1739_v35 = vld [vmem:[%s3031_s15 + $0x8] sm:$0xff] }
  0xbb   : > { %v669_v19 = vcvt.s32.f32 %v541_v11  ;;  %409 = vst.msk [vmem:[#allocation2 + $0xc8] sm:$0xff] %vm383_vm0, %v2714_v51 }
  0xbc   : > { %1247 = vmatmul.bf16.gmra.mxu2 %v742_v26  ;;  %v751_v26 = vpack.c.bf16 %v639_v14, %v635_v13  ;;  %v654_v13 = vcvt.s32.f32 %v526_v2  ;;  %v651_v14 = vcvt.s32.f32 %v523_v3  ;;  %410 = vst.msk [vmem:[#allocation2 + $0xd0] sm:$0xff] %vm383_vm0, %v2714_v51 }
  0xbd   : > { %1336 = vmatmul.bf16.gmra.mxu3 %v743_v27  ;;  %v1538_v27 = vld [vmem:[%s2864_s28 + $0xd0] sm:$0xff]  ;;  %411 = vst.msk [vmem:[#allocation2 + $0xd8] sm:$0xff] %vm383_vm0, %v2714_v51 }
  0xbe   : > { %1676 = vperm.xlu2 %2687, %v1538_v27   ;;  %v758_v27 = vpack.c.bf16 %v654_v13, %v650_v12  ;;  %v466_v12 = vld [vmem:[%s2809_s11 + $0x90] sm:$0xff]  ;;  %v467_v13 = vld [vmem:[%s2809_s11 + $0x98] sm:$0xff]  ;;  %412 = vst.msk [vmem:[#allocation2 + $0xe0] sm:$0xff] %vm383_vm0, %v2714_v51 }
  0xbf   : > { %v1110_v32 = vpop.f32.mrf.mxu2  ;;  %v546_v17 = vunpack.c.0.s8 %v466_v12  ;;  %413 = vst.msk [vmem:[#allocation2 + $0xe8] sm:$0xff] %vm383_vm0, %v2714_v51 }
  0xc0   : > { %v1199_v33 = vpop.f32.mrf.mxu3  ;;  %414 = vst.msk [vmem:[#allocation2 + $0xf0] sm:$0xff] %vm383_vm0, %v2714_v51 }
  0xc1   : > { %v2939_v38 = vadd.f32 %v1199_v33, %v1110_v32  ;;  %v514_v32 = vunpack.c.0.s8 %v458_v28  ;;  %v518_v33 = vunpack.c.1.s8 %v458_v28  ;;  %v759_v28 = vpack.c.bf16 %v655_v15, %v651_v14  ;;  %1099 = vmatmul.bf16.gmra.mxu0 %v764_v20  ;;  %415 = vst.msk [vmem:[#allocation2 + $0xf8] sm:$0xff] %vm383_vm0, %v2714_v51 }
  0xc2   : > { %v550_v20 = vunpack.c.1.s8 %v466_v12 }
  0xc3   : > { %v642_v47 = vcvt.s32.f32 %v514_v32  ;;  %v646_v48 = vcvt.s32.f32 %v518_v33  ;;  %v530_v33 = vunpack.c.0.s8 %v462_v29 }
  0xc5   : > { %v754_v61 = vpack.c.bf16 %v646_v48, %v642_v47  ;;  %v658_v41 = vcvt.s32.f32 %v530_v33 }
  0xc6   : > { %1691 = vperm.xlu2 %2687, %v1541_v40  }
  0xc7   : > { %v1112_v56 = vpop.f32.mrf.mxu2  ;;  %v762_v48 = vpack.c.bf16 %v662_v42, %v658_v41 }
  0xc8   : > { %v1201_v57 = vpop.f32.mrf.mxu3 }
  0xc9   : > { %v2944_v58 = vadd.f32 %v1201_v57, %v1112_v56  ;;  %v761_v56 = vpack.c.bf16 %v661_v54, %v657_v53 }
  0xcb   : > { %1183 = vmatmul.bf16.gmra.mxu1 %v761_v56 }
  0xcc   : > { %1252 = vmatmul.bf16.gmra.mxu2 %v746_v59 }
  0xcd   : > { %1341 = vmatmul.bf16.gmra.mxu3 %v747_v60 }
  0xce   : > { %v2976_v40 = vpop.f32.mrf.mxu0 }
  0xcf   : > { %v1115_v62 = vpop.f32.mrf.mxu2 }
  0xd0   : > { %v1204_v63 = vpop.f32.mrf.mxu3 }
  0xd1   : > { %v2947_v4 = vadd.f32 %v1204_v63, %v1115_v62  ;;  %v755_v62 = vpack.c.bf16 %v647_v50, %v643_v49  ;;  %v2980_v50 = vpop.f32.mrf.mxu1 }
  0xd6   : > { %v2984_v52 = vpop.f32.mrf.mxu0 }
  0xd7   : > { %v1117_v21 = vpop.f32.mrf.mxu2 }
  0xd8   : > { %v1206_v22 = vpop.f32.mrf.mxu3 }
  0xd9   : > { %v2950_v23 = vadd.f32 %v1206_v22, %v1117_v21  ;;  %v765_v21 = vpack.c.bf16 %v669_v19, %v665_v18  ;;  %v3006_v2 = vpop.f32.mrf.mxu1  ;;  %v1738_v18 = vld [vmem:[%s3031_s15] sm:$0xff] }
  0xda   : > { %2544 = vmatmul.msk.f32.vlgmr.msrb.gmra.mxu0 %vm383_vm0, %v1738_v18  ;;  %v1547_v18 = vpop.permute.xlu0 %1546 }
  0xdb   : > { %1188 = vmatmul.bf16.gmra.mxu1 %v765_v21  ;;  %v547_v21 = vunpack.c.0.s8 %v467_v13 }
  0xdc   : > { %1257 = vmatmul.bf16.gmra.mxu2 %v750_v24 }
  0xdd   : > { %1346 = vmatmul.bf16.gmra.mxu3 %v751_v26 }
  0xde   : > { %v3010_v3 = vpop.f32.mrf.mxu0 }
  0xdf   : > { %v1120_v30 = vpop.f32.mrf.mxu2 }
  0xe0   : > { %v1209_v31 = vpop.f32.mrf.mxu3 }
  0xe1   : > { %v2955_v36 = vadd.f32 %v1209_v31, %v1120_v30  ;;  %v463_v30 = vld [vmem:[%s2809_s11 + $0x78] sm:$0xff] }
  0xe2   : > { %v531_v37 = vunpack.c.0.s8 %v463_v30  ;;  %v535_v39 = vunpack.c.1.s8 %v463_v30  ;;  %2545 = vmatmul.msk.f32.gmra.mxu0 %vm383_vm0, %v1739_v35 }
  0xe4   : > { %v659_v43 = vcvt.s32.f32 %v531_v37  ;;  %v663_v44 = vcvt.s32.f32 %v535_v39 }
  0xe6   : > { %v763_v49 = vpack.c.bf16 %v663_v44, %v659_v43  ;;  %v3038_v14 = vpop.f32.mrf.mxu0  ;;  %v1155_v43 = vadd.f32 %v2980_v50, %v2976_v40 }
  0xe7   : > { %v1122_v57 = vpop.f32.mrf.mxu2 }
  0xe8   : > { %v1211_v59 = vpop.f32.mrf.mxu3 }
  0xe9   : > { %v2966_v60 = vadd.f32 %v1211_v59, %v1122_v57  ;;  %v542_v57 = vunpack.c.3.s8 %v462_v29  ;;  %v539_v59 = vunpack.c.2.s8 %v463_v30  ;;  %v675_v29 = vcvt.s32.f32 %v547_v21 }
  0xec   : > { %1262 = vmatmul.bf16.gmra.mxu2 %v754_v61  ;;  %v543_v61 = vunpack.c.3.s8 %v463_v30 }
  0xed   : > { %1351 = vmatmul.bf16.gmra.mxu3 %v755_v62  ;;  %v666_v62 = vcvt.s32.f32 %v538_v55  ;;  %v559_v55 = vunpack.c.3.s8 %v467_v13 }
  0xee   : > { %v671_v1 = vcvt.s32.f32 %v543_v61 }
  0xef   : > { %v1125_v63 = vpop.f32.mrf.mxu2 }
  0xf0   : > { %v1214_v0 = vpop.f32.mrf.mxu3 }
  0xf1   : > { %v2968_v7 = vadd.f32 %v1214_v0, %v1125_v63  ;;  %v670_v63 = vcvt.s32.f32 %v542_v57  ;;  %v667_v0 = vcvt.s32.f32 %v539_v59  ;;  %v416_v59 = vld [vmem:[#allocation2] sm:$0xff] }
  0xf3   : > { %v766_v10 = vpack.c.bf16 %v670_v63, %v666_v62  ;;  %v767_v11 = vpack.c.bf16 %v671_v1, %v667_v0  ;;  %v687_v63 = vcvt.s32.f32 %v559_v55  ;;  %v1157_v1 = vadd.f32 %v3006_v2, %v2984_v52 }
  0xf7   : > { %v1127_v22 = vpop.f32.mrf.mxu2 }
  0xf8   : > { %v1216_v24 = vpop.f32.mrf.mxu3 }
  0xf9   : > { %v2970_v26 = vadd.f32 %v1216_v24, %v1127_v22  ;;  %v551_v22 = vunpack.c.1.s8 %v467_v13  ;;  %v1159_v24 = vpop.f32.mrf.mxu1 }
  0xfa   : > { %v1160_v52 = vadd.f32 %v1159_v24, %v3010_v3 }
  0xfb   : > { %v679_v30 = vcvt.s32.f32 %v551_v22  ;;  %v3096_v22 = vld [vmem:[%s2809_s11 + $0xb8] sm:$0xff] }
  0xfc   : > { %1267 = vmatmul.bf16.gmra.mxu2 %v758_v27  ;;  %v674_v27 = vcvt.s32.f32 %v546_v17  ;;  %v563_v24 = vunpack.c.0.s8 %v3096_v22 }
  0xfd   : > { %1356 = vmatmul.bf16.gmra.mxu3 %v759_v28  ;;  %v678_v28 = vcvt.s32.f32 %v550_v20  ;;  %v771_v41 = vpack.c.bf16 %v679_v30, %v675_v29  ;;  %v3093_v20 = vld [vmem:[%s2809_s11 + $0xb0] sm:$0xff] }
  0xfe   : > { %v566_v3 = vunpack.c.1.s8 %v3093_v20 }
  0xff   : > { %v1130_v31 = vpop.f32.mrf.mxu2  ;;  %v770_v39 = vpack.c.bf16 %v678_v28, %v674_v27 }
 0x100   : > { %v1219_v32 = vpop.f32.mrf.mxu3 }
 0x101   : > { %v2974_v34 = vadd.f32 %v1219_v32, %v1130_v31  ;;  %v3060_v31 = vpop.f32.mrf.mxu0  ;;  %v3074_v42 = vpop.f32.mrf.mxu1 }
 0x107   : > { %v1132_v45 = vpop.f32.mrf.mxu2 }
 0x108   : > { %v1221_v46 = vpop.f32.mrf.mxu3 }
 0x109   : > { %v2978_v47 = vadd.f32 %v1221_v46, %v1132_v45  ;;  %v554_v46 = vunpack.c.2.s8 %v466_v12  ;;  %v3081_v57 = vpop.f32.mrf.mxu0  ;;  %v1164_v0 = vpop.f32.mrf.mxu1 }
 0x10b   : > { %v682_v61 = vcvt.s32.f32 %v554_v46  ;;  %v694_v46 = vcvt.s32.f32 %v566_v3 }
 0x10c   : > { %1272 = vmatmul.bf16.gmra.mxu2 %v762_v48  ;;  %v1740_v48 = vld [vmem:[%s3031_s15 + $0x10] sm:$0xff] }
 0x10d   : > { %1361 = vmatmul.bf16.gmra.mxu3 %v763_v49  ;;  %2546 = vmatmul.msk.f32.gmra.mxu0 %vm383_vm0, %v1740_v48  ;;  %v691_v48 = vcvt.s32.f32 %v563_v24 }
 0x10f   : > { %v1135_v53 = vpop.f32.mrf.mxu2 }
 0x110   : > { %v1224_v54 = vpop.f32.mrf.mxu3 }
 0x111   : > { %v2992_v56 = vadd.f32 %v1224_v54, %v1135_v53  ;;  %v558_v53 = vunpack.c.3.s8 %v466_v12  ;;  %v555_v54 = vunpack.c.2.s8 %v467_v13  ;;  %v3089_v17 = vpop.f32.mrf.mxu0  ;;  %v3099_v28 = vpop.f32.mrf.mxu1 }
 0x113   : > { %v686_v40 = vcvt.s32.f32 %v558_v53  ;;  %v683_v50 = vcvt.s32.f32 %v555_v54  ;;  %v1552_v54 = vpop.permute.xlu0 %1551 }
 0x115   : > { %v774_v12 = vpack.c.bf16 %v686_v40, %v682_v61  ;;  %v775_v13 = vpack.c.bf16 %v687_v63, %v683_v50  ;;  %v1743_v40 = vld [vmem:[%s3031_s15 + $0x28] sm:$0xff] }
 0x117   : > { %v1137_v5 = vpop.f32.mrf.mxu2 }
 0x118   : > { %v1226_v8 = vpop.f32.mrf.mxu3 }
 0x119   : > { %v3014_v9 = vadd.f32 %v1226_v8, %v1137_v5  ;;  %v3108_v53 = vpop.f32.mrf.mxu0 }
 0x11c   : > { %1277 = vmatmul.bf16.gmra.mxu2 %v766_v10  ;;  %v1741_v10 = vld [vmem:[%s3031_s15 + $0x18] sm:$0xff] }
 0x11d   : > { %1366 = vmatmul.bf16.gmra.mxu3 %v767_v11  ;;  %2547 = vmatmul.msk.f32.gmra.mxu0 %vm383_vm0, %v1741_v10 }
 0x11f   : > { %v1140_v15 = vpop.f32.mrf.mxu2 }
 0x120   : > { %v1229_v16 = vpop.f32.mrf.mxu3 }
 0x121   : > { %v3043_v19 = vadd.f32 %v1229_v16, %v1140_v15  ;;  %v417_v15 = vld [vmem:[#allocation2 + $0x8] sm:$0xff] }
 0x127   : > { %v1142_v32 = vpop.f32.mrf.mxu2 }
 0x128   : > { %v1231_v33 = vpop.f32.mrf.mxu3 }
 0x129   : > { %v3065_v37 = vadd.f32 %v1231_v33, %v1142_v32  ;;  %v562_v32 = vunpack.c.0.s8 %v3093_v20  ;;  %v1742_v33 = vld [vmem:[%s3031_s15 + $0x20] sm:$0xff] }
 0x12a   : > { %2548 = vmatmul.msk.f32.gmra.mxu0 %vm383_vm0, %v1742_v33 }
 0x12c   : > { %1282 = vmatmul.bf16.gmra.mxu2 %v770_v39  ;;  %v567_v39 = vunpack.c.1.s8 %v3096_v22 }
 0x12d   : > { %1371 = vmatmul.bf16.gmra.mxu3 %v771_v41  ;;  %v418_v41 = vld [vmem:[#allocation2 + $0x10] sm:$0xff] }
 0x12f   : > { %v1243_v44 = vpop.f32.mrf.mxu2 }
 0x130   : > { %v1332_v45 = vpop.f32.mrf.mxu3  ;;  %v1244_v49 = vadd.f32 %v1243_v44, %v1155_v43  ;;  %v690_v44 = vcvt.s32.f32 %v562_v32 }
 0x132   : > { %v1333_v51 = vadd.f32 %v1332_v45, %v1244_v49  ;;  %v695_v49 = vcvt.s32.f32 %v567_v39  ;;  %v778_v63 = vpack.c.bf16 %v694_v46, %v690_v44  ;;  %2549 = vmatmul.msk.f32.gmra.mxu0 %vm383_vm0, %v1743_v40  ;;  %v1745_v46 = vld [vmem:[%s3031_s15 + $0x38] sm:$0xff]  ;;  %v3137_v40 = vld [vmem:[%s2809_s11 + $0xd0] sm:$0xff] }
 0x134   : > { %v1412_v62 = vadd.f32 %v1333_v51, %v416_v59  ;;  %v1162_v59 = vadd.f32 %v3074_v42, %v3038_v14  ;;  %v1165_v14 = vadd.f32 %v1164_v0, %v3060_v31  ;;  %v571_v31 = vunpack.c.2.s8 %v3096_v22 }
 0x135   : > { %v575_v0 = vunpack.c.3.s8 %v3096_v22 }
 0x136   : > { %1445 = vst.msk [vmem:[#allocation2] sm:$0xff] %vm383_vm0, %v1412_v62  ;;  %v699_v24 = vcvt.s32.f32 %v571_v31 }
 0x137   : > { %v1245_v5 = vpop.f32.mrf.mxu2  ;;  %v703_v39 = vcvt.s32.f32 %v575_v0 }
 0x138   : > { %v1334_v8 = vpop.f32.mrf.mxu3  ;;  %v1246_v11 = vadd.f32 %v1245_v5, %v1157_v1  ;;  %v779_v1 = vpack.c.bf16 %v695_v49, %v691_v48  ;;  %v1169_v5 = vpop.f32.mrf.mxu1 }
 0x13a   : > { %v1335_v16 = vadd.f32 %v1334_v8, %v1246_v11  ;;  %v419_v8 = vld [vmem:[#allocation2 + $0x18] sm:$0xff]  ;;  %v1557_v11 = vpop.permute.xlu1 %1556 }
 0x13c   : > { %v1413_v2 = vadd.f32 %v1335_v16, %v417_v15  ;;  %1287 = vmatmul.bf16.gmra.mxu2 %v774_v12  ;;  %v3118_v15 = vpop.f32.mrf.mxu0 }
 0x13d   : > { %1376 = vmatmul.bf16.gmra.mxu3 %v775_v13  ;;  %v1480_v21 = vld [vmem:[#allocation2] sm:$0xff] }
 0x13e   : > { %1446 = vst.msk [vmem:[#allocation2 + $0x8] sm:$0xff] %vm383_vm0, %v1413_v2  ;;  %v1704_v27 = vmul.f32 %v1547_v18, %v1480_v21  ;;  %v1744_v2 = vld [vmem:[%s3031_s15 + $0x30] sm:$0xff] }
 0x13f   : > { %v1248_v29 = vpop.f32.mrf.mxu2  ;;  %2550 = vmatmul.msk.f32.gmra.mxu0 %vm383_vm0, %v1744_v2 }
 0x140   : > { %v1337_v30 = vpop.f32.mrf.mxu3  ;;  %v1249_v35 = vadd.f32 %v1248_v29, %v1160_v52  ;;  %2576 = vmatmul.msk.f32.vlgmr.msrb.gmra.mxu1 %vm383_vm0, %v1704_v27  ;;  %v570_v52 = vunpack.c.2.s8 %v3093_v20  ;;  %v574_v27 = vunpack.c.3.s8 %v3093_v20  ;;  %v420_v29 = vld [vmem:[#allocation2 + $0x20] sm:$0xff]  ;;  %v1171_v32 = vpop.f32.mrf.mxu1  ;;  %v1167_v20 = vadd.f32 %v3099_v28, %v3081_v57 }
 0x141   : > { %v1567_v28 = vpop.permute.xlu2 %1566 }
 0x142   : > { %v1338_v43 = vadd.f32 %v1337_v30, %v1249_v35  ;;  %v698_v33 = vcvt.s32.f32 %v570_v52  ;;  %v702_v3 = vcvt.s32.f32 %v574_v27 }
 0x144   : > { %v1414_v45 = vadd.f32 %v1338_v43, %v418_v41  ;;  %v1562_v41 = vpop.permute.xlu1 %1561  ;;  %v782_v49 = vpack.c.bf16 %v702_v3, %v698_v33 }
 0x145   : > { %v1481_v55 = vld [vmem:[#allocation2 + $0x8] sm:$0xff] }
 0x146   : > { %1447 = vst.msk [vmem:[#allocation2 + $0x10] sm:$0xff] %vm383_vm0, %v1414_v45  ;;  %v1705_v51 = vmul.f32 %v1552_v54, %v1481_v55  ;;  %v783_v54 = vpack.c.bf16 %v703_v39, %v699_v24  ;;  %v3132_v55 = vpop.f32.mrf.mxu0  ;;  %v1747_v39 = vld [vmem:[%s3031_s15 + $0x48] sm:$0xff] }
 0x147   : > { %v1250_v61 = vpop.f32.mrf.mxu2  ;;  %2551 = vmatmul.msk.f32.gmra.mxu0 %vm383_vm0, %v1745_v46  ;;  %v1577_v46 = vpop.permute.xlu0 %1576 }
 0x148   : > { %v1339_v62 = vpop.f32.mrf.mxu3  ;;  %v1251_v50 = vadd.f32 %v1250_v61, %v1162_v59  ;;  %2577 = vmatmul.msk.f32.gmra.mxu1 %vm383_vm0, %v1705_v51  ;;  %v421_v59 = vld [vmem:[#allocation2 + $0x28] sm:$0xff]  ;;  %v1170_v51 = vadd.f32 %v1169_v5, %v3089_v17  ;;  %v582_v17 = vunpack.c.1.s8 %v3137_v40 }
 0x149   : > { %v1572_v0 = vpop.permute.xlu2 %1571 }
 0x14a   : > { %v1340_v10 = vadd.f32 %v1339_v62, %v1251_v50  ;;  %v1174_v62 = vpop.f32.mrf.mxu1 }
 0x14c   : > { %v1415_v42 = vadd.f32 %v1340_v10, %v419_v8  ;;  %1292 = vmatmul.bf16.gmra.mxu2 %v778_v63  ;;  %v3140_v63 = vld [vmem:[%s2809_s11 + $0xd8] sm:$0xff] }
 0x14d   : > { %1381 = vmatmul.bf16.gmra.mxu3 %v779_v1  ;;  %v1482_v12 = vld [vmem:[#allocation2 + $0x10] sm:$0xff]  ;;  %v579_v5 = vunpack.c.0.s8 %v3140_v63 }
 0x14e   : > { %1448 = vst.msk [vmem:[#allocation2 + $0x18] sm:$0xff] %vm383_vm0, %v1415_v42  ;;  %v1706_v13 = vmul.f32 %v1557_v11, %v1482_v12  ;;  %v578_v11 = vunpack.c.0.s8 %v3137_v40  ;;  %v583_v12 = vunpack.c.1.s8 %v3140_v63 }
 0x14f   : > { %v1253_v16 = vpop.f32.mrf.mxu2  ;;  %v707_v27 = vcvt.s32.f32 %v579_v5  ;;  %v1582_v5 = vpop.permute.xlu1 %1581 }
 0x150   : > { %v1342_v18 = vpop.f32.mrf.mxu3  ;;  %v1254_v21 = vadd.f32 %v1253_v16, %v1165_v14  ;;  %2578 = vmatmul.msk.f32.gmra.mxu1 %vm383_vm0, %v1706_v13  ;;  %v1746_v14 = vld [vmem:[%s3031_s15 + $0x40] sm:$0xff]  ;;  %v422_v13 = vld [vmem:[#allocation2 + $0x30] sm:$0xff]  ;;  %v706_v52 = vcvt.s32.f32 %v578_v11  ;;  %v711_v31 = vcvt.s32.f32 %v583_v12 }
 0x151   : > { %2552 = vmatmul.msk.f32.gmra.mxu0 %vm383_vm0, %v1746_v14 }
 0x152   : > { %v1343_v30 = vadd.f32 %v1342_v18, %v1254_v21  ;;  %v3150_v18 = vpop.f32.mrf.mxu0  ;;  %v710_v21 = vcvt.s32.f32 %v582_v17 }
 0x154   : > { %v1416_v35 = vadd.f32 %v1343_v30, %v420_v29  ;;  %v1172_v30 = vadd.f32 %v1171_v32, %v3108_v53 }
 0x155   : > { %v1483_v43 = vld [vmem:[#allocation2 + $0x18] sm:$0xff] }
 0x156   : > { %1449 = vst.msk [vmem:[#allocation2 + $0x20] sm:$0xff] %vm383_vm0, %v1416_v35  ;;  %v1707_v44 = vmul.f32 %v1562_v41, %v1483_v43  ;;  %v1176_v35 = vpop.f32.mrf.mxu1  ;;  %v786_v43 = vpack.c.bf16 %v710_v21, %v706_v52 }
 0x157   : > { %v1255_v22 = vpop.f32.mrf.mxu2 }
 0x158   : > { %v1344_v45 = vpop.f32.mrf.mxu3  ;;  %v1256_v48 = vadd.f32 %v1255_v22, %v1167_v20  ;;  %2579 = vmatmul.msk.f32.gmra.mxu1 %vm383_vm0, %v1707_v44  ;;  %v787_v20 = vpack.c.bf16 %v711_v31, %v707_v27  ;;  %v423_v44 = vld [vmem:[#allocation2 + $0x38] sm:$0xff] }
 0x159   : > { %2553 = vmatmul.msk.f32.gmra.mxu0 %vm383_vm0, %v1747_v39  ;;  %v3178_v39 = vld [vmem:[%s2809_s11 + $0xf8] sm:$0xff] }
 0x15a   : > { %v1345_v57 = vadd.f32 %v1344_v45, %v1256_v48  ;;  %v1175_v45 = vadd.f32 %v1174_v62, %v3118_v15  ;;  %v3158_v32 = vpop.f32.mrf.mxu0  ;;  %v590_v15 = vunpack.c.3.s8 %v3137_v40  ;;  %v587_v62 = vunpack.c.2.s8 %v3140_v63 }
 0x15c   : > { %v1417_v61 = vadd.f32 %v1345_v57, %v421_v59  ;;  %1297 = vmatmul.bf16.gmra.mxu2 %v782_v49  ;;  %v586_v57 = vunpack.c.2.s8 %v3137_v40  ;;  %v718_v14 = vcvt.s32.f32 %v590_v15 }
 0x15d   : > { %1386 = vmatmul.bf16.gmra.mxu3 %v783_v54  ;;  %v1484_v50 = vld [vmem:[#allocation2 + $0x20] sm:$0xff] }
 0x15e   : > { %1450 = vst.msk [vmem:[#allocation2 + $0x28] sm:$0xff] %vm383_vm0, %v1417_v61  ;;  %v1708_v1 = vmul.f32 %v1567_v28, %v1484_v50  ;;  %v1748_v28 = vld [vmem:[%s3031_s15 + $0x50] sm:$0xff]  ;;  %v1179_v61 = vpop.f32.mrf.mxu1  ;;  %v591_v50 = vunpack.c.3.s8 %v3140_v63 }
 0x15f   : > { %v1258_v8 = vpop.f32.mrf.mxu2 }
 0x160   : > { %v1347_v10 = vpop.f32.mrf.mxu3  ;;  %v1259_v42 = vadd.f32 %v1258_v8, %v1170_v51  ;;  %2580 = vmatmul.msk.f32.gmra.mxu1 %vm383_vm0, %v1708_v1  ;;  %v424_v1 = vld [vmem:[#allocation2 + $0x40] sm:$0xff]  ;;  %v719_v17 = vcvt.s32.f32 %v591_v50 }
 0x161   : > { %2554 = vmatmul.msk.f32.gmra.mxu0 %vm383_vm0, %v1748_v28 }
 0x162   : > { %v1348_v16 = vadd.f32 %v1347_v10, %v1259_v42  ;;  %v714_v10 = vcvt.s32.f32 %v586_v57  ;;  %v715_v42 = vcvt.s32.f32 %v587_v62  ;;  %v1592_v62 = vpop.permute.xlu0 %1591 }
 0x164   : > { %v1418_v2 = vadd.f32 %v1348_v16, %v422_v13  ;;  %v1177_v13 = vadd.f32 %v1176_v35, %v3132_v55  ;;  %v1095_v16 = vpop.f32.mrf.mxu0  ;;  %v790_v27 = vpack.c.bf16 %v718_v14, %v714_v10  ;;  %v791_v31 = vpack.c.bf16 %v719_v17, %v715_v42  ;;  %v3175_v35 = vld [vmem:[%s2809_s11 + $0xf0] sm:$0xff]  ;;  %v1751_v14 = vld [vmem:[%s3031_s15 + $0x68] sm:$0xff] }
 0x165   : > { %v1485_v29 = vld [vmem:[#allocation2 + $0x28] sm:$0xff] }
 0x166   : > { %1451 = vst.msk [vmem:[#allocation2 + $0x30] sm:$0xff] %vm383_vm0, %v1418_v2  ;;  %v1709_v33 = vmul.f32 %v1572_v0, %v1485_v29  ;;  %v1749_v2 = vld [vmem:[%s3031_s15 + $0x58] sm:$0xff]  ;;  %v425_v0 = vld [vmem:[#allocation2 + $0x48] sm:$0xff]  ;;  %v1181_v55 = vpop.f32.mrf.mxu1 }
 0x167   : > { %v1260_v3 = vpop.f32.mrf.mxu2 }
 0x168   : > { %v1349_v24 = vpop.f32.mrf.mxu3  ;;  %v1261_v41 = vadd.f32 %v1260_v3, %v1172_v30  ;;  %2581 = vmatmul.msk.f32.gmra.mxu1 %vm383_vm0, %v1709_v33  ;;  %v1180_v30 = vadd.f32 %v1179_v61, %v3150_v18  ;;  %v1587_v3 = vpop.permute.xlu2 %1586  ;;  %v598_v18 = vunpack.c.1.s8 %v3175_v35 }
 0x169   : > { %2555 = vmatmul.msk.f32.gmra.mxu0 %vm383_vm0, %v1749_v2 }
 0x16a   : > { %v1350_v22 = vadd.f32 %v1349_v24, %v1261_v41 }
 0x16c   : > { %v1419_v53 = vadd.f32 %v1350_v22, %v423_v44  ;;  %1302 = vmatmul.bf16.gmra.mxu2 %v786_v43  ;;  %v594_v44 = vunpack.c.0.s8 %v3175_v35  ;;  %v1750_v22 = vld [vmem:[%s3031_s15 + $0x60] sm:$0xff] }
 0x16d   : > { %1391 = vmatmul.bf16.gmra.mxu3 %v787_v20  ;;  %v1486_v48 = vld [vmem:[#allocation2 + $0x30] sm:$0xff] }
 0x16e   : > { %1452 = vst.msk [vmem:[#allocation2 + $0x38] sm:$0xff] %vm383_vm0, %v1419_v53  ;;  %v1710_v49 = vmul.f32 %v1577_v46, %v1486_v48  ;;  %v595_v53 = vunpack.c.0.s8 %v3178_v39  ;;  %v599_v46 = vunpack.c.1.s8 %v3178_v39  ;;  %v426_v48 = vld [vmem:[#allocation2 + $0x50] sm:$0xff]  ;;  %v1184_v28 = vpop.f32.mrf.mxu1 }
 0x16f   : > { %v1263_v54 = vpop.f32.mrf.mxu2 }
 0x170   : > { %v1352_v59 = vpop.f32.mrf.mxu3  ;;  %v1264_v51 = vadd.f32 %v1263_v54, %v1175_v45  ;;  %2582 = vmatmul.msk.f32.gmra.mxu1 %vm383_vm0, %v1710_v49  ;;  %v1097_v49 = vpop.f32.mrf.mxu0  ;;  %v723_v61 = vcvt.s32.f32 %v595_v53  ;;  %v727_v15 = vcvt.s32.f32 %v599_v46 }
 0x171   : > { %2556 = vmatmul.msk.f32.gmra.mxu0 %vm383_vm0, %v1750_v22 }
 0x172   : > { %v1353_v8 = vadd.f32 %v1352_v59, %v1264_v51  ;;  %v722_v59 = vcvt.s32.f32 %v594_v44  ;;  %v726_v51 = vcvt.s32.f32 %v598_v18  ;;  %v1602_v18 = vpop.permute.xlu2 %1601 }
 0x174   : > { %v1420_v11 = vadd.f32 %v1353_v8, %v424_v1  ;;  %v1182_v1 = vadd.f32 %v1181_v55, %v3158_v32  ;;  %v794_v17 = vpack.c.bf16 %v726_v51, %v722_v59  ;;  %v1597_v32 = vpop.permute.xlu1 %1596  ;;  %v1752_v55 = vld [vmem:[%s3031_s15 + $0x70] sm:$0xff] }
 0x175   : > { %v1487_v12 = vld [vmem:[#allocation2 + $0x38] sm:$0xff] }
 0x176   : > { %1453 = vst.msk [vmem:[#allocation2 + $0x40] sm:$0xff] %vm383_vm0, %v1420_v11  ;;  %v1711_v40 = vmul.f32 %v1582_v5, %v1487_v12  ;;  %v795_v5 = vpack.c.bf16 %v727_v15, %v723_v61  ;;  %v427_v12 = vld [vmem:[#allocation2 + $0x58] sm:$0xff]  ;;  %v429_v15 = vld [vmem:[#allocation2 + $0x68] sm:$0xff] }
 0x177   : > { %v1265_v63 = vpop.f32.mrf.mxu2 }
 0x178   : > { %v1354_v52 = vpop.f32.mrf.mxu3  ;;  %v1266_v21 = vadd.f32 %v1265_v63, %v1177_v13  ;;  %2583 = vmatmul.msk.f32.gmra.mxu1 %vm383_vm0, %v1711_v40  ;;  %v1100_v40 = vpop.f32.mrf.mxu0  ;;  %v1185_v63 = vadd.f32 %v1184_v28, %v1095_v16  ;;  %v603_v16 = vunpack.c.2.s8 %v3178_v39 }
 0x179   : > { %2557 = vmatmul.msk.f32.gmra.mxu0 %vm383_vm0, %v1751_v14 }
 0x17a   : > { %v1355_v29 = vadd.f32 %v1354_v52, %v1266_v21  ;;  %v1186_v21 = vpop.f32.mrf.mxu1  ;;  %v731_v22 = vcvt.s32.f32 %v603_v16 }
 0x17c   : > { %v1421_v33 = vadd.f32 %v1355_v29, %v425_v0  ;;  %1307 = vmatmul.bf16.gmra.mxu2 %v790_v27  ;;  %v602_v29 = vunpack.c.2.s8 %v3175_v35 }
 0x17d   : > { %1396 = vmatmul.bf16.gmra.mxu3 %v791_v31  ;;  %v1488_v24 = vld [vmem:[#allocation2 + $0x40] sm:$0xff] }
 0x17e   : > { %1454 = vst.msk [vmem:[#allocation2 + $0x48] sm:$0xff] %vm383_vm0, %v1421_v33  ;;  %v1712_v41 = vmul.f32 %v1587_v3, %v1488_v24  ;;  %v606_v33 = vunpack.c.3.s8 %v3175_v35  ;;  %v607_v3 = vunpack.c.3.s8 %v3178_v39  ;;  %v428_v24 = vld [vmem:[#allocation2 + $0x60] sm:$0xff]  ;;  %v1753_v39 = vld [vmem:[%s3031_s15 + $0x78] sm:$0xff] }
 0x17f   : > { %v1268_v43 = vpop.f32.mrf.mxu2 }
 0x180   : > { %v1357_v20 = vpop.f32.mrf.mxu3  ;;  %v1269_v45 = vadd.f32 %v1268_v43, %v1180_v30  ;;  %2584 = vmatmul.msk.f32.gmra.mxu1 %vm383_vm0, %v1712_v41  ;;  %v730_v43 = vcvt.s32.f32 %v602_v29  ;;  %v734_v44 = vcvt.s32.f32 %v606_v33  ;;  %v1102_v46 = vpop.f32.mrf.mxu0  ;;  %v1755_v29 = vld [vmem:[%s3031_s15 + $0x88] sm:$0xff] }
 0x181   : > { %2558 = vmatmul.msk.f32.gmra.mxu0 %vm383_vm0, %v1752_v55 }
 0x182   : > { %v1358_v54 = vadd.f32 %v1357_v20, %v1269_v45  ;;  %v735_v45 = vcvt.s32.f32 %v607_v3  ;;  %v798_v28 = vpack.c.bf16 %v734_v44, %v730_v43  ;;  %v1189_v61 = vpop.f32.mrf.mxu1  ;;  %v1617_v3 = vpop.permute.xlu2 %1616 }
 0x184   : > { %v1422_v57 = vadd.f32 %v1358_v54, %v426_v48  ;;  %v1187_v48 = vadd.f32 %v1186_v21, %v1097_v49  ;;  %v799_v51 = vpack.c.bf16 %v735_v45, %v731_v22  ;;  %v1607_v49 = vpop.permute.xlu0 %1606  ;;  %v1756_v22 = vld [vmem:[%s3031_s15 + $0x90] sm:$0xff] }
 0x185   : > { %v1489_v50 = vld [vmem:[#allocation2 + $0x48] sm:$0xff] }
 0x186   : > { %1455 = vst.msk [vmem:[#allocation2 + $0x50] sm:$0xff] %vm383_vm0, %v1422_v57  ;;  %v1713_v8 = vmul.f32 %v1592_v62, %v1489_v50  ;;  %v1190_v50 = vadd.f32 %v1189_v61, %v1100_v40 }
 0x187   : > { %v1270_v10 = vpop.f32.mrf.mxu2 }
 0x188   : > { %v1359_v11 = vpop.f32.mrf.mxu3  ;;  %v1271_v42 = vadd.f32 %v1270_v10, %v1182_v1  ;;  %2585 = vmatmul.msk.f32.gmra.mxu1 %vm383_vm0, %v1713_v8  ;;  %v1885_v10 = vpop.f32.mrf.mxu0 }
 0x189   : > { %2559 = vmatmul.msk.f32.gmra.mxu0 %vm383_vm0, %v1753_v39 }
 0x18a   : > { %v1360_v13 = vadd.f32 %v1359_v11, %v1271_v42  ;;  %v1191_v40 = vpop.f32.mrf.mxu1 }
 0x18b   : > { %v1192_v21 = vadd.f32 %v1191_v40, %v1102_v46 }
 0x18c   : > { %v1423_v52 = vadd.f32 %v1360_v13, %v427_v12  ;;  %1312 = vmatmul.bf16.gmra.mxu2 %v794_v17  ;;  %v1754_v17 = vld [vmem:[%s3031_s15 + $0x80] sm:$0xff]  ;;  %v430_v12 = vld [vmem:[#allocation2 + $0x70] sm:$0xff] }
 0x18d   : > { %1401 = vmatmul.bf16.gmra.mxu3 %v795_v5  ;;  %v1490_v2 = vld [vmem:[#allocation2 + $0x50] sm:$0xff] }
 0x18e   : > { %1456 = vst.msk [vmem:[#allocation2 + $0x58] sm:$0xff] %vm383_vm0, %v1423_v52  ;;  %v1714_v27 = vmul.f32 %v1597_v32, %v1490_v2  ;;  %v1612_v52 = vpop.permute.xlu1 %1611 }
 0x18f   : > { %v1273_v31 = vpop.f32.mrf.mxu2 }
 0x190   : > { %v1362_v0 = vpop.f32.mrf.mxu3  ;;  %v1274_v30 = vadd.f32 %v1273_v31, %v1185_v63  ;;  %2586 = vmatmul.msk.f32.gmra.mxu1 %vm383_vm0, %v1714_v27  ;;  %v3209_v2 = vpop.f32.mrf.mxu0 }
 0x191   : > { %2560 = vmatmul.msk.f32.gmra.mxu0 %vm383_vm0, %v1754_v17  ;;  %v1758_v17 = vld [vmem:[%s3031_s15 + $0xa0] sm:$0xff] }
 0x192   : > { %v1363_v41 = vadd.f32 %v1362_v0, %v1274_v30  ;;  %v431_v30 = vld [vmem:[#allocation2 + $0x78] sm:$0xff] }
 0x194   : > { %v1424_v20 = vadd.f32 %v1363_v41, %v428_v24 }
 0x195   : > { %v1491_v53 = vld [vmem:[#allocation2 + $0x58] sm:$0xff] }
 0x196   : > { %1457 = vst.msk [vmem:[#allocation2 + $0x60] sm:$0xff] %vm383_vm0, %v1424_v20  ;;  %v1715_v35 = vmul.f32 %v1602_v18, %v1491_v53  ;;  %v432_v18 = vld [vmem:[#allocation2 + $0x80] sm:$0xff] }
 0x197   : > { %v1275_v54 = vpop.f32.mrf.mxu2 }
 0x198   : > { %v1364_v59 = vpop.f32.mrf.mxu3  ;;  %v1276_v57 = vadd.f32 %v1275_v54, %v1187_v48  ;;  %2587 = vmatmul.msk.f32.gmra.mxu1 %vm383_vm0, %v1715_v35  ;;  %v3215_v41 = vpop.f32.mrf.mxu0 }
 0x199   : > { %2561 = vmatmul.msk.f32.gmra.mxu0 %vm383_vm0, %v1755_v29  ;;  %v1622_v48 = vpop.permute.xlu0 %1621 }
 0x19a   : > { %v1365_v62 = vadd.f32 %v1364_v59, %v1276_v57 }
 0x19c   : > { %v1425_v1 = vadd.f32 %v1365_v62, %v429_v15  ;;  %1317 = vmatmul.bf16.gmra.mxu2 %v798_v28  ;;  %v1757_v28 = vld [vmem:[%s3031_s15 + $0x98] sm:$0xff]  ;;  %v1627_v15 = vpop.permute.xlu1 %1626 }
 0x19d   : > { %1406 = vmatmul.bf16.gmra.mxu3 %v799_v51  ;;  %v1492_v8 = vld [vmem:[#allocation2 + $0x60] sm:$0xff] }
 0x19e   : > { %1458 = vst.msk [vmem:[#allocation2 + $0x68] sm:$0xff] %vm383_vm0, %v1425_v1  ;;  %v1716_v11 = vmul.f32 %v1607_v49, %v1492_v8 }
 0x19f   : > { %v1278_v14 = vpop.f32.mrf.mxu2 }
 0x1a0   : > { %v1367_v42 = vpop.f32.mrf.mxu3  ;;  %v1279_v5 = vadd.f32 %v1278_v14, %v1190_v50  ;;  %2588 = vmatmul.msk.f32.gmra.mxu1 %vm383_vm0, %v1716_v11  ;;  %v3222_v54 = vpop.f32.mrf.mxu0  ;;  %v3232_v50 = vld [vmem:[%s3459_s6] ss:$0 sm:$0xff] }
 0x1a1   : > { %2562 = vmatmul.msk.f32.gmra.mxu0 %vm383_vm0, %v1756_v22 }
 0x1a2   : > { %v1368_v13 = vadd.f32 %v1367_v42, %v1279_v5 }
 0x1a4   : > { %v1426_v63 = vadd.f32 %v1368_v13, %v430_v12 }
 0x1a5   : > { %v1493_v32 = vld [vmem:[#allocation2 + $0x68] sm:$0xff] }
 0x1a6   : > { %1459 = vst.msk [vmem:[#allocation2 + $0x70] sm:$0xff] %vm383_vm0, %v1426_v63  ;;  %v1717_v27 = vmul.f32 %v1612_v52, %v1493_v32  ;;  %v1632_v63 = vpop.permute.xlu2 %1631 }
 0x1a7   : > { %v1280_v31 = vpop.f32.mrf.mxu2 }
 0x1a8   : > { %v1369_v0 = vpop.f32.mrf.mxu3  ;;  %v1281_v55 = vadd.f32 %v1280_v31, %v1192_v21  ;;  %2589 = vmatmul.msk.f32.gmra.mxu1 %vm383_vm0, %v1717_v27  ;;  %v3234_v8 = vpop.f32.mrf.mxu0 }
 0x1a9   : > { %2563 = vmatmul.msk.f32.gmra.mxu0 %vm383_vm0, %v1757_v28  ;;  %v1642_v28 = vpop.permute.xlu1 %1641 }
 0x1aa   : > { %v1370_v33 = vadd.f32 %v1369_v0, %v1281_v55  ;;  %v1759_v55 = vld [vmem:[%s3031_s15 + $0xa8] sm:$0xff] }
 0x1ac   : > { %v1427_v16 = vadd.f32 %v1370_v33, %v431_v30 }
 0x1ad   : > { %v1494_v24 = vld [vmem:[#allocation2 + $0x70] sm:$0xff] }
 0x1ae   : > { %1460 = vst.msk [vmem:[#allocation2 + $0x78] sm:$0xff] %vm383_vm0, %v1427_v16  ;;  %v1718_v43 = vmul.f32 %v1617_v3, %v1494_v24  ;;  %v435_v16 = vld [vmem:[#allocation2 + $0x98] sm:$0xff] }
 0x1af   : > { %v1283_v20 = vpop.f32.mrf.mxu2 }
 0x1b0   : > { %v1372_v44 = vpop.f32.mrf.mxu3  ;;  %v1284_v45 = vadd.f32 %v1283_v20, %v2929_v6  ;;  %2590 = vmatmul.msk.f32.gmra.mxu1 %vm383_vm0, %v1718_v43  ;;  %v433_v6 = vld [vmem:[#allocation2 + $0x88] sm:$0xff]  ;;  %v3250_v21 = vpop.f32.mrf.mxu0 }
 0x1b1   : > { %2564 = vmatmul.msk.f32.gmra.mxu0 %vm383_vm0, %v1758_v17  ;;  %v1637_v43 = vpop.permute.xlu0 %1636 }
 0x1b2   : > { %v1373_v53 = vadd.f32 %v1372_v44, %v1284_v45 }
 0x1b4   : > { %v1428_v46 = vadd.f32 %v1373_v53, %v432_v18 }
 0x1b5   : > { %v1495_v35 = vld [vmem:[#allocation2 + $0x78] sm:$0xff] }
 0x1b6   : > { %1461 = vst.msk [vmem:[#allocation2 + $0x80] sm:$0xff] %vm383_vm0, %v1428_v46  ;;  %v1719_v59 = vmul.f32 %v1622_v48, %v1495_v35  ;;  %v1760_v46 = vld [vmem:[%s3031_s15 + $0xb0] sm:$0xff] }
 0x1b7   : > { %v1285_v39 = vpop.f32.mrf.mxu2 }
 0x1b8   : > { %v1374_v57 = vpop.f32.mrf.mxu3  ;;  %v1286_v51 = vadd.f32 %v1285_v39, %v2933_v25  ;;  %2591 = vmatmul.msk.f32.gmra.mxu1 %vm383_vm0, %v1719_v59  ;;  %v436_v59 = vld [vmem:[#allocation2 + $0xa0] sm:$0xff] }
 0x1b9   : > { %2565 = vmatmul.msk.f32.gmra.mxu0 %vm383_vm0, %v1759_v55  ;;  %v1652_v55 = vpop.permute.xlu0 %1651 }
 0x1ba   : > { %v1375_v61 = vadd.f32 %v1374_v57, %v1286_v51 }
 0x1bc   : > { %v1429_v62 = vadd.f32 %v1375_v61, %v433_v6  ;;  %v3261_v22 = vpop.f32.mrf.mxu0 }
 0x1bd   : > { %v2094_v1 = vpop.f32.mrf.mxu1  ;;  %v1496_v49 = vld [vmem:[#allocation2 + $0x80] sm:$0xff] }
 0x1be   : > { %1462 = vst.msk [vmem:[#allocation2 + $0x88] sm:$0xff] %vm383_vm0, %v1429_v62  ;;  %v2095_v25 = vadd.f32 %v2094_v1, %v1885_v10  ;;  %v1720_v11 = vmul.f32 %v1627_v15, %v1496_v49  ;;  %v434_v10 = vld [vmem:[#allocation2 + $0x90] sm:$0xff]  ;;  %v1761_v49 = vld [vmem:[%s3031_s15 + $0xb8] sm:$0xff] }
 0x1bf   : > { %v1288_v14 = vpop.f32.mrf.mxu2 }
 0x1c0   : > { %v1377_v42 = vpop.f32.mrf.mxu3  ;;  %v2194_v5 = vadd.f32 %v3232_v50, %v2095_v25  ;;  %v1289_v12 = vadd.f32 %v1288_v14, %v2939_v38  ;;  %2592 = vmatmul.msk.f32.gmra.mxu1 %vm383_vm0, %v1720_v11  ;;  %v437_v14 = vld [vmem:[#allocation2 + $0xa8] sm:$0xff] }
 0x1c1   : > { %2566 = vmatmul.msk.f32.gmra.mxu0 %vm383_vm0, %v1760_v46 }
 0x1c2   : > { %v2226_v13 = vmax.f32 %v2194_v5, 0.0  ;;  %v1378_v40 = vadd.f32 %v1377_v42, %v1289_v12  ;;  %v1647_v5 = vpop.permute.xlu2 %1646 }
 0x1c4   : > { %2259 = vst.msk [vmem:[%s3246_s19] sm:$0xff] %vm2258_vm1, %v2226_v13  ;;  %v1430_v52 = vadd.f32 %v1378_v40, %v434_v10  ;;  %v3272_v61 = vpop.f32.mrf.mxu0 }
 0x1c5   : > { %v2097_v38 = vpop.f32.mrf.mxu1  ;;  %v1497_v32 = vld [vmem:[#allocation2 + $0x88] sm:$0xff] }
 0x1c6   : > { %1463 = vst.msk [vmem:[#allocation2 + $0x90] sm:$0xff] %vm383_vm0, %v1430_v52  ;;  %v2098_v27 = vadd.f32 %v2097_v38, %v3209_v2  ;;  %v1721_v31 = vmul.f32 %v1632_v63, %v1497_v32  ;;  %v1762_v38 = vld [vmem:[%s3031_s15 + $0xc0] sm:$0xff] }
 0x1c7   : > { %v1290_v0 = vpop.f32.mrf.mxu2 }
 0x1c8   : > { %v1379_v29 = vpop.f32.mrf.mxu3  ;;  %v2195_v30 = vadd.f32 %v3232_v50, %v2098_v27  ;;  %v1291_v33 = vadd.f32 %v1290_v0, %v2944_v58  ;;  %2593 = vmatmul.msk.f32.gmra.mxu1 %vm383_vm0, %v1721_v31  ;;  %v438_v31 = vld [vmem:[#allocation2 + $0xb0] sm:$0xff] }
 0x1c9   : > { %2567 = vmatmul.msk.f32.gmra.mxu0 %vm383_vm0, %v1761_v49 }
 0x1ca   : > { %v2227_v3 = vmax.f32 %v2195_v30, 0.0  ;;  %v1380_v24 = vadd.f32 %v1379_v29, %v1291_v33 }
 0x1cc   : > { %2260 = vst.msk [vmem:[%s3246_s19 + $0x8] sm:$0xff] %vm2258_vm1, %v2227_v3  ;;  %v1431_v2 = vadd.f32 %v1380_v24, %v435_v16 }
 0x1cd   : > { %v2100_v20 = vpop.f32.mrf.mxu1  ;;  %v1498_v44 = vld [vmem:[#allocation2 + $0x90] sm:$0xff] }
 0x1ce   : > { %1464 = vst.msk [vmem:[#allocation2 + $0x98] sm:$0xff] %vm383_vm0, %v1431_v2  ;;  %v2101_v58 = vadd.f32 %v2100_v20, %v3215_v41  ;;  %v1722_v45 = vmul.f32 %v1637_v43, %v1498_v44  ;;  %v3283_v13 = vpop.f32.mrf.mxu0  ;;  %v1763_v2 = vld [vmem:[%s3031_s15 + $0xc8] sm:$0xff] }
 0x1cf   : > { %v1293_v18 = vpop.f32.mrf.mxu2 }
 0x1d0   : > { %v1382_v53 = vpop.f32.mrf.mxu3  ;;  %v2196_v48 = vadd.f32 %v3232_v50, %v2101_v58  ;;  %v1294_v35 = vadd.f32 %v1293_v18, %v2947_v4  ;;  %2594 = vmatmul.msk.f32.gmra.mxu1 %vm383_vm0, %v1722_v45  ;;  %v439_v58 = vld [vmem:[#allocation2 + $0xb8] sm:$0xff] }
 0x1d1   : > { %2568 = vmatmul.msk.f32.gmra.mxu0 %vm383_vm0, %v1762_v38 }
 0x1d2   : > { %v2228_v39 = vmax.f32 %v2196_v48, 0.0  ;;  %v1383_v57 = vadd.f32 %v1382_v53, %v1294_v35  ;;  %v1657_v53 = vpop.permute.xlu1 %1656 }
 0x1d4   : > { %2261 = vst.msk [vmem:[%s3246_s19 + $0x10] sm:$0xff] %vm2258_vm1, %v2228_v39  ;;  %v1432_v41 = vadd.f32 %v1383_v57, %v436_v59 }
 0x1d5   : > { %v2103_v51 = vpop.f32.mrf.mxu1  ;;  %v1499_v6 = vld [vmem:[#allocation2 + $0x98] sm:$0xff] }
 0x1d6   : > { %1465 = vst.msk [vmem:[#allocation2 + $0xa0] sm:$0xff] %vm383_vm0, %v1432_v41  ;;  %v2104_v4 = vadd.f32 %v2103_v51, %v3222_v54  ;;  %v1723_v15 = vmul.f32 %v1642_v28, %v1499_v6  ;;  %v3294_v16 = vpop.f32.mrf.mxu0  ;;  %v1764_v28 = vld [vmem:[%s3031_s15 + $0xd0] sm:$0xff]  ;;  %v440_v6 = vld [vmem:[#allocation2 + $0xc0] sm:$0xff] }
 0x1d7   : > { %v1295_v62 = vpop.f32.mrf.mxu2 }
 0x1d8   : > { %v1384_v1 = vpop.f32.mrf.mxu3  ;;  %v2197_v25 = vadd.f32 %v3232_v50, %v2104_v4  ;;  %v1296_v11 = vadd.f32 %v1295_v62, %v2950_v23  ;;  %2595 = vmatmul.msk.f32.gmra.mxu1 %vm383_vm0, %v1723_v15  ;;  %v1662_v62 = vpop.permute.xlu2 %1661 }
 0x1d9   : > { %2569 = vmatmul.msk.f32.gmra.mxu0 %vm383_vm0, %v1763_v2 }
 0x1da   : > { %v2229_v42 = vmax.f32 %v2197_v25, 0.0  ;;  %v1385_v17 = vadd.f32 %v1384_v1, %v1296_v11 }
 0x1dc   : > { %2262 = vst.msk [vmem:[%s3246_s19 + $0x18] sm:$0xff] %vm2258_vm1, %v2229_v42  ;;  %v1433_v54 = vadd.f32 %v1385_v17, %v437_v14  ;;  %v1765_v17 = vld [vmem:[%s3031_s15 + $0xd8] sm:$0xff] }
 0x1dd   : > { %v2106_v12 = vpop.f32.mrf.mxu1  ;;  %v1500_v10 = vld [vmem:[#allocation2 + $0xa0] sm:$0xff] }
 0x1de   : > { %1466 = vst.msk [vmem:[#allocation2 + $0xa8] sm:$0xff] %vm383_vm0, %v1433_v54  ;;  %v2107_v23 = vadd.f32 %v2106_v12, %v3234_v8  ;;  %v1724_v40 = vmul.f32 %v1647_v5, %v1500_v10  ;;  %v3305_v35 = vpop.f32.mrf.mxu0  ;;  %v441_v12 = vld [vmem:[#allocation2 + $0xc8] sm:$0xff] }
 0x1df   : > { %v1298_v63 = vpop.f32.mrf.mxu2 }
 0x1e0   : > { %v1387_v52 = vpop.f32.mrf.mxu3  ;;  %v2198_v32 = vadd.f32 %v3232_v50, %v2107_v23  ;;  %v1299_v27 = vadd.f32 %v1298_v63, %v2955_v36  ;;  %2596 = vmatmul.msk.f32.gmra.mxu1 %vm383_vm0, %v1724_v40  ;;  %v1667_v40 = vpop.permute.xlu0 %1666 }
 0x1e1   : > { %2570 = vmatmul.msk.f32.gmra.mxu0 %vm383_vm0, %v1764_v28 }
 0x1e2   : > { %v2230_v0 = vmax.f32 %v2198_v32, 0.0  ;;  %v1388_v29 = vadd.f32 %v1387_v52, %v1299_v27 }
 0x1e4   : > { %2263 = vst.msk [vmem:[%s3246_s19 + $0x20] sm:$0xff] %vm2258_vm1, %v2230_v0  ;;  %v1434_v8 = vadd.f32 %v1388_v29, %v438_v31  ;;  %v1766_v0 = vld [vmem:[%s3031_s15 + $0xe0] sm:$0xff] }
 0x1e5   : > { %v2109_v30 = vpop.f32.mrf.mxu1  ;;  %v1501_v33 = vld [vmem:[#allocation2 + $0xa8] sm:$0xff] }
 0x1e6   : > { %1467 = vst.msk [vmem:[#allocation2 + $0xb0] sm:$0xff] %vm383_vm0, %v1434_v8  ;;  %v2110_v36 = vadd.f32 %v2109_v30, %v3250_v21  ;;  %v1725_v3 = vmul.f32 %v1652_v55, %v1501_v33  ;;  %v3316_v25 = vpop.f32.mrf.mxu0  ;;  %v442_v8 = vld [vmem:[#allocation2 + $0xd0] sm:$0xff] }
 0x1e7   : > { %v1300_v24 = vpop.f32.mrf.mxu2 }
 0x1e8   : > { %v1389_v43 = vpop.f32.mrf.mxu3  ;;  %v2199_v20 = vadd.f32 %v3232_v50, %v2110_v36  ;;  %v1301_v44 = vadd.f32 %v1300_v24, %v2966_v60  ;;  %2597 = vmatmul.msk.f32.gmra.mxu1 %vm383_vm0, %v1725_v3  ;;  %v1672_v36 = vpop.permute.xlu1 %1671 }
 0x1e9   : > { %2571 = vmatmul.msk.f32.gmra.mxu0 %vm383_vm0, %v1765_v17 }
 0x1ea   : > { %v2231_v45 = vmax.f32 %v2199_v20, 0.0  ;;  %v1390_v18 = vadd.f32 %v1389_v43, %v1301_v44 }
 0x1ec   : > { %2264 = vst.msk [vmem:[%s3246_s19 + $0x28] sm:$0xff] %vm2258_vm1, %v2231_v45  ;;  %v1435_v21 = vadd.f32 %v1390_v18, %v439_v58  ;;  %v1767_v58 = vld [vmem:[%s3031_s15 + $0xe8] sm:$0xff] }
 0x1ed   : > { %v2112_v46 = vpop.f32.mrf.mxu1  ;;  %v1502_v48 = vld [vmem:[#allocation2 + $0xb0] sm:$0xff] }
 0x1ee   : > { %1468 = vst.msk [vmem:[#allocation2 + $0xb8] sm:$0xff] %vm383_vm0, %v1435_v21  ;;  %v2113_v60 = vadd.f32 %v2112_v46, %v3261_v22  ;;  %v1726_v59 = vmul.f32 %v1657_v53, %v1502_v48  ;;  %v3327_v38 = vpop.f32.mrf.mxu0  ;;  %v443_v53 = vld [vmem:[#allocation2 + $0xd8] sm:$0xff]  ;;  %v1677_v48 = vpop.permute.xlu2 %1676 }
 0x1ef   : > { %v1303_v39 = vpop.f32.mrf.mxu2 }
 0x1f0   : > { %v1392_v57 = vpop.f32.mrf.mxu3  ;;  %v2200_v41 = vadd.f32 %v3232_v50, %v2113_v60  ;;  %v1304_v51 = vadd.f32 %v1303_v39, %v2968_v7  ;;  %2598 = vmatmul.msk.f32.gmra.mxu1 %vm383_vm0, %v1726_v59 }
 0x1f1   : > { %2572 = vmatmul.msk.f32.gmra.mxu0 %vm383_vm0, %v1766_v0 }
 0x1f2   : > { %v2232_v4 = vmax.f32 %v2200_v41, 0.0  ;;  %v1393_v15 = vadd.f32 %v1392_v57, %v1304_v51  ;;  %v1768_v51 = vld [vmem:[%s3031_s15 + $0xf0] sm:$0xff] }
 0x1f4   : > { %2265 = vst.msk [vmem:[%s3246_s19 + $0x30] sm:$0xff] %vm2258_vm1, %v2232_v4  ;;  %v1436_v22 = vadd.f32 %v1393_v15, %v440_v6  ;;  %v444_v15 = vld [vmem:[#allocation2 + $0xe0] sm:$0xff] }
 0x1f5   : > { %v2115_v1 = vpop.f32.mrf.mxu1  ;;  %v1503_v49 = vld [vmem:[#allocation2 + $0xb8] sm:$0xff] }
 0x1f6   : > { %1469 = vst.msk [vmem:[#allocation2 + $0xc0] sm:$0xff] %vm383_vm0, %v1436_v22  ;;  %v2116_v7 = vadd.f32 %v2115_v1, %v3272_v61  ;;  %v1727_v11 = vmul.f32 %v1662_v62, %v1503_v49  ;;  %v3338_v43 = vpop.f32.mrf.mxu0  ;;  %v1682_v1 = vpop.permute.xlu0 %1681 }
 0x1f7   : > { %v1305_v14 = vpop.f32.mrf.mxu2 }
 0x1f8   : > { %v1394_v42 = vpop.f32.mrf.mxu3  ;;  %v2201_v5 = vadd.f32 %v3232_v50, %v2116_v7  ;;  %v1306_v54 = vadd.f32 %v1305_v14, %v2970_v26  ;;  %2599 = vmatmul.msk.f32.gmra.mxu1 %vm383_vm0, %v1727_v11 }
 0x1f9   : > { %2573 = vmatmul.msk.f32.gmra.mxu0 %vm383_vm0, %v1767_v58 }
 0x1fa   : > { %v2233_v10 = vmax.f32 %v2201_v5, 0.0  ;;  %v1395_v23 = vadd.f32 %v1394_v42, %v1306_v54  ;;  %v1769_v5 = vld [vmem:[%s3031_s15 + $0xf8] sm:$0xff] }
 0x1fc   : > { %2266 = vst.msk [vmem:[%s3246_s19 + $0x38] sm:$0xff] %vm2258_vm1, %v2233_v10  ;;  %v1437_v61 = vadd.f32 %v1395_v23, %v441_v12  ;;  %v445_v10 = vld [vmem:[#allocation2 + $0xe8] sm:$0xff] }
 0x1fd   : > { %v2118_v63 = vpop.f32.mrf.mxu1  ;;  %v1504_v52 = vld [vmem:[#allocation2 + $0xc0] sm:$0xff] }
 0x1fe   : > { %1470 = vst.msk [vmem:[#allocation2 + $0xc8] sm:$0xff] %vm383_vm0, %v1437_v61  ;;  %v2119_v26 = vadd.f32 %v2118_v63, %v3283_v13  ;;  %v1728_v32 = vmul.f32 %v1667_v40, %v1504_v52  ;;  %v3349_v39 = vpop.f32.mrf.mxu0  ;;  %v1687_v61 = vpop.permute.xlu1 %1686 }
 0x1ff   : > { %v1308_v27 = vpop.f32.mrf.mxu2 }
 0x200   : > { %v1397_v31 = vpop.f32.mrf.mxu3  ;;  %v2202_v29 = vadd.f32 %v3232_v50, %v2119_v26  ;;  %v1309_v55 = vadd.f32 %v1308_v27, %v2974_v34  ;;  %2600 = vmatmul.msk.f32.gmra.mxu1 %vm383_vm0, %v1728_v32 }
 0x201   : > { %2574 = vmatmul.msk.f32.gmra.mxu0 %vm383_vm0, %v1768_v51 }
 0x202   : > { %v2234_v30 = vmax.f32 %v2202_v29, 0.0  ;;  %v1398_v33 = vadd.f32 %v1397_v31, %v1309_v55  ;;  %v446_v55 = vld [vmem:[#allocation2 + $0xf0] sm:$0xff] }
 0x204   : > { %2267 = vst.msk [vmem:[%s3246_s19 + $0x40] sm:$0xff] %vm2258_vm1, %v2234_v30  ;;  %v1438_v13 = vadd.f32 %v1398_v33, %v442_v8 }
 0x205   : > { %v2121_v3 = vpop.f32.mrf.mxu1  ;;  %v1505_v24 = vld [vmem:[#allocation2 + $0xc8] sm:$0xff] }
 0x206   : > { %1471 = vst.msk [vmem:[#allocation2 + $0xd0] sm:$0xff] %vm383_vm0, %v1438_v13  ;;  %v2122_v34 = vadd.f32 %v2121_v3, %v3294_v16  ;;  %v1729_v2 = vmul.f32 %v1672_v36, %v1505_v24  ;;  %v3360_v11 = vpop.f32.mrf.mxu0  ;;  %v1692_v36 = vpop.permute.xlu2 %1691 }
 0x207   : > { %v1310_v20 = vpop.f32.mrf.mxu2 }
 0x208   : > { %v1399_v44 = vpop.f32.mrf.mxu3  ;;  %v2203_v45 = vadd.f32 %v3232_v50, %v2122_v34  ;;  %v1311_v18 = vadd.f32 %v1310_v20, %v2978_v47  ;;  %2601 = vmatmul.msk.f32.gmra.mxu1 %vm383_vm0, %v1729_v2 }
 0x209   : > { %2575 = vmatmul.msk.f32.gmra.mxu0 %vm383_vm0, %v1769_v5 }
 0x20a   : > { %v2235_v21 = vmax.f32 %v2203_v45, 0.0  ;;  %v1400_v46 = vadd.f32 %v1399_v44, %v1311_v18  ;;  %v447_v44 = vld [vmem:[#allocation2 + $0xf8] sm:$0xff] }
 0x20c   : > { %2268 = vst.msk [vmem:[%s3246_s19 + $0x48] sm:$0xff] %vm2258_vm1, %v2235_v21  ;;  %v1439_v16 = vadd.f32 %v1400_v46, %v443_v53  ;;  %v1697_v21 = vpop.permute.xlu0 %1696 }
 0x20d   : > { %v2124_v60 = vpop.f32.mrf.mxu1  ;;  %v1506_v59 = vld [vmem:[#allocation2 + $0xd0] sm:$0xff] }
 0x20e   : > { %1472 = vst.msk [vmem:[#allocation2 + $0xd8] sm:$0xff] %vm383_vm0, %v1439_v16  ;;  %v2125_v47 = vadd.f32 %v2124_v60, %v3305_v35  ;;  %v1730_v57 = vmul.f32 %v1677_v48, %v1506_v59  ;;  %v1933_v26 = vpop.f32.mrf.mxu0 }
 0x20f   : > { %v1313_v28 = vpop.f32.mrf.mxu2 }
 0x210   : > { %v1402_v41 = vpop.f32.mrf.mxu3  ;;  %v2204_v6 = vadd.f32 %v3232_v50, %v2125_v47  ;;  %v1314_v4 = vadd.f32 %v1313_v28, %v2992_v56  ;;  %2602 = vmatmul.msk.f32.gmra.mxu1 %vm383_vm0, %v1730_v57  ;;  %v1702_v47 = vpop.permute.xlu1 %1701 }
 0x212   : > { %v2236_v62 = vmax.f32 %v2204_v6, 0.0  ;;  %v1403_v22 = vadd.f32 %v1402_v41, %v1314_v4 }
 0x214   : > { %2269 = vst.msk [vmem:[%s3246_s19 + $0x50] sm:$0xff] %vm2258_vm1, %v2236_v62  ;;  %v1440_v35 = vadd.f32 %v1403_v22, %v444_v15 }
 0x215   : > { %v2127_v49 = vpop.f32.mrf.mxu1  ;;  %v1507_v7 = vld [vmem:[#allocation2 + $0xd8] sm:$0xff] }
 0x216   : > { %1473 = vst.msk [vmem:[#allocation2 + $0xe0] sm:$0xff] %vm383_vm0, %v1440_v35  ;;  %v2128_v56 = vadd.f32 %v2127_v49, %v3316_v25  ;;  %v1731_v14 = vmul.f32 %v1682_v1, %v1507_v7  ;;  %v1936_v2 = vpop.f32.mrf.mxu0 }
 0x217   : > { %v1315_v42 = vpop.f32.mrf.mxu2 }
 0x218   : > { %v1404_v17 = vpop.f32.mrf.mxu3  ;;  %v2205_v54 = vadd.f32 %v3232_v50, %v2128_v56  ;;  %v1316_v12 = vadd.f32 %v1315_v42, %v3014_v9  ;;  %2603 = vmatmul.msk.f32.gmra.mxu1 %vm383_vm0, %v1731_v14 }
 0x21a   : > { %v2237_v23 = vmax.f32 %v2205_v54, 0.0  ;;  %v1405_v40 = vadd.f32 %v1404_v17, %v1316_v12 }
 0x21c   : > { %2270 = vst.msk [vmem:[%s3246_s19 + $0x58] sm:$0xff] %vm2258_vm1, %v2237_v23  ;;  %v1441_v25 = vadd.f32 %v1405_v40, %v445_v10 }
 0x21d   : > { %v2130_v63 = vpop.f32.mrf.mxu1  ;;  %v1508_v52 = vld [vmem:[#allocation2 + $0xe0] sm:$0xff] }
 0x21e   : > { %1474 = vst.msk [vmem:[#allocation2 + $0xe8] sm:$0xff] %vm383_vm0, %v1441_v25  ;;  %v2131_v32 = vadd.f32 %v2130_v63, %v3327_v38  ;;  %v1732_v9 = vmul.f32 %v1687_v61, %v1508_v52  ;;  %v1939_v60 = vpop.f32.mrf.mxu0 }
 0x21f   : > { %v1318_v27 = vpop.f32.mrf.mxu2 }
 0x220   : > { %v1407_v31 = vpop.f32.mrf.mxu3  ;;  %v2206_v0 = vadd.f32 %v3232_v50, %v2131_v32  ;;  %v1319_v29 = vadd.f32 %v1318_v27, %v3043_v19  ;;  %2604 = vmatmul.msk.f32.gmra.mxu1 %vm383_vm0, %v1732_v9 }
 0x222   : > { %v2238_v8 = vmax.f32 %v2206_v0, 0.0  ;;  %v1408_v30 = vadd.f32 %v1407_v31, %v1319_v29 }
 0x224   : > { %2271 = vst.msk [vmem:[%s3246_s19 + $0x60] sm:$0xff] %vm2258_vm1, %v2238_v8  ;;  %v1442_v33 = vadd.f32 %v1408_v30, %v446_v55 }
 0x225   : > { %v2133_v13 = vpop.f32.mrf.mxu1  ;;  %v1509_v3 = vld [vmem:[#allocation2 + $0xe8] sm:$0xff] }
 0x226   : > { %1475 = vst.msk [vmem:[#allocation2 + $0xf0] sm:$0xff] %vm383_vm0, %v1442_v33  ;;  %v2134_v38 = vadd.f32 %v2133_v13, %v3338_v43  ;;  %v1733_v24 = vmul.f32 %v1692_v36, %v1509_v3  ;;  %v1942_v4 = vpop.f32.mrf.mxu0 }
 0x227   : > { %v1320_v34 = vpop.f32.mrf.mxu2 }
 0x228   : > { %v2207_v19 = vadd.f32 %v3232_v50, %v2134_v38  ;;  %v1321_v20 = vadd.f32 %v1320_v34, %v3065_v37  ;;  %2605 = vmatmul.msk.f32.gmra.mxu1 %vm383_vm0, %v1733_v24  ;;  %v1409_v58 = vpop.f32.mrf.mxu3 }
 0x22a   : > { %v2239_v45 = vmax.f32 %v2207_v19, 0.0  ;;  %v1410_v18 = vadd.f32 %v1409_v58, %v1321_v20 }
 0x22c   : > { %2272 = vst.msk [vmem:[%s3246_s19 + $0x68] sm:$0xff] %vm2258_vm1, %v2239_v45  ;;  %v1443_v53 = vadd.f32 %v1410_v18, %v447_v44 }
 0x22d   : > { %v2136_v46 = vpop.f32.mrf.mxu1  ;;  %v1510_v43 = vld [vmem:[#allocation2 + $0xf0] sm:$0xff] }
 0x22e   : > { %1476 = vst.msk [vmem:[#allocation2 + $0xf8] sm:$0xff] %vm383_vm0, %v1443_v53  ;;  %v2137_v48 = vadd.f32 %v2136_v46, %v3349_v39  ;;  %v1734_v16 = vmul.f32 %v1697_v21, %v1510_v43  ;;  %v1945_v49 = vpop.f32.mrf.mxu0 }
 0x230   : > { %v2208_v37 = vadd.f32 %v3232_v50, %v2137_v48  ;;  %2606 = vmatmul.msk.f32.gmra.mxu1 %vm383_vm0, %v1734_v16 }
 0x232   : > { %v2240_v59 = vmax.f32 %v2208_v37, 0.0 }
 0x234   : > { %2273 = vst.msk [vmem:[%s3246_s19 + $0x70] sm:$0xff] %vm2258_vm1, %v2240_v59 }
 0x235   : > { %v2139_v57 = vpop.f32.mrf.mxu1  ;;  %v1511_v28 = vld [vmem:[#allocation2 + $0xf8] sm:$0xff] }
 0x236   : > { %v2140_v41 = vadd.f32 %v2139_v57, %v3360_v11  ;;  %v1735_v51 = vmul.f32 %v1702_v47, %v1511_v28  ;;  %v1948_v17 = vpop.f32.mrf.mxu0 }
 0x238   : > { %v2209_v39 = vadd.f32 %v3232_v50, %v2140_v41  ;;  %2607 = vmatmul.msk.f32.gmra.mxu1 %vm383_vm0, %v1735_v51 }
 0x23a   : > { %v2241_v6 = vmax.f32 %v2209_v39, 0.0 }
 0x23c   : > { %2274 = vst.msk [vmem:[%s3246_s19 + $0x78] sm:$0xff] %vm2258_vm1, %v2241_v6 }
 0x23d   : > { %v2142_v15 = vpop.f32.mrf.mxu1 }
 0x23e   : > { %v2143_v62 = vadd.f32 %v2142_v15, %v1933_v26  ;;  %v1951_v40 = vpop.f32.mrf.mxu0 }
 0x240   : > { %v2210_v22 = vadd.f32 %v3232_v50, %v2143_v62 }
 0x242   : > { %v2242_v1 = vmax.f32 %v2210_v22, 0.0 }
 0x244   : > { %2275 = vst.msk [vmem:[%s3246_s19 + $0x80] sm:$0xff] %vm2258_vm1, %v2242_v1 }
 0x245   : > { %v2145_v35 = vpop.f32.mrf.mxu1 }
 0x246   : > { %v2146_v7 = vadd.f32 %v2145_v35, %v1936_v2  ;;  %v1954_v32 = vpop.f32.mrf.mxu0 }
 0x248   : > { %v2211_v11 = vadd.f32 %v3232_v50, %v2146_v7 }
 0x24a   : > { %v2243_v56 = vmax.f32 %v2211_v11, 0.0 }
 0x24c   : > { %2276 = vst.msk [vmem:[%s3246_s19 + $0x88] sm:$0xff] %vm2258_vm1, %v2243_v56 }
 0x24d   : > { %v2148_v14 = vpop.f32.mrf.mxu1 }
 0x24e   : > { %v2149_v42 = vadd.f32 %v2148_v14, %v1939_v60  ;;  %v1957_v55 = vpop.f32.mrf.mxu0 }
 0x250   : > { %v2212_v5 = vadd.f32 %v3232_v50, %v2149_v42 }
 0x252   : > { %v2244_v54 = vmax.f32 %v2212_v5, 0.0 }
 0x254   : > { %2277 = vst.msk [vmem:[%s3246_s19 + $0x90] sm:$0xff] %vm2258_vm1, %v2244_v54 }
 0x255   : > { %v2151_v12 = vpop.f32.mrf.mxu1 }
 0x256   : > { %v2152_v10 = vadd.f32 %v2151_v12, %v1942_v4  ;;  %v1960_v3 = vpop.f32.mrf.mxu0 }
 0x258   : > { %v2213_v23 = vadd.f32 %v3232_v50, %v2152_v10 }
 0x25a   : > { %v2245_v61 = vmax.f32 %v2213_v23, 0.0 }
 0x25c   : > { %2278 = vst.msk [vmem:[%s3246_s19 + $0x98] sm:$0xff] %vm2258_vm1, %v2245_v61 }
 0x25d   : > { %v2154_v25 = vpop.f32.mrf.mxu1 }
 0x25e   : > { %v2155_v63 = vadd.f32 %v2154_v25, %v1945_v49  ;;  %v1963_v20 = vpop.f32.mrf.mxu0 }
 0x260   : > { %v2214_v52 = vadd.f32 %v3232_v50, %v2155_v63 }
 0x262   : > { %v2246_v26 = vmax.f32 %v2214_v52, 0.0 }
 0x264   : > { %2279 = vst.msk [vmem:[%s3246_s19 + $0xa0] sm:$0xff] %vm2258_vm1, %v2246_v26 }
 0x265   : > { %v2157_v9 = vpop.f32.mrf.mxu1 }
 0x266   : > { %v2158_v27 = vadd.f32 %v2157_v9, %v1948_v17  ;;  %v1966_v21 = vpop.f32.mrf.mxu0 }
 0x268   : > { %v2215_v31 = vadd.f32 %v3232_v50, %v2158_v27 }
 0x26a   : > { %v2247_v0 = vmax.f32 %v2215_v31, 0.0 }
 0x26c   : > { %2280 = vst.msk [vmem:[%s3246_s19 + $0xa8] sm:$0xff] %vm2258_vm1, %v2247_v0 }
 0x26d   : > { %v2160_v29 = vpop.f32.mrf.mxu1 }
 0x26e   : > { %v2161_v8 = vadd.f32 %v2160_v29, %v1951_v40  ;;  %v1969_v60 = vpop.f32.mrf.mxu0 }
 0x270   : > { %v2216_v30 = vadd.f32 %v3232_v50, %v2161_v8 }
 0x272   : > { %v2248_v33 = vmax.f32 %v2216_v30, 0.0 }
 0x274   : > { %2281 = vst.msk [vmem:[%s3246_s19 + $0xb0] sm:$0xff] %vm2258_vm1, %v2248_v33 }
 0x275   : > { %v2163_v36 = vpop.f32.mrf.mxu1 }
 0x276   : > { %v2164_v13 = vadd.f32 %v2163_v36, %v1954_v32  ;;  %v1972_v51 = vpop.f32.mrf.mxu0 }
 0x278   : > { %v2217_v38 = vadd.f32 %v3232_v50, %v2164_v13 }
 0x27a   : > { %v2249_v24 = vmax.f32 %v2217_v38, 0.0 }
 0x27c   : > { %2282 = vst.msk [vmem:[%s3246_s19 + $0xb8] sm:$0xff] %vm2258_vm1, %v2249_v24 }
 0x27d   : > { %v2166_v34 = vpop.f32.mrf.mxu1 }
 0x27e   : > { %v2167_v2 = vadd.f32 %v2166_v34, %v1957_v55  ;;  %v1975_v22 = vpop.f32.mrf.mxu0 }
 0x280   : > { %v2218_v19 = vadd.f32 %v3232_v50, %v2167_v2 }
 0x282   : > { %v2250_v44 = vmax.f32 %v2218_v19, 0.0 }
 0x284   : > { %2283 = vst.msk [vmem:[%s3246_s19 + $0xc0] sm:$0xff] %vm2258_vm1, %v2250_v44 }
 0x285   : > { %v2169_v58 = vpop.f32.mrf.mxu1 }
 0x286   : > { %v2170_v45 = vadd.f32 %v2169_v58, %v1960_v3  ;;  %v1978_v56 = vpop.f32.mrf.mxu0 }
 0x288   : > { %v2219_v18 = vadd.f32 %v3232_v50, %v2170_v45 }
 0x28a   : > { %v2251_v53 = vmax.f32 %v2219_v18, 0.0 }
 0x28c   : > { %2284 = vst.msk [vmem:[%s3246_s19 + $0xc8] sm:$0xff] %vm2258_vm1, %v2251_v53 }
 0x28d   : > { %v2172_v46 = vpop.f32.mrf.mxu1 }
 0x28e   : > { %v2173_v43 = vadd.f32 %v2172_v46, %v1963_v20 }
 0x290   : > { %v2220_v48 = vadd.f32 %v3232_v50, %v2173_v43 }
 0x292   : > { %v2252_v16 = vmax.f32 %v2220_v48, 0.0 }
 0x294   : > { %2285 = vst.msk [vmem:[%s3246_s19 + $0xd0] sm:$0xff] %vm2258_vm1, %v2252_v16 }
 0x295   : > { %v2175_v37 = vpop.f32.mrf.mxu1 }
 0x296   : > { %v2176_v59 = vadd.f32 %v2175_v37, %v1966_v21 }
 0x298   : > { %v2221_v47 = vadd.f32 %v3232_v50, %v2176_v59 }
 0x29a   : > { %v2253_v57 = vmax.f32 %v2221_v47, 0.0 }
 0x29c   : > { %2286 = vst.msk [vmem:[%s3246_s19 + $0xd8] sm:$0xff] %vm2258_vm1, %v2253_v57 }
 0x29d   : > { %v2178_v28 = vpop.f32.mrf.mxu1 }
 0x29e   : > { %v2179_v41 = vadd.f32 %v2178_v28, %v1969_v60 }
 0x2a0   : > { %v2222_v39 = vadd.f32 %v3232_v50, %v2179_v41 }
 0x2a2   : > { %v2254_v6 = vmax.f32 %v2222_v39, 0.0 }
 0x2a4   : > { %2287 = vst.msk [vmem:[%s3246_s19 + $0xe0] sm:$0xff] %vm2258_vm1, %v2254_v6 }
 0x2a5   : > { %v2181_v4 = vpop.f32.mrf.mxu1 }
 0x2a6   : > { %v2182_v15 = vadd.f32 %v2181_v4, %v1972_v51 }
 0x2a8   : > { %v2223_v62 = vadd.f32 %v3232_v50, %v2182_v15 }
 0x2aa   : > { %v2255_v1 = vmax.f32 %v2223_v62, 0.0 }
 0x2ac   : > { %2288 = vst.msk [vmem:[%s3246_s19 + $0xe8] sm:$0xff] %vm2258_vm1, %v2255_v1 }
 0x2ad   : > { %v2184_v35 = vpop.f32.mrf.mxu1 }
 0x2ae   : > { %v2185_v49 = vadd.f32 %v2184_v35, %v1975_v22 }
 0x2b0   : > { %v2224_v7 = vadd.f32 %v3232_v50, %v2185_v49 }
 0x2b2   : > { %v2256_v11 = vmax.f32 %v2224_v7, 0.0 }
 0x2b4   : > { %2289 = vst.msk [vmem:[%s3246_s19 + $0xf0] sm:$0xff] %vm2258_vm1, %v2256_v11 }
 0x2b5   : > { %v2187_v14 = vpop.f32.mrf.mxu1 }
 0x2b6   : > { %v2188_v42 = vadd.f32 %v2187_v14, %v1978_v56 }
 0x2b8   : > { %v2225_v17 = vadd.f32 %v3232_v50, %v2188_v42 }
 0x2ba   : > { %v2257_v5 = vmax.f32 %v2225_v17, 0.0 }
 0x2bc   : > { %2290 = vst.msk [vmem:[%s3246_s19 + $0xf8] sm:$0xff] %vm2258_vm1, %v2257_v5 }
 0x2bd PF: > { %s17_s26 = sadd.s32 1, %s2711_s26   ;;  %s3461_s24 = smov %s2707_s25 }
 0x2be   : > { %p14_p6 = scmp.ge.s32.totalorder %s17_s26, 4   ;;  %s3462_s25 = smov %s3464_s27 }
 0x2c0   :  { %16 = sbr.rel (!%p14_p6) target bundleno = 2 (0x2), region = 95 }

// kernel: gnn_linear_forward.3
= control target key start
LH: loop header
LB: loop body
LE: loop exit
PB: predicated region body
PF: predicated region fallthrough
CT: control target
= control target key end

     0   :  { %s3596_s27 = smov 0   ;;  %s3598_s28 = smov 0   ;;  %s4456_s0 = inlined_call_operand.vmem [shape: s8[512,512], index: 0, kind: input, shape index: {}]   ;;  %s4457_s1 = inlined_call_operand.vmem [shape: bf16[512,16], index: 1, kind: input, shape index: {}]   ;;  %s4458_s2 = inlined_call_operand.vmem [shape: f32[512,32], index: 2, kind: input, shape index: {}]   ;;  %s4459_s3 = inlined_call_operand.vmem [shape: f32[512,1], index: 3, kind: input, shape index: {}]   ;;  %s4460_s4 = inlined_call_operand.vmem [shape: f32[32,16], index: 4, kind: input, shape index: {}]   ;;  %s4461_s5 = inlined_call_operand.vmem [shape: f32[1,16], index: 5, kind: input, shape index: {}]   ;;  %s4462_s6 = inlined_call_operand.vmem [shape: f32[16,128], index: 6, kind: input, shape index: {}]   ;;  %s4463_s7 = inlined_call_operand.vmem [shape: f32[1,128], index: 7, kind: input, shape index: {}]   ;;  %s4464_s8 = inlined_call_operand.vmem [shape: f32[512,128], index: 8, kind: output, shape index: {}]  }
   0x1   :  { %s3600_s29 = smov 0  }
   0x2 LB: > { %s30_s30 = sadd.s32 1, %s3543_s28  ;;  %p3079_p0 = scmp.ge.s32.totalorder %s3547_s29, 1  ;;  %s3547_s29 = sphi %s3600_s29, %s18_s29   ;;  %s3543_s28 = sphi %s3598_s28, %s4466_s28   ;;  %s3539_s27 = sphi %s3596_s27, %s4465_s27  }
   0x3   : > { %p32_p1 = scmp.ge.s32.totalorder %s30_s30, 2  ;;  %p316_p2 = scmp.lt.s32.totalorder %s3547_s29, 3 }
   0x5   : > { %s4468_s30 = smov (%p32_p1, %s30_s30), 0  ;;  %p317_p3 = pnand %p3079_p0, %p316_p2 }
   0x6   : > { %s3080_s13 = sshll.u32 (!%p317_p3), %s3539_s27, 3  ;;  %s3083_s14 = sshll.u32 (!%p317_p3), %s3539_s27, 5 }
   0x7   : > { %320 = sbr.rel (%p317_p3) target bundleno = 732 (0x2dc), region = 52  ;;  %p372_p4 = scmp.lt.s32.totalorder (!%p317_p3), %s3080_s13, 15 }
   0x8   : > { %p389_p5 = scmp.lt.s32.totalorder (!%p317_p3), %s3083_s14, 63 }
   0xc   : > { %v3323_v0 = vld [vmem:[%s4457_s1 + $0x38] sm:$0xff]  ;;  %v3322_v2 = vld [vmem:[%s4457_s1 + $0x30] sm:$0xff]  ;;  %v3321_v4 = vld [vmem:[%s4457_s1 + $0x28] sm:$0xff]  ;;  %s4470_s13 = smov (!%p372_p4, %s3080_s13), 15  ;;  %s4472_s14 = smov (!%p389_p5, %s3083_s14), 63  ;;  %vm1799_vm0 = vcmask 261120  }
   0xd   : > { %v3331_v1 = vld [vmem:[%s4457_s1 + $0x78] sm:$0xff]  ;;  %3348 = vmatpush.bf16.msra.mxu2 %v3323_v0  ;;  %v3330_v3 = vld [vmem:[%s4457_s1 + $0x70] sm:$0xff]  ;;  %1083 = vmatpush.bf16.msra.mxu0 %v3323_v0  ;;  %v3329_v5 = vld [vmem:[%s4457_s1 + $0x68] sm:$0xff]  ;;  %s3315_s26 = sshll.u32 %s4470_s13, 5  ;;  %s3733_s27 = sshll.u32 %s4472_s14, 3  ;;  %vm410_vm1 = vcmask 130048  }
   0xe   : > { %3356 = vmatpush.bf16.msra.mxu3 %v3331_v1  ;;  %1172 = vmatpush.bf16.msra.mxu1 %v3331_v1  ;;  %v3320_v6 = vld [vmem:[%s4457_s1 + $0x20] sm:$0xff]  ;;  %v3319_v8 = vld [vmem:[%s4457_s1 + $0x18] sm:$0xff]  ;;  %s3650_s16 = scalar_lea.vmem %s4456_s0, %s3315_s26  ;;  %v3318_v10 = vld [vmem:[%s4457_s1 + $0x10] sm:$0xff]  ;;  %s3739_s18 = scalar_lea.vmem %s4459_s3, %s3733_s27 }
   0xf   : > { %v3328_v7 = vld [vmem:[%s4457_s1 + $0x60] sm:$0xff]  ;;  %v3327_v9 = vld [vmem:[%s4457_s1 + $0x58] sm:$0xff]  ;;  %v3326_v11 = vld [vmem:[%s4457_s1 + $0x50] sm:$0xff]  ;;  %s3808_s26 = scalar_lea.vmem %s4458_s2, %s3733_s27  ;;  %s4237_s17 = scalar_lea.vmem %s4464_s8, %s3733_s27 }
  0x10   : > { %v3659_v12 = vld [vmem:[%s3650_s16 + $0x80] sm:$0xff]  ;;  %v3662_v13 = vld [vmem:[%s3650_s16 + $0x88] sm:$0xff]  ;;  %v3339_v32 = vld [vmem:[%s4457_s1 + $0xb8] sm:$0xff] }
  0x11   : > { %3349 = vmatpush.bf16.msra.mxu2 %v3322_v2  ;;  %1084 = vmatpush.bf16.msra.mxu0 %v3322_v2  ;;  %v3665_v14 = vld [vmem:[%s3650_s16] sm:$0xff]  ;;  %v3668_v15 = vld [vmem:[%s3650_s16 + $0x8] sm:$0xff]  ;;  %v571_v16 = vunpack.c.0.s8 %v3659_v12  ;;  %v575_v17 = vunpack.c.1.s8 %v3659_v12  ;;  %v572_v18 = vunpack.c.0.s8 %v3662_v13  ;;  %v576_v19 = vunpack.c.1.s8 %v3662_v13  ;;  %v3347_v33 = vld [vmem:[%s4457_s1 + $0xf8] sm:$0xff] }
  0x12   : > { %3357 = vmatpush.bf16.msra.mxu3 %v3330_v3  ;;  %1173 = vmatpush.bf16.msra.mxu1 %v3330_v3  ;;  %v3317_v20 = vld [vmem:[%s4457_s1 + $0x8] sm:$0xff]  ;;  %v507_v22 = vunpack.c.0.s8 %v3665_v14  ;;  %v511_v23 = vunpack.c.1.s8 %v3665_v14  ;;  %v508_v24 = vunpack.c.0.s8 %v3668_v15  ;;  %v512_v25 = vunpack.c.1.s8 %v3668_v15  ;;  %v3316_v30 = vld [vmem:[%s4457_s1] sm:$0xff]  ;;  %v1798_v42 = vld [vmem:[%s4460_s4 + $0x18] sm:$0xff] }
  0x13   : > { %v3325_v21 = vld [vmem:[%s4457_s1 + $0x48] sm:$0xff]  ;;  %v699_v26 = vcvt.s32.f32 %v571_v16  ;;  %v703_v27 = vcvt.s32.f32 %v575_v17  ;;  %v700_v28 = vcvt.s32.f32 %v572_v18  ;;  %v704_v29 = vcvt.s32.f32 %v576_v19  ;;  %v3324_v31 = vld [vmem:[%s4457_s1 + $0x40] sm:$0xff]  ;;  %v3338_v43 = vld [vmem:[%s4457_s1 + $0xb0] sm:$0xff] }
  0x14   : > { %v635_v34 = vcvt.s32.f32 %v507_v22  ;;  %v639_v35 = vcvt.s32.f32 %v511_v23  ;;  %v636_v36 = vcvt.s32.f32 %v508_v24  ;;  %v640_v37 = vcvt.s32.f32 %v512_v25  ;;  %v3346_v44 = vld [vmem:[%s4457_s1 + $0xf0] sm:$0xff]  ;;  %v3337_v45 = vld [vmem:[%s4457_s1 + $0xa8] sm:$0xff]  ;;  %v3336_v3 = vld [vmem:[%s4457_s1 + $0xa0] sm:$0xff] }
  0x15   : > { %3350 = vmatpush.bf16.msra.mxu2 %v3321_v4  ;;  %1085 = vmatpush.bf16.msra.mxu0 %v3321_v4  ;;  %v795_v38 = vpack.c.bf16 %v703_v27, %v699_v26  ;;  %v796_v39 = vpack.c.bf16 %v704_v29, %v700_v28  ;;  %v3345_v46 = vld [vmem:[%s4457_s1 + $0xe8] sm:$0xff]  ;;  %v579_v47 = vunpack.c.2.s8 %v3659_v12  ;;  %v583_v48 = vunpack.c.3.s8 %v3659_v12  ;;  %v3344_v4 = vld [vmem:[%s4457_s1 + $0xe0] sm:$0xff] }
  0x16   : > { %3358 = vmatpush.bf16.msra.mxu3 %v3329_v5  ;;  %1174 = vmatpush.bf16.msra.mxu1 %v3329_v5  ;;  %v763_v40 = vpack.c.bf16 %v639_v35, %v635_v34  ;;  %v764_v41 = vpack.c.bf16 %v640_v37, %v636_v36  ;;  %v580_v49 = vunpack.c.2.s8 %v3662_v13  ;;  %v584_v50 = vunpack.c.3.s8 %v3662_v13  ;;  %v1797_v5 = vld [vmem:[%s4460_s4 + $0x10] sm:$0xff] }
  0x17   : > { %v515_v51 = vunpack.c.2.s8 %v3665_v14  ;;  %v519_v52 = vunpack.c.3.s8 %v3665_v14  ;;  %v516_v53 = vunpack.c.2.s8 %v3668_v15  ;;  %v520_v54 = vunpack.c.3.s8 %v3668_v15 }
  0x18   : > { %v707_v55 = vcvt.s32.f32 %v579_v47  ;;  %v711_v56 = vcvt.s32.f32 %v583_v48  ;;  %v708_v57 = vcvt.s32.f32 %v580_v49  ;;  %v712_v58 = vcvt.s32.f32 %v584_v50 }
  0x19   : > { %3351 = vmatpush.bf16.msra.mxu2 %v3320_v6  ;;  %1086 = vmatpush.bf16.msra.mxu0 %v3320_v6  ;;  %v643_v59 = vcvt.s32.f32 %v515_v51  ;;  %v647_v60 = vcvt.s32.f32 %v519_v52  ;;  %v644_v61 = vcvt.s32.f32 %v516_v53  ;;  %v648_v62 = vcvt.s32.f32 %v520_v54  ;;  %v495_v6 = vld [vmem:[%s3650_s16 + $0xa0] sm:$0xff]  ;;  %v3334_v54 = vld [vmem:[%s4457_s1 + $0x90] sm:$0xff] }
  0x1a   : > { %3359 = vmatpush.bf16.msra.mxu3 %v3328_v7  ;;  %1175 = vmatpush.bf16.msra.mxu1 %v3328_v7  ;;  %v799_v63 = vpack.c.bf16 %v711_v56, %v707_v55  ;;  %v800_v0 = vpack.c.bf16 %v712_v58, %v708_v57  ;;  %v496_v7 = vld [vmem:[%s3650_s16 + $0xa8] sm:$0xff]  ;;  %v595_v34 = vunpack.c.2.s8 %v495_v6  ;;  %v599_v35 = vunpack.c.3.s8 %v495_v6  ;;  %v3342_v55 = vld [vmem:[%s4457_s1 + $0xd0] sm:$0xff]  ;;  %v499_v57 = vld [vmem:[%s3650_s16 + $0xc0] sm:$0xff] }
  0x1b   : > { %v767_v1 = vpack.c.bf16 %v647_v60, %v643_v59  ;;  %v768_v2 = vpack.c.bf16 %v648_v62, %v644_v61  ;;  %v588_v12 = vunpack.c.0.s8 %v496_v7  ;;  %v592_v13 = vunpack.c.1.s8 %v496_v7  ;;  %v1796_v56 = vld [vmem:[%s4460_s4 + $0x8] sm:$0xff]  ;;  %v1541_v60 = vld [vmem:[%s3739_s18 + $0x10] sm:$0xff]  ;;  %v483_v61 = vld [vmem:[%s3650_s16 + $0x40] sm:$0xff] }
  0x1c   : > { %v596_v36 = vunpack.c.2.s8 %v496_v7  ;;  %v600_v37 = vunpack.c.3.s8 %v496_v7  ;;  %v500_v58 = vld [vmem:[%s3650_s16 + $0xc8] sm:$0xff] }
  0x1d   : > { %3352 = vmatpush.bf16.msra.mxu2 %v3319_v8  ;;  %1087 = vmatpush.bf16.msra.mxu0 %v3319_v8  ;;  %v479_v8 = vld [vmem:[%s3650_s16 + $0x20] sm:$0xff]  ;;  %v1540_v59 = vld [vmem:[%s3739_s18 + $0x8] sm:$0xff] }
  0x1e   : > { %3360 = vmatpush.bf16.msra.mxu3 %v3327_v9  ;;  %1176 = vmatpush.bf16.msra.mxu1 %v3327_v9  ;;  %v480_v9 = vld [vmem:[%s3650_s16 + $0x28] sm:$0xff]  ;;  %v523_v14 = vunpack.c.0.s8 %v479_v8  ;;  %v527_v15 = vunpack.c.1.s8 %v479_v8 }
  0x1f   : > { %v524_v16 = vunpack.c.0.s8 %v480_v9  ;;  %v528_v17 = vunpack.c.1.s8 %v480_v9  ;;  %v484_v62 = vld [vmem:[%s3650_s16 + $0x48] sm:$0xff] }
  0x20   : > { %v651_v22 = vcvt.s32.f32 %v523_v14  ;;  %v655_v23 = vcvt.s32.f32 %v527_v15 }
  0x21   : > { %3353 = vmatpush.bf16.msra.mxu2 %v3318_v10  ;;  %1088 = vmatpush.bf16.msra.mxu0 %v3318_v10  ;;  %v587_v10 = vunpack.c.0.s8 %v495_v6  ;;  %v652_v24 = vcvt.s32.f32 %v524_v16  ;;  %v656_v25 = vcvt.s32.f32 %v528_v17 }
  0x22   : > { %3361 = vmatpush.bf16.msra.mxu3 %v3326_v11  ;;  %1177 = vmatpush.bf16.msra.mxu1 %v3326_v11  ;;  %v591_v11 = vunpack.c.1.s8 %v495_v6  ;;  %v771_v28 = vpack.c.bf16 %v655_v23, %v651_v22  ;;  %v544_v6 = vunpack.c.1.s8 %v484_v62  ;;  %v1542_v22 = vld [vmem:[%s3739_s18 + $0x18] sm:$0xff]  ;;  %v1548_v23 = vld [vmem:[%s3739_s18 + $0x48] sm:$0xff] }
  0x23   : > { %v715_v18 = vcvt.s32.f32 %v587_v10  ;;  %v772_v29 = vpack.c.bf16 %v656_v25, %v652_v24  ;;  %v611_v24 = vunpack.c.2.s8 %v499_v57  ;;  %v615_v25 = vunpack.c.3.s8 %v499_v57 }
  0x24   : > { %v719_v19 = vcvt.s32.f32 %v591_v11  ;;  %v1545_v11 = vld [vmem:[%s3739_s18 + $0x30] sm:$0xff]  ;;  %v672_v15 = vcvt.s32.f32 %v544_v6 }
  0x25   : > { %3354 = vmatpush.bf16.msra.mxu2 %v3317_v20  ;;  %1089 = vmatpush.bf16.msra.mxu0 %v3317_v20  ;;  %v716_v20 = vcvt.s32.f32 %v588_v12 }
  0x26   : > { %3362 = vmatpush.bf16.msra.mxu3 %v3325_v21  ;;  %1178 = vmatpush.bf16.msra.mxu1 %v3325_v21  ;;  %v720_v21 = vcvt.s32.f32 %v592_v13  ;;  %v803_v26 = vpack.c.bf16 %v719_v19, %v715_v18 }
  0x28   : > { %v804_v27 = vpack.c.bf16 %v720_v21, %v716_v20  ;;  %v3333_v20 = vld [vmem:[%s4457_s1 + $0x88] sm:$0xff] }
  0x29   : > { %3355 = vmatpush.bf16.msra.mxu2 %v3316_v30  ;;  %1090 = vmatpush.bf16.msra.mxu0 %v3316_v30  ;;  %v3335_v30 = vld [vmem:[%s4457_s1 + $0x98] sm:$0xff]  ;;  %v3341_v21 = vld [vmem:[%s4457_s1 + $0xc8] sm:$0xff] }
  0x2a   : > { %3363 = vmatpush.bf16.msra.mxu3 %v3324_v31  ;;  %1179 = vmatpush.bf16.msra.mxu1 %v3324_v31  ;;  %v3343_v31 = vld [vmem:[%s4457_s1 + $0xd8] sm:$0xff] }
  0x2c   : > { %1131 = vmatmul.bf16.vlgmr.msra.gmra.mxu2 %v795_v38  ;;  %1091 = vmatmul.bf16.vlgmr.msra.gmra.mxu0 %v763_v40  ;;  %v531_v38 = vunpack.c.2.s8 %v479_v8  ;;  %v532_v40 = vunpack.c.2.s8 %v480_v9 }
  0x2d   : > { %1261 = vmatpush.bf16.msrb.mxu2 %v3339_v32  ;;  %1220 = vmatmul.bf16.vlgmr.msra.gmra.mxu3 %v796_v39  ;;  %v3549_v32 = vmov 0   ;;  %v535_v39 = vunpack.c.3.s8 %v479_v8 }
  0x2e   : > { %1350 = vmatpush.bf16.msrb.mxu3 %v3347_v33  ;;  %1908 = vmatpush.msrb.mxu0 %v1798_v42  ;;  %v1539_v33 = vld [vmem:[%s3739_s18] sm:$0xff]  ;;  %v723_v42 = vcvt.s32.f32 %v595_v34  ;;  %v660_v48 = vcvt.s32.f32 %v532_v40  ;;  %v743_v34 = vcvt.s32.f32 %v615_v25 }
  0x2f   : > { %1180 = vmatmul.bf16.vlgmr.msra.gmra.mxu1 %v764_v41  ;;  %3390 = vset.pattern.permute.xlu0 %v3549_v32  ;;  %v536_v41 = vunpack.c.3.s8 %v480_v9  ;;  %v663_v47 = vcvt.s32.f32 %v535_v39 }
  0x30   : > { %1909 = vmatpush.msrb.mxu0 %v1797_v5  ;;  %3391 = vset.pattern.permute.xlu1 %v3549_v32  ;;  %v540_v5 = vunpack.c.0.s8 %v484_v62 }
  0x31   : > { %1262 = vmatpush.bf16.msrb.mxu2 %v3338_v43  ;;  %1573 = vperm.xlu0 %3390, %v1539_v33   ;;  %v727_v43 = vcvt.s32.f32 %v599_v35  ;;  %v664_v49 = vcvt.s32.f32 %v536_v41  ;;  %v739_v33 = vcvt.s32.f32 %v611_v24 }
  0x32   : > { %1351 = vmatpush.bf16.msrb.mxu3 %v3346_v44  ;;  %3392 = vset.pattern.permute.xlu2 %v3549_v32  ;;  %v724_v44 = vcvt.s32.f32 %v596_v36  ;;  %v668_v14 = vcvt.s32.f32 %v540_v5  ;;  %v1546_v32 = vld [vmem:[%s3739_s18 + $0x38] sm:$0xff] }
  0x33   : > { %v807_v50 = vpack.c.bf16 %v727_v43, %v723_v42  ;;  %v776_v53 = vpack.c.bf16 %v664_v49, %v660_v48  ;;  %1910 = vmatpush.msrb.mxu0 %v1796_v56  ;;  %1583 = vperm.xlu1 %3391, %v1541_v60   ;;  %v815_v42 = vpack.c.bf16 %v743_v34, %v739_v33  ;;  %v3340_v48 = vld [vmem:[%s4457_s1 + $0xc0] sm:$0xff]  ;;  %v1558_v34 = vld [vmem:[%s3739_s18 + $0x98] sm:$0xff] }
  0x34   : > { %v780_v19 = vpack.c.bf16 %v672_v15, %v668_v14  ;;  %v1795_v49 = vld [vmem:[%s4460_s4] sm:$0xff] }
  0x35   : > { %1263 = vmatpush.bf16.msrb.mxu2 %v3337_v45  ;;  %v728_v45 = vcvt.s32.f32 %v600_v37  ;;  %v1551_v37 = vld [vmem:[%s3739_s18 + $0x60] sm:$0xff]  ;;  %1911 = vmatpush.msrb.mxu0 %v1795_v49 }
  0x36   : > { %1352 = vmatpush.bf16.msrb.mxu3 %v3345_v46  ;;  %v659_v46 = vcvt.s32.f32 %v531_v38  ;;  %v1543_v33 = vld [vmem:[%s3739_s18 + $0x20] sm:$0xff] }
  0x37   : > { %v808_v51 = vpack.c.bf16 %v728_v45, %v724_v44  ;;  %1593 = vperm.xlu2 %3392, %v1543_v33  }
  0x38   : > { %v775_v52 = vpack.c.bf16 %v663_v47, %v659_v46  ;;  %v503_v46 = vld [vmem:[%s3650_s16 + $0xe0] sm:$0xff] }
  0x39   : > { %1264 = vmatpush.bf16.msrb.mxu2 %v3336_v3  ;;  %1578 = vperm.xlu0 %3390, %v1540_v59   ;;  %v539_v3 = vunpack.c.0.s8 %v483_v61  ;;  %v3332_v47 = vld [vmem:[%s4457_s1 + $0x80] sm:$0xff]  ;;  %v623_v56 = vunpack.c.1.s8 %v503_v46  ;;  %v631_v14 = vunpack.c.3.s8 %v503_v46 }
  0x3a   : > { %1353 = vmatpush.bf16.msrb.mxu3 %v3344_v4  ;;  %v543_v4 = vunpack.c.1.s8 %v483_v61 }
  0x3b   : > { %v667_v12 = vcvt.s32.f32 %v539_v3  ;;  %1588 = vperm.xlu1 %3391, %v1542_v22   ;;  %v1552_v3 = vld [vmem:[%s3739_s18 + $0x68] sm:$0xff]  ;;  %v759_v24 = vcvt.s32.f32 %v631_v14 }
  0x3c   : > { %1136 = vmatmul.bf16.gmra.mxu2 %v799_v63  ;;  %1096 = vmatmul.bf16.gmra.mxu0 %v767_v1  ;;  %v603_v63 = vunpack.c.0.s8 %v499_v57  ;;  %v604_v1 = vunpack.c.0.s8 %v500_v58  ;;  %v671_v13 = vcvt.s32.f32 %v543_v4  ;;  %v1557_v4 = vld [vmem:[%s3739_s18 + $0x90] sm:$0xff] }
  0x3d   : > { %1225 = vmatmul.bf16.gmra.mxu3 %v800_v0  ;;  %1265 = vmatpush.bf16.msrb.mxu2 %v3335_v30  ;;  %v607_v0 = vunpack.c.1.s8 %v499_v57  ;;  %v548_v30 = vunpack.c.2.s8 %v484_v62 }
  0x3e   : > { %1354 = vmatpush.bf16.msrb.mxu3 %v3343_v31  ;;  %v731_v7 = vcvt.s32.f32 %v603_v63  ;;  %v732_v9 = vcvt.s32.f32 %v604_v1  ;;  %v779_v18 = vpack.c.bf16 %v671_v13, %v667_v12  ;;  %v552_v31 = vunpack.c.3.s8 %v484_v62 }
  0x3f   : > { %1185 = vmatmul.bf16.gmra.mxu1 %v768_v2  ;;  %v608_v2 = vunpack.c.1.s8 %v500_v58  ;;  %v735_v8 = vcvt.s32.f32 %v607_v0  ;;  %v676_v40 = vcvt.s32.f32 %v548_v30  ;;  %v751_v0 = vcvt.s32.f32 %v623_v56  ;;  %v1569_v56 = vld [vmem:[%s3739_s18 + $0xf0] sm:$0xff] }
  0x40   : > { %v680_v41 = vcvt.s32.f32 %v552_v31  ;;  %v627_v13 = vunpack.c.2.s8 %v503_v46 }
  0x41   : > { %1266 = vmatpush.bf16.msrb.mxu2 %v3334_v54  ;;  %v736_v10 = vcvt.s32.f32 %v608_v2  ;;  %v811_v16 = vpack.c.bf16 %v735_v8, %v731_v7  ;;  %1603 = vperm.xlu0 %3390, %v1545_v11   ;;  %v488_v54 = vld [vmem:[%s3650_s16 + $0x68] sm:$0xff] }
  0x42   : > { %1355 = vmatpush.bf16.msrb.mxu3 %v3342_v55  ;;  %v784_v45 = vpack.c.bf16 %v680_v41, %v676_v40  ;;  %v619_v55 = vunpack.c.0.s8 %v503_v46  ;;  %v560_v62 = vunpack.c.1.s8 %v488_v54  ;;  %v568_v22 = vunpack.c.3.s8 %v488_v54  ;;  %v1566_v46 = vld [vmem:[%s3739_s18 + $0xd8] sm:$0xff] }
  0x43   : > { %v812_v17 = vpack.c.bf16 %v736_v10, %v732_v9  ;;  %1608 = vperm.xlu1 %3391, %v1546_v32  }
  0x44   : > { %v747_v63 = vcvt.s32.f32 %v619_v55  ;;  %v688_v8 = vcvt.s32.f32 %v560_v62  ;;  %v696_v30 = vcvt.s32.f32 %v568_v22  ;;  %v1564_v55 = vld [vmem:[%s3739_s18 + $0xc8] sm:$0xff] }
  0x45   : > { %1267 = vmatpush.bf16.msrb.mxu2 %v3333_v20 }
  0x46   : > { %1356 = vmatpush.bf16.msrb.mxu3 %v3341_v21  ;;  %v819_v9 = vpack.c.bf16 %v751_v0, %v747_v63  ;;  %v564_v21 = vunpack.c.2.s8 %v488_v54 }
  0x49   : > { %1618 = vperm.xlu0 %3390, %v1548_v23   ;;  %1268 = vmatpush.bf16.msrb.mxu2 %v3332_v47  ;;  %v755_v23 = vcvt.s32.f32 %v627_v13  ;;  %v2110_v47 = vld [vmem:[%s4462_s6 + $0x8] sm:$0xff] }
  0x4a   : > { %1357 = vmatpush.bf16.msrb.mxu3 %v3340_v48  ;;  %2225 = vmatpush.msrb.mxu1 %v2110_v47 }
  0x4b   : > { %v823_v31 = vpack.c.bf16 %v759_v24, %v755_v23 }
  0x4c   : > { %1141 = vmatmul.bf16.gmra.mxu2 %v803_v26  ;;  %1101 = vmatmul.bf16.gmra.mxu0 %v771_v28  ;;  %v612_v26 = vunpack.c.2.s8 %v500_v58  ;;  %v547_v28 = vunpack.c.2.s8 %v483_v61 }
  0x4d   : > { %1230 = vmatmul.bf16.gmra.mxu3 %v804_v27  ;;  %v616_v27 = vunpack.c.3.s8 %v500_v58 }
  0x4e   : > { %v740_v35 = vcvt.s32.f32 %v612_v26  ;;  %v675_v38 = vcvt.s32.f32 %v547_v28 }
  0x4f   : > { %1190 = vmatmul.bf16.gmra.mxu1 %v772_v29  ;;  %v551_v29 = vunpack.c.3.s8 %v483_v61  ;;  %v744_v36 = vcvt.s32.f32 %v616_v27  ;;  %v556_v61 = vunpack.c.0.s8 %v488_v54  ;;  %v1547_v54 = vld [vmem:[%s3739_s18 + $0x40] sm:$0xff] }
  0x51   : > { %v679_v39 = vcvt.s32.f32 %v551_v29  ;;  %v816_v43 = vpack.c.bf16 %v744_v36, %v740_v35  ;;  %1633 = vperm.xlu0 %3390, %v1551_v37   ;;  %v684_v7 = vcvt.s32.f32 %v556_v61  ;;  %v692_v29 = vcvt.s32.f32 %v564_v21  ;;  %v1563_v35 = vld [vmem:[%s3739_s18 + $0xc0] sm:$0xff] }
  0x53   : > { %v783_v44 = vpack.c.bf16 %v679_v39, %v675_v38  ;;  %v788_v12 = vpack.c.bf16 %v688_v8, %v684_v7  ;;  %v792_v37 = vpack.c.bf16 %v696_v30, %v692_v29  ;;  %v477_v38 = vld [vmem:[%s3650_s16 + $0x10] sm:$0xff]  ;;  %v478_v39 = vld [vmem:[%s3650_s16 + $0x18] sm:$0xff] }
  0x54   : > { %v509_v40 = vunpack.c.0.s8 %v477_v38  ;;  %v513_v41 = vunpack.c.1.s8 %v477_v38  ;;  %v517_v61 = vunpack.c.2.s8 %v477_v38  ;;  %v521_v63 = vunpack.c.3.s8 %v477_v38  ;;  %v1766_v30 = vld [vmem:[%s3808_s26 + $0x18] sm:$0xff] }
  0x55   : > { %v518_v0 = vunpack.c.2.s8 %v478_v39 }
  0x56   : > { %v637_v48 = vcvt.s32.f32 %v509_v40  ;;  %v641_v49 = vcvt.s32.f32 %v513_v41  ;;  %v649_v7 = vcvt.s32.f32 %v521_v63  ;;  %v1559_v40 = vld [vmem:[%s3739_s18 + $0xa0] sm:$0xff] }
  0x57   : > { %v646_v8 = vcvt.s32.f32 %v518_v0  ;;  %v1565_v0 = vld [vmem:[%s3739_s18 + $0xd0] sm:$0xff] }
  0x5c   : > { %1146 = vmatmul.bf16.gmra.mxu2 %v807_v50  ;;  %1106 = vmatmul.bf16.gmra.mxu0 %v775_v52  ;;  %v504_v50 = vld [vmem:[%s3650_s16 + $0xe8] sm:$0xff]  ;;  %v1554_v52 = vld [vmem:[%s3739_s18 + $0x78] sm:$0xff] }
  0x5d   : > { %1235 = vmatmul.bf16.gmra.mxu3 %v808_v51  ;;  %v1549_v51 = vld [vmem:[%s3739_s18 + $0x50] sm:$0xff]  ;;  %v620_v57 = vunpack.c.0.s8 %v504_v50  ;;  %v624_v58 = vunpack.c.1.s8 %v504_v50  ;;  %1648 = vperm.xlu0 %3390, %v1554_v52   ;;  %v628_v15 = vunpack.c.2.s8 %v504_v50  ;;  %v765_v52 = vpack.c.bf16 %v641_v49, %v637_v48 }
  0x5e   : > { %1623 = vperm.xlu1 %3391, %v1549_v51  }
  0x5f   : > { %1195 = vmatmul.bf16.gmra.mxu1 %v776_v53  ;;  %v487_v53 = vld [vmem:[%s3650_s16 + $0x60] sm:$0xff]  ;;  %v748_v1 = vcvt.s32.f32 %v620_v57  ;;  %v752_v2 = vcvt.s32.f32 %v624_v58  ;;  %v756_v25 = vcvt.s32.f32 %v628_v15  ;;  %v1553_v15 = vld [vmem:[%s3739_s18 + $0x70] sm:$0xff] }
  0x60   : > { %v555_v59 = vunpack.c.0.s8 %v487_v53  ;;  %v559_v60 = vunpack.c.1.s8 %v487_v53  ;;  %v567_v20 = vunpack.c.3.s8 %v487_v53  ;;  %v1763_v58 = vld [vmem:[%s3808_s26] sm:$0xff] }
  0x61   : > { %v820_v10 = vpack.c.bf16 %v752_v2, %v748_v1  ;;  %v522_v1 = vunpack.c.3.s8 %v478_v39  ;;  %v1550_v2 = vld [vmem:[%s3739_s18 + $0x58] sm:$0xff] }
  0x62   : > { %v683_v5 = vcvt.s32.f32 %v555_v59  ;;  %v687_v6 = vcvt.s32.f32 %v559_v60  ;;  %v695_v28 = vcvt.s32.f32 %v567_v20  ;;  %v482_v20 = vld [vmem:[%s3650_s16 + $0x38] sm:$0xff] }
  0x63   : > { %v534_v48 = vunpack.c.2.s8 %v482_v20  ;;  %v538_v49 = vunpack.c.3.s8 %v482_v20 }
  0x64   : > { %v787_v11 = vpack.c.bf16 %v687_v6, %v683_v5  ;;  %v1764_v5 = vld [vmem:[%s3808_s26 + $0x8] sm:$0xff]  ;;  %v645_v6 = vcvt.s32.f32 %v517_v61 }
  0x65   : > { %1663 = vperm.xlu0 %3390, %v1557_v4  }
  0x66   : > { %1638 = vperm.xlu1 %3391, %v1552_v3   ;;  %v1567_v3 = vld [vmem:[%s3739_s18 + $0xe0] sm:$0xff]  ;;  %v769_v13 = vpack.c.bf16 %v649_v7, %v645_v6 }
  0x6c   : > { %1151 = vmatmul.bf16.gmra.mxu2 %v811_v16  ;;  %1111 = vmatmul.bf16.gmra.mxu0 %v779_v18  ;;  %v632_v16 = vunpack.c.3.s8 %v504_v50  ;;  %v1560_v18 = vld [vmem:[%s3739_s18 + $0xa8] sm:$0xff] }
  0x6d   : > { %1240 = vmatmul.bf16.gmra.mxu3 %v812_v17  ;;  %v1555_v17 = vld [vmem:[%s3739_s18 + $0x80] sm:$0xff]  ;;  %1678 = vperm.xlu0 %3390, %v1560_v18   ;;  %v1765_v18 = vld [vmem:[%s3808_s26 + $0x10] sm:$0xff] }
  0x6e   : > { %1653 = vperm.xlu1 %3391, %v1555_v17   ;;  %v760_v26 = vcvt.s32.f32 %v632_v16  ;;  %v1570_v16 = vld [vmem:[%s3739_s18 + $0xf8] sm:$0xff] }
  0x6f   : > { %1200 = vmatmul.bf16.gmra.mxu1 %v780_v19  ;;  %v563_v19 = vunpack.c.2.s8 %v487_v53 }
  0x70   : > { %v824_v32 = vpack.c.bf16 %v760_v26, %v756_v25  ;;  %v526_v26 = vunpack.c.0.s8 %v482_v20 }
  0x71   : > { %v691_v27 = vcvt.s32.f32 %v563_v19  ;;  %v481_v19 = vld [vmem:[%s3650_s16 + $0x30] sm:$0xff] }
  0x72   : > { %v525_v23 = vunpack.c.0.s8 %v481_v19  ;;  %v529_v25 = vunpack.c.1.s8 %v481_v19  ;;  %v654_v33 = vcvt.s32.f32 %v526_v26  ;;  %v537_v47 = vunpack.c.3.s8 %v481_v19 }
  0x73   : > { %v791_v36 = vpack.c.bf16 %v695_v28, %v691_v27  ;;  %v530_v27 = vunpack.c.1.s8 %v482_v20  ;;  %v1556_v28 = vld [vmem:[%s3739_s18 + $0x88] sm:$0xff] }
  0x75   : > { %1693 = vperm.xlu0 %3390, %v1563_v35  }
  0x76   : > { %1668 = vperm.xlu1 %3391, %v1558_v34   ;;  %v658_v34 = vcvt.s32.f32 %v530_v27 }
  0x7c   : > { %1156 = vmatmul.bf16.gmra.mxu2 %v815_v42  ;;  %1116 = vmatmul.bf16.gmra.mxu0 %v783_v44  ;;  %v510_v42 = vunpack.c.0.s8 %v478_v39  ;;  %v1544_v44 = vld [vmem:[%s3739_s18 + $0x28] sm:$0xff] }
  0x7d   : > { %1245 = vmatmul.bf16.gmra.mxu3 %v816_v43  ;;  %v514_v43 = vunpack.c.1.s8 %v478_v39  ;;  %1598 = vperm.xlu2 %3392, %v1544_v44   ;;  %v774_v39 = vpack.c.bf16 %v658_v34, %v654_v33 }
  0x7e   : > { %1708 = vperm.xlu0 %3390, %v1566_v46   ;;  %v638_v50 = vcvt.s32.f32 %v510_v42  ;;  %v1767_v42 = vld [vmem:[%s3808_s26 + $0x20] sm:$0xff] }
  0x7f   : > { %1205 = vmatmul.bf16.gmra.mxu1 %v784_v45  ;;  %v1561_v45 = vld [vmem:[%s3739_s18 + $0xb0] sm:$0xff]  ;;  %v642_v51 = vcvt.s32.f32 %v514_v43 }
  0x80   : > { %1683 = vperm.xlu1 %3391, %v1561_v45   ;;  %v533_v45 = vunpack.c.2.s8 %v481_v19 }
  0x81   : > { %v766_v53 = vpack.c.bf16 %v642_v51, %v638_v50  ;;  %v1562_v50 = vld [vmem:[%s3739_s18 + $0xb8] sm:$0xff] }
  0x85   : > { %1613 = vperm.xlu2 %3392, %v1547_v54   ;;  %v665_v54 = vcvt.s32.f32 %v537_v47 }
  0x86   : > { %1723 = vperm.xlu0 %3390, %v1569_v56   ;;  %v666_v56 = vcvt.s32.f32 %v538_v49 }
  0x88   : > { %1698 = vperm.xlu1 %3391, %v1564_v55   ;;  %v662_v55 = vcvt.s32.f32 %v534_v48 }
  0x8a   : > { %v778_v63 = vpack.c.bf16 %v666_v56, %v662_v55  ;;  %v1773_v55 = vld [vmem:[%s3808_s26 + $0x50] sm:$0xff] }
  0x8b   : > { %v489_v56 = vld [vmem:[%s3650_s16 + $0x70] sm:$0xff] }
  0x8c   : > { %1161 = vmatmul.bf16.gmra.mxu2 %v819_v9  ;;  %1121 = vmatmul.bf16.gmra.mxu0 %v787_v11  ;;  %v650_v9 = vcvt.s32.f32 %v522_v1 }
  0x8d   : > { %1250 = vmatmul.bf16.gmra.mxu3 %v820_v10  ;;  %1628 = vperm.xlu2 %3392, %v1550_v2   ;;  %v1769_v2 = vld [vmem:[%s3808_s26 + $0x30] sm:$0xff] }
  0x8e   : > { %v770_v14 = vpack.c.bf16 %v650_v9, %v646_v8 }
  0x8f   : > { %1210 = vmatmul.bf16.gmra.mxu1 %v788_v12 }
  0x90   : > { %1713 = vperm.xlu1 %3391, %v1567_v3   ;;  %v485_v3 = vld [vmem:[%s3650_s16 + $0x50] sm:$0xff] }
  0x91   : > { %v541_v8 = vunpack.c.0.s8 %v485_v3  ;;  %v549_v34 = vunpack.c.2.s8 %v485_v3 }
  0x93   : > { %v669_v19 = vcvt.s32.f32 %v541_v8 }
  0x95   : > { %1643 = vperm.xlu2 %3392, %v1553_v15   ;;  %v2109_v15 = vld [vmem:[%s4462_s6] sm:$0xff] }
  0x96   : > { %2226 = vmatpush.msrb.mxu1 %v2109_v15 }
  0x98   : > { %1728 = vperm.xlu1 %3391, %v1570_v16  }
  0x9c   : > { %1166 = vmatmul.bf16.gmra.mxu2 %v823_v31  ;;  %1126 = vmatmul.bf16.gmra.mxu0 %v791_v36  ;;  %v653_v31 = vcvt.s32.f32 %v525_v23 }
  0x9d   : > { %1255 = vmatmul.bf16.gmra.mxu3 %v824_v32  ;;  %1658 = vperm.xlu2 %3392, %v1556_v28   ;;  %v657_v32 = vcvt.s32.f32 %v529_v25 }
  0x9f   : > { %1215 = vmatmul.bf16.gmra.mxu1 %v792_v37  ;;  %v773_v38 = vpack.c.bf16 %v657_v32, %v653_v31  ;;  %v1771_v31 = vld [vmem:[%s3808_s26 + $0x40] sm:$0xff] }
  0xa5   : > { %1673 = vperm.xlu2 %3392, %v1559_v40  }
  0xa9   : > { %v3813_v57 = vpop.f32.mrf.mxu0 }
  0xac   : > { %1269 = vmatmul.bf16.vlgmr.msrb.gmra.mxu2 %v765_v52  ;;  %3217 = vmatmul.msk.f32.vlgmr.msrb.gmra.mxu0 %vm1799_vm0, %v1763_v58  ;;  %v1768_v52 = vld [vmem:[%s3808_s26 + $0x28] sm:$0xff] }
  0xad   : > { %1358 = vmatmul.bf16.vlgmr.msrb.gmra.mxu3 %v766_v53  ;;  %1688 = vperm.xlu2 %3392, %v1562_v50   ;;  %v661_v53 = vcvt.s32.f32 %v533_v45 }
  0xaf   : > { %v1132_v59 = vpop.f32.mrf.mxu2  ;;  %v777_v61 = vpack.c.bf16 %v665_v54, %v661_v53 }
  0xb0   : > { %v1221_v60 = vpop.f32.mrf.mxu3 }
  0xb1   : > { %v3817_v62 = vadd.f32 %v1221_v60, %v1132_v59  ;;  %v3821_v4 = vpop.f32.mrf.mxu0 }
  0xb4   : > { %3218 = vmatmul.msk.f32.gmra.mxu0 %vm1799_vm0, %v1764_v5  ;;  %v486_v5 = vld [vmem:[%s3650_s16 + $0x58] sm:$0xff] }
  0xb5   : > { %1703 = vperm.xlu2 %3392, %v1565_v0  }
  0xb7   : > { %v1134_v10 = vpop.f32.mrf.mxu2 }
  0xb8   : > { %v1223_v11 = vpop.f32.mrf.mxu3 }
  0xb9   : > { %v3825_v12 = vadd.f32 %v1223_v11, %v1134_v10  ;;  %v3829_v17 = vpop.f32.mrf.mxu0  ;;  %v545_v10 = vunpack.c.1.s8 %v485_v3  ;;  %v542_v11 = vunpack.c.0.s8 %v486_v5 }
  0xbb   : > { %v673_v20 = vcvt.s32.f32 %v545_v10 }
  0xbc   : > { %1274 = vmatmul.bf16.gmra.mxu2 %v769_v13  ;;  %3219 = vmatmul.msk.f32.gmra.mxu0 %vm1799_vm0, %v1765_v18  ;;  %v546_v13 = vunpack.c.1.s8 %v486_v5  ;;  %v1770_v18 = vld [vmem:[%s3808_s26 + $0x38] sm:$0xff] }
  0xbd   : > { %1363 = vmatmul.bf16.gmra.mxu3 %v770_v14  ;;  %v1568_v14 = vld [vmem:[%s3739_s18 + $0xe8] sm:$0xff]  ;;  %v781_v27 = vpack.c.bf16 %v673_v20, %v669_v19 }
  0xbe   : > { %1718 = vperm.xlu2 %3392, %v1568_v14  }
  0xbf   : > { %v1137_v21 = vpop.f32.mrf.mxu2 }
  0xc0   : > { %v1226_v22 = vpop.f32.mrf.mxu3 }
  0xc1   : > { %v3835_v24 = vadd.f32 %v1226_v22, %v1137_v21  ;;  %v3838_v29 = vpop.f32.mrf.mxu0  ;;  %v670_v21 = vcvt.s32.f32 %v542_v11  ;;  %v674_v22 = vcvt.s32.f32 %v546_v13 }
  0xc3   : > { %v782_v28 = vpack.c.bf16 %v674_v22, %v670_v21  ;;  %v1775_v22 = vld [vmem:[%s3808_s26 + $0x60] sm:$0xff] }
  0xc4   : > { %3220 = vmatmul.msk.f32.gmra.mxu0 %vm1799_vm0, %v1766_v30 }
  0xc7   : > { %v1139_v35 = vpop.f32.mrf.mxu2 }
  0xc8   : > { %v1228_v36 = vpop.f32.mrf.mxu3 }
  0xc9   : > { %v3842_v37 = vadd.f32 %v1228_v36, %v1139_v35  ;;  %v3845_v41 = vpop.f32.mrf.mxu0  ;;  %v553_v36 = vunpack.c.3.s8 %v485_v3 }
  0xcc   : > { %1279 = vmatmul.bf16.gmra.mxu2 %v773_v38  ;;  %3221 = vmatmul.msk.f32.gmra.mxu0 %vm1799_vm0, %v1767_v42  ;;  %v550_v38 = vunpack.c.2.s8 %v486_v5  ;;  %v1772_v42 = vld [vmem:[%s3808_s26 + $0x48] sm:$0xff] }
  0xcd   : > { %1368 = vmatmul.bf16.gmra.mxu3 %v774_v39  ;;  %v554_v39 = vunpack.c.3.s8 %v486_v5 }
  0xce   : > { %v678_v45 = vcvt.s32.f32 %v550_v38 }
  0xcf   : > { %v1142_v43 = vpop.f32.mrf.mxu2  ;;  %v682_v47 = vcvt.s32.f32 %v554_v39  ;;  %v1776_v39 = vld [vmem:[%s3808_s26 + $0x68] sm:$0xff] }
  0xd0   : > { %v1231_v44 = vpop.f32.mrf.mxu3 }
  0xd1   : > { %v3849_v46 = vadd.f32 %v1231_v44, %v1142_v43  ;;  %v3852_v51 = vpop.f32.mrf.mxu0  ;;  %v677_v43 = vcvt.s32.f32 %v549_v34  ;;  %v681_v44 = vcvt.s32.f32 %v553_v36  ;;  %v786_v53 = vpack.c.bf16 %v682_v47, %v678_v45 }
  0xd4   : > { %3222 = vmatmul.msk.f32.gmra.mxu0 %vm1799_vm0, %v1768_v52  ;;  %v785_v52 = vpack.c.bf16 %v681_v44, %v677_v43 }
  0xd7   : > { %v1144_v58 = vpop.f32.mrf.mxu2 }
  0xd8   : > { %v1233_v59 = vpop.f32.mrf.mxu3 }
  0xd9   : > { %v3856_v60 = vadd.f32 %v1233_v59, %v1144_v58  ;;  %v3859_v1 = vpop.f32.mrf.mxu0  ;;  %v490_v58 = vld [vmem:[%s3650_s16 + $0x78] sm:$0xff] }
  0xda   : > { %v558_v3 = vunpack.c.0.s8 %v490_v58  ;;  %v562_v5 = vunpack.c.1.s8 %v490_v58  ;;  %v566_v34 = vunpack.c.2.s8 %v490_v58  ;;  %v570_v36 = vunpack.c.3.s8 %v490_v58  ;;  %v1777_v58 = vld [vmem:[%s3808_s26 + $0x70] sm:$0xff] }
  0xdc   : > { %1284 = vmatmul.bf16.gmra.mxu2 %v777_v61  ;;  %3223 = vmatmul.msk.f32.gmra.mxu0 %vm1799_vm0, %v1769_v2  ;;  %v561_v2 = vunpack.c.1.s8 %v489_v56  ;;  %v686_v11 = vcvt.s32.f32 %v558_v3  ;;  %v690_v13 = vcvt.s32.f32 %v562_v5  ;;  %v694_v44 = vcvt.s32.f32 %v566_v34 }
  0xdd   : > { %1373 = vmatmul.bf16.gmra.mxu3 %v778_v63  ;;  %v557_v63 = vunpack.c.0.s8 %v489_v56  ;;  %v698_v45 = vcvt.s32.f32 %v570_v36 }
  0xde   : > { %v689_v10 = vcvt.s32.f32 %v561_v2  ;;  %v790_v20 = vpack.c.bf16 %v690_v13, %v686_v11 }
  0xdf   : > { %v1147_v6 = vpop.f32.mrf.mxu2  ;;  %v685_v8 = vcvt.s32.f32 %v557_v63 }
  0xe0   : > { %v1236_v7 = vpop.f32.mrf.mxu3 }
  0xe1   : > { %v3865_v9 = vadd.f32 %v1236_v7, %v1147_v6  ;;  %v3871_v16 = vpop.f32.mrf.mxu0  ;;  %v1774_v7 = vld [vmem:[%s3808_s26 + $0x58] sm:$0xff]  ;;  %v789_v19 = vpack.c.bf16 %v689_v10, %v685_v8 }
  0xe4   : > { %3224 = vmatmul.msk.f32.gmra.mxu0 %vm1799_vm0, %v1770_v18 }
  0xe7   : > { %v1149_v23 = vpop.f32.mrf.mxu2 }
  0xe8   : > { %v1238_v25 = vpop.f32.mrf.mxu3 }
  0xe9   : > { %v3875_v26 = vadd.f32 %v1238_v25, %v1149_v23  ;;  %v3877_v30 = vpop.f32.mrf.mxu0  ;;  %v3906_v23 = vpop.f32.mrf.mxu1  ;;  %v3550_v25 = vmov 0.0  }
  0xea   : > { %411 = vst.msk [vmem:[#allocation2] sm:$0xff] %vm410_vm1, %v3550_v25 }
  0xeb   : > { %412 = vst.msk [vmem:[#allocation2 + $0x8] sm:$0xff] %vm410_vm1, %v3550_v25 }
  0xec   : > { %1289 = vmatmul.bf16.gmra.mxu2 %v781_v27  ;;  %3225 = vmatmul.msk.f32.gmra.mxu0 %vm1799_vm0, %v1771_v31  ;;  %413 = vst.msk [vmem:[#allocation2 + $0x10] sm:$0xff] %vm410_vm1, %v3550_v25  ;;  %v565_v31 = vunpack.c.2.s8 %v489_v56 }
  0xed   : > { %1378 = vmatmul.bf16.gmra.mxu3 %v782_v28  ;;  %414 = vst.msk [vmem:[#allocation2 + $0x18] sm:$0xff] %vm410_vm1, %v3550_v25 }
  0xee   : > { %415 = vst.msk [vmem:[#allocation2 + $0x20] sm:$0xff] %vm410_vm1, %v3550_v25 }
  0xef   : > { %v1152_v32 = vpop.f32.mrf.mxu2  ;;  %416 = vst.msk [vmem:[#allocation2 + $0x28] sm:$0xff] %vm410_vm1, %v3550_v25 }
  0xf0   : > { %v1241_v33 = vpop.f32.mrf.mxu3  ;;  %417 = vst.msk [vmem:[#allocation2 + $0x30] sm:$0xff] %vm410_vm1, %v3550_v25 }
  0xf1   : > { %v3881_v35 = vadd.f32 %v1241_v33, %v1152_v32  ;;  %v3883_v40 = vpop.f32.mrf.mxu0  ;;  %v569_v33 = vunpack.c.3.s8 %v489_v56  ;;  %418 = vst.msk [vmem:[#allocation2 + $0x38] sm:$0xff] %vm410_vm1, %v3550_v25  ;;  %v3934_v47 = vpop.f32.mrf.mxu1 }
  0xf2   : > { %419 = vst.msk [vmem:[#allocation2 + $0x40] sm:$0xff] %vm410_vm1, %v3550_v25 }
  0xf3   : > { %v697_v43 = vcvt.s32.f32 %v569_v33  ;;  %420 = vst.msk [vmem:[#allocation2 + $0x48] sm:$0xff] %vm410_vm1, %v3550_v25 }
  0xf4   : > { %3226 = vmatmul.msk.f32.gmra.mxu0 %vm1799_vm0, %v1772_v42  ;;  %v693_v42 = vcvt.s32.f32 %v565_v31  ;;  %421 = vst.msk [vmem:[#allocation2 + $0x50] sm:$0xff] %vm410_vm1, %v3550_v25 }
  0xf5   : > { %422 = vst.msk [vmem:[#allocation2 + $0x58] sm:$0xff] %vm410_vm1, %v3550_v25 }
  0xf6   : > { %423 = vst.msk [vmem:[#allocation2 + $0x60] sm:$0xff] %vm410_vm1, %v3550_v25 }
  0xf7   : > { %v1154_v48 = vpop.f32.mrf.mxu2  ;;  %424 = vst.msk [vmem:[#allocation2 + $0x68] sm:$0xff] %vm410_vm1, %v3550_v25 }
  0xf8   : > { %v1243_v49 = vpop.f32.mrf.mxu3  ;;  %425 = vst.msk [vmem:[#allocation2 + $0x70] sm:$0xff] %vm410_vm1, %v3550_v25 }
  0xf9   : > { %v3887_v50 = vadd.f32 %v1243_v49, %v1154_v48  ;;  %v3889_v54 = vpop.f32.mrf.mxu0  ;;  %426 = vst.msk [vmem:[#allocation2 + $0x78] sm:$0xff] %vm410_vm1, %v3550_v25  ;;  %v3965_v5 = vpop.f32.mrf.mxu1 }
  0xfa   : > { %427 = vst.msk [vmem:[#allocation2 + $0x80] sm:$0xff] %vm410_vm1, %v3550_v25 }
  0xfb   : > { %428 = vst.msk [vmem:[#allocation2 + $0x88] sm:$0xff] %vm410_vm1, %v3550_v25 }
  0xfc   : > { %1294 = vmatmul.bf16.gmra.mxu2 %v785_v52  ;;  %3227 = vmatmul.msk.f32.gmra.mxu0 %vm1799_vm0, %v1773_v55  ;;  %v794_v55 = vpack.c.bf16 %v698_v45, %v694_v44  ;;  %429 = vst.msk [vmem:[#allocation2 + $0x90] sm:$0xff] %vm410_vm1, %v3550_v25 }
  0xfd   : > { %1383 = vmatmul.bf16.gmra.mxu3 %v786_v53  ;;  %v793_v53 = vpack.c.bf16 %v697_v43, %v693_v42  ;;  %430 = vst.msk [vmem:[#allocation2 + $0x98] sm:$0xff] %vm410_vm1, %v3550_v25  ;;  %v1779_v42 = vld [vmem:[%s3808_s26 + $0x80] sm:$0xff]  ;;  %v1182_v43 = vadd.f32 %v3906_v23, %v3813_v57 }
  0xfe   : > { %431 = vst.msk [vmem:[#allocation2 + $0xa0] sm:$0xff] %vm410_vm1, %v3550_v25 }
  0xff   : > { %v1157_v59 = vpop.f32.mrf.mxu2  ;;  %432 = vst.msk [vmem:[#allocation2 + $0xa8] sm:$0xff] %vm410_vm1, %v3550_v25 }
 0x100   : > { %v1246_v61 = vpop.f32.mrf.mxu3  ;;  %433 = vst.msk [vmem:[#allocation2 + $0xb0] sm:$0xff] %vm410_vm1, %v3550_v25 }
 0x101   : > { %v3895_v0 = vadd.f32 %v1246_v61, %v1157_v59  ;;  %v3897_v6 = vpop.f32.mrf.mxu0  ;;  %v493_v59 = vld [vmem:[%s3650_s16 + $0x90] sm:$0xff]  ;;  %v494_v61 = vld [vmem:[%s3650_s16 + $0x98] sm:$0xff]  ;;  %434 = vst.msk [vmem:[#allocation2 + $0xb8] sm:$0xff] %vm410_vm1, %v3550_v25  ;;  %v3995_v36 = vpop.f32.mrf.mxu1 }
 0x102   : > { %v573_v3 = vunpack.c.0.s8 %v493_v59  ;;  %v577_v8 = vunpack.c.1.s8 %v493_v59  ;;  %v574_v10 = vunpack.c.0.s8 %v494_v61  ;;  %v578_v11 = vunpack.c.1.s8 %v494_v61  ;;  %435 = vst.msk [vmem:[#allocation2 + $0xc0] sm:$0xff] %vm410_vm1, %v3550_v25 }
 0x103   : > { %436 = vst.msk [vmem:[#allocation2 + $0xc8] sm:$0xff] %vm410_vm1, %v3550_v25 }
 0x104   : > { %3228 = vmatmul.msk.f32.gmra.mxu0 %vm1799_vm0, %v1774_v7  ;;  %437 = vst.msk [vmem:[#allocation2 + $0xd0] sm:$0xff] %vm410_vm1, %v3550_v25 }
 0x105   : > { %438 = vst.msk [vmem:[#allocation2 + $0xd8] sm:$0xff] %vm410_vm1, %v3550_v25 }
 0x106   : > { %439 = vst.msk [vmem:[#allocation2 + $0xe0] sm:$0xff] %vm410_vm1, %v3550_v25 }
 0x107   : > { %v1159_v14 = vpop.f32.mrf.mxu2  ;;  %440 = vst.msk [vmem:[#allocation2 + $0xe8] sm:$0xff] %vm410_vm1, %v3550_v25 }
 0x108   : > { %v1248_v15 = vpop.f32.mrf.mxu3  ;;  %441 = vst.msk [vmem:[#allocation2 + $0xf0] sm:$0xff] %vm410_vm1, %v3550_v25 }
 0x109   : > { %v3901_v18 = vadd.f32 %v1248_v15, %v1159_v14  ;;  %v3903_v21 = vpop.f32.mrf.mxu0  ;;  %v1778_v14 = vld [vmem:[%s3808_s26 + $0x78] sm:$0xff]  ;;  %v701_v15 = vcvt.s32.f32 %v573_v3  ;;  %442 = vst.msk [vmem:[#allocation2 + $0xf8] sm:$0xff] %vm410_vm1, %v3550_v25 }
 0x10c   : > { %1299 = vmatmul.bf16.gmra.mxu2 %v789_v19  ;;  %3229 = vmatmul.msk.f32.gmra.mxu0 %vm1799_vm0, %v1775_v22  ;;  %v705_v19 = vcvt.s32.f32 %v577_v8  ;;  %v706_v22 = vcvt.s32.f32 %v578_v11  ;;  %v1780_v8 = vld [vmem:[%s3808_s26 + $0x88] sm:$0xff] }
 0x10d   : > { %1388 = vmatmul.bf16.gmra.mxu3 %v790_v20  ;;  %v702_v20 = vcvt.s32.f32 %v574_v10  ;;  %v4006_v10 = vpop.f32.mrf.mxu1 }
 0x10e   : > { %v797_v33 = vpack.c.bf16 %v705_v19, %v701_v15  ;;  %v1184_v15 = vadd.f32 %v3934_v47, %v3821_v4  ;;  %v4016_v4 = vld [vmem:[%s3650_s16 + $0xb0] sm:$0xff] }
 0x10f   : > { %v1162_v27 = vpop.f32.mrf.mxu2  ;;  %v798_v34 = vpack.c.bf16 %v706_v22, %v702_v20 }
 0x110   : > { %v1251_v28 = vpop.f32.mrf.mxu3 }
 0x111   : > { %v3917_v32 = vadd.f32 %v1251_v28, %v1162_v27  ;;  %v3925_v38 = vpop.f32.mrf.mxu0 }
 0x114   : > { %3230 = vmatmul.msk.f32.gmra.mxu0 %vm1799_vm0, %v1776_v39 }
 0x117   : > { %v1164_v48 = vpop.f32.mrf.mxu2 }
 0x118   : > { %v1253_v49 = vpop.f32.mrf.mxu3 }
 0x119   : > { %v3941_v52 = vadd.f32 %v1253_v49, %v1164_v48  ;;  %v3949_v56 = vpop.f32.mrf.mxu0  ;;  %v581_v48 = vunpack.c.2.s8 %v493_v59 }
 0x11b   : > { %v709_v25 = vcvt.s32.f32 %v581_v48  ;;  %v4023_v48 = vpop.f32.mrf.mxu1 }
 0x11c   : > { %1304 = vmatmul.bf16.gmra.mxu2 %v793_v53  ;;  %3231 = vmatmul.msk.f32.gmra.mxu0 %vm1799_vm0, %v1777_v58  ;;  %v585_v53 = vunpack.c.3.s8 %v493_v59  ;;  %v586_v58 = vunpack.c.3.s8 %v494_v61 }
 0x11d   : > { %1393 = vmatmul.bf16.gmra.mxu3 %v794_v55  ;;  %v582_v55 = vunpack.c.2.s8 %v494_v61 }
 0x11e   : > { %v714_v23 = vcvt.s32.f32 %v586_v58 }
 0x11f   : > { %v1167_v63 = vpop.f32.mrf.mxu2  ;;  %v710_v57 = vcvt.s32.f32 %v582_v55 }
 0x120   : > { %v1256_v2 = vpop.f32.mrf.mxu3 }
 0x121   : > { %v3967_v7 = vadd.f32 %v1256_v2, %v1167_v63  ;;  %v3975_v13 = vpop.f32.mrf.mxu0  ;;  %v443_v63 = vld [vmem:[#allocation2] sm:$0xff]  ;;  %v802_v22 = vpack.c.bf16 %v714_v23, %v710_v57 }
 0x124   : > { %3232 = vmatmul.msk.f32.gmra.mxu0 %vm1799_vm0, %v1778_v14  ;;  %v713_v14 = vcvt.s32.f32 %v585_v53  ;;  %v4029_v53 = vld [vmem:[%s4461_s5] ss:$0 sm:$0xff] }
 0x126   : > { %v801_v20 = vpack.c.bf16 %v713_v14, %v709_v25 }
 0x127   : > { %v1169_v27 = vpop.f32.mrf.mxu2 }
 0x128   : > { %v1258_v28 = vpop.f32.mrf.mxu3 }
 0x129   : > { %v3989_v31 = vadd.f32 %v1258_v28, %v1169_v27  ;;  %v1913_v39 = vpop.f32.mrf.mxu0  ;;  %v444_v27 = vld [vmem:[#allocation2 + $0x8] sm:$0xff] }
 0x12c   : > { %1309 = vmatmul.bf16.gmra.mxu2 %v797_v33  ;;  %3233 = vmatmul.msk.f32.gmra.mxu0 %vm1799_vm0, %v1779_v42  ;;  %v1574_v33 = vpop.permute.xlu0 %1573  ;;  %v1781_v42 = vld [vmem:[%s3808_s26 + $0x90] sm:$0xff] }
 0x12d   : > { %1398 = vmatmul.bf16.gmra.mxu3 %v798_v34 }
 0x12f   : > { %v1270_v44 = vpop.f32.mrf.mxu2 }
 0x130   : > { %v1359_v45 = vpop.f32.mrf.mxu3  ;;  %v1271_v49 = vadd.f32 %v1270_v44, %v1182_v43  ;;  %v4019_v44 = vld [vmem:[%s3650_s16 + $0xb8] sm:$0xff] }
 0x131   : > { %v1916_v3 = vpop.f32.mrf.mxu0  ;;  %v590_v25 = vunpack.c.0.s8 %v4019_v44 }
 0x132   : > { %v1360_v2 = vadd.f32 %v1359_v45, %v1271_v49  ;;  %v1187_v45 = vadd.f32 %v3965_v5, %v3829_v17 }
 0x134   : > { %v1439_v11 = vadd.f32 %v1360_v2, %v443_v63  ;;  %3234 = vmatmul.msk.f32.gmra.mxu0 %vm1799_vm0, %v1780_v8  ;;  %v589_v63 = vunpack.c.0.s8 %v4016_v4  ;;  %v593_v2 = vunpack.c.1.s8 %v4016_v4  ;;  %v594_v8 = vunpack.c.1.s8 %v4019_v44 }
 0x136   : > { %1472 = vst.msk [vmem:[#allocation2] sm:$0xff] %vm410_vm1, %v1439_v11  ;;  %v445_v11 = vld [vmem:[#allocation2 + $0x10] sm:$0xff]  ;;  %v717_v23 = vcvt.s32.f32 %v589_v63 }
 0x137   : > { %v1272_v59 = vpop.f32.mrf.mxu2 }
 0x138   : > { %v1361_v61 = vpop.f32.mrf.mxu3  ;;  %v1273_v19 = vadd.f32 %v1272_v59, %v1184_v15  ;;  %v721_v15 = vcvt.s32.f32 %v593_v2  ;;  %v446_v2 = vld [vmem:[#allocation2 + $0x18] sm:$0xff] }
 0x139   : > { %v4012_v34 = vpop.f32.mrf.mxu0 }
 0x13a   : > { %v1362_v28 = vadd.f32 %v1361_v61, %v1273_v19  ;;  %v1782_v61 = vld [vmem:[%s3808_s26 + $0x98] sm:$0xff] }
 0x13c   : > { %v1440_v43 = vadd.f32 %v1362_v28, %v444_v27  ;;  %1314 = vmatmul.bf16.gmra.mxu2 %v801_v20  ;;  %3235 = vmatmul.msk.f32.gmra.mxu0 %vm1799_vm0, %v1781_v42  ;;  %v722_v27 = vcvt.s32.f32 %v594_v8  ;;  %v1579_v28 = vpop.permute.xlu0 %1578 }
 0x13d   : > { %1403 = vmatmul.bf16.gmra.mxu3 %v802_v22  ;;  %v1507_v47 = vld [vmem:[#allocation2] sm:$0xff]  ;;  %v718_v22 = vcvt.s32.f32 %v590_v25 }
 0x13e   : > { %1473 = vst.msk [vmem:[#allocation2 + $0x8] sm:$0xff] %vm410_vm1, %v1440_v43  ;;  %v1731_v49 = vmul.f32 %v1574_v33, %v1507_v47  ;;  %v1783_v25 = vld [vmem:[%s3808_s26 + $0xa0] sm:$0xff] }
 0x13f   : > { %v1275_v55 = vpop.f32.mrf.mxu2  ;;  %v806_v63 = vpack.c.bf16 %v722_v27, %v718_v22  ;;  %v598_v27 = vunpack.c.2.s8 %v4019_v44 }
 0x140   : > { %v1364_v58 = vpop.f32.mrf.mxu3  ;;  %v1276_v17 = vadd.f32 %v1275_v55, %v1187_v45  ;;  %v2009_v5 = vadd.f32 %v1913_v39, %v1731_v49  ;;  %v1189_v39 = vadd.f32 %v3995_v36, %v3838_v29  ;;  %v4045_v45 = vpop.f32.mrf.mxu1 }
 0x141   : > { %v4037_v59 = vpop.f32.mrf.mxu0  ;;  %v1584_v36 = vpop.permute.xlu1 %1583 }
 0x142   : > { %v1365_v14 = vadd.f32 %v1364_v58, %v1276_v17  ;;  %v2045_v57 = vadd.f32 %v4029_v53, %v2009_v5  ;;  %v805_v58 = vpack.c.bf16 %v721_v15, %v717_v23 }
 0x144   : > { %v1441_v19 = vadd.f32 %v1365_v14, %v445_v11  ;;  %v2077_v20 = vmax.f32 %v2045_v57, 0.0  ;;  %3236 = vmatmul.msk.f32.gmra.mxu0 %vm1799_vm0, %v1782_v61  ;;  %v1192_v57 = vadd.f32 %v4006_v10, %v3845_v41  ;;  %v597_v61 = vunpack.c.2.s8 %v4016_v4  ;;  %v447_v10 = vld [vmem:[#allocation2 + $0x20] sm:$0xff] }
 0x145   : > { %v1508_v33 = vld [vmem:[#allocation2 + $0x8] sm:$0xff]  ;;  %v602_v41 = vunpack.c.3.s8 %v4019_v44  ;;  %v1194_v44 = vadd.f32 %v4023_v48, %v3852_v51  ;;  %v1594_v48 = vpop.permute.xlu2 %1593 }
 0x146   : > { %1474 = vst.msk [vmem:[#allocation2 + $0x10] sm:$0xff] %vm410_vm1, %v1441_v19  ;;  %3249 = vmatmul.msk.f32.vlgmr.msrb.gmra.mxu1 %vm410_vm1, %v2077_v20  ;;  %v1732_v42 = vmul.f32 %v1579_v28, %v1508_v33  ;;  %v601_v19 = vunpack.c.3.s8 %v4016_v4 }
 0x147   : > { %v1277_v43 = vpop.f32.mrf.mxu2 }
 0x148   : > { %v1366_v47 = vpop.f32.mrf.mxu3  ;;  %v1278_v49 = vadd.f32 %v1277_v43, %v1189_v39  ;;  %v2010_v55 = vadd.f32 %v1916_v3, %v1732_v42  ;;  %v4061_v28 = vpop.f32.mrf.mxu1  ;;  %v725_v42 = vcvt.s32.f32 %v597_v61  ;;  %v729_v43 = vcvt.s32.f32 %v601_v19 }
 0x149   : > { %v4048_v5 = vpop.f32.mrf.mxu0 }
 0x14a   : > { %v1367_v17 = vadd.f32 %v1366_v47, %v1278_v49  ;;  %v2046_v29 = vadd.f32 %v4029_v53, %v2010_v55  ;;  %v1784_v49 = vld [vmem:[%s3808_s26 + $0xa8] sm:$0xff] }
 0x14c   : > { %v1442_v8 = vadd.f32 %v1367_v17, %v446_v2  ;;  %1319 = vmatmul.bf16.gmra.mxu2 %v805_v58  ;;  %v2078_v11 = vmax.f32 %v2046_v29, 0.0  ;;  %3237 = vmatmul.msk.f32.gmra.mxu0 %vm1799_vm0, %v1783_v25  ;;  %v726_v58 = vcvt.s32.f32 %v598_v27 }
 0x14d   : > { %1408 = vmatmul.bf16.gmra.mxu3 %v806_v63  ;;  %v1509_v14 = vld [vmem:[#allocation2 + $0x10] sm:$0xff]  ;;  %v730_v63 = vcvt.s32.f32 %v602_v41  ;;  %v1197_v41 = vadd.f32 %v4045_v45, %v3859_v1 }
 0x14e   : > { %1475 = vst.msk [vmem:[#allocation2 + $0x18] sm:$0xff] %vm410_vm1, %v1442_v8  ;;  %3250 = vmatmul.msk.f32.gmra.mxu1 %vm410_vm1, %v2078_v11  ;;  %v1733_v3 = vmul.f32 %v1584_v36, %v1509_v14  ;;  %v809_v11 = vpack.c.bf16 %v729_v43, %v725_v42  ;;  %v449_v45 = vld [vmem:[#allocation2 + $0x30] sm:$0xff] }
 0x14f   : > { %v1280_v23 = vpop.f32.mrf.mxu2  ;;  %v810_v14 = vpack.c.bf16 %v730_v63, %v726_v58 }
 0x150   : > { %v1369_v15 = vpop.f32.mrf.mxu3  ;;  %v1281_v20 = vadd.f32 %v1280_v23, %v1192_v57  ;;  %v2011_v22 = vadd.f32 %v4012_v34, %v1733_v3  ;;  %v1589_v34 = vpop.permute.xlu1 %1588  ;;  %v448_v57 = vld [vmem:[#allocation2 + $0x28] sm:$0xff] }
 0x151   : > { %v4064_v47 = vpop.f32.mrf.mxu0  ;;  %v1201_v61 = vpop.f32.mrf.mxu1 }
 0x152   : > { %v1370_v33 = vadd.f32 %v1369_v15, %v1281_v20  ;;  %v2047_v39 = vadd.f32 %v4029_v53, %v2011_v22  ;;  %v1785_v15 = vld [vmem:[%s3808_s26 + $0xb0] sm:$0xff] }
 0x153   : > { %v4078_v22 = vld [vmem:[%s3650_s16 + $0xd0] sm:$0xff] }
 0x154   : > { %v1443_v55 = vadd.f32 %v1370_v33, %v447_v10  ;;  %v2079_v4 = vmax.f32 %v2047_v39, 0.0  ;;  %3238 = vmatmul.msk.f32.gmra.mxu0 %vm1799_vm0, %v1784_v49  ;;  %v605_v42 = vunpack.c.0.s8 %v4078_v22  ;;  %v609_v43 = vunpack.c.1.s8 %v4078_v22 }
 0x155   : > { %v1510_v2 = vld [vmem:[#allocation2 + $0x18] sm:$0xff] }
 0x156   : > { %1476 = vst.msk [vmem:[#allocation2 + $0x20] sm:$0xff] %vm410_vm1, %v1443_v55  ;;  %3251 = vmatmul.msk.f32.gmra.mxu1 %vm410_vm1, %v2079_v4  ;;  %v1734_v17 = vmul.f32 %v1589_v34, %v1510_v2  ;;  %v733_v34 = vcvt.s32.f32 %v605_v42  ;;  %v737_v2 = vcvt.s32.f32 %v609_v43  ;;  %v1604_v43 = vpop.permute.xlu0 %1603 }
 0x157   : > { %v1282_v29 = vpop.f32.mrf.mxu2 }
 0x158   : > { %v1371_v36 = vpop.f32.mrf.mxu3  ;;  %v1283_v25 = vadd.f32 %v1282_v29, %v1194_v44  ;;  %v2012_v8 = vadd.f32 %v4037_v59, %v1734_v17  ;;  %v4081_v59 = vld [vmem:[%s3650_s16 + $0xd8] sm:$0xff] }
 0x159   : > { %v4074_v23 = vpop.f32.mrf.mxu0  ;;  %v606_v4 = vunpack.c.0.s8 %v4081_v59  ;;  %v610_v1 = vunpack.c.1.s8 %v4081_v59  ;;  %v1786_v17 = vld [vmem:[%s3808_s26 + $0xb8] sm:$0xff] }
 0x15a   : > { %v1372_v3 = vadd.f32 %v1371_v36, %v1283_v25  ;;  %v2048_v51 = vadd.f32 %v4029_v53, %v2012_v8 }
 0x15b   : > { %v734_v25 = vcvt.s32.f32 %v606_v4  ;;  %v738_v8 = vcvt.s32.f32 %v610_v1 }
 0x15c   : > { %v1444_v19 = vadd.f32 %v1372_v3, %v448_v57  ;;  %1324 = vmatmul.bf16.gmra.mxu2 %v809_v11  ;;  %v2080_v20 = vmax.f32 %v2048_v51, 0.0  ;;  %3239 = vmatmul.msk.f32.gmra.mxu0 %vm1799_vm0, %v1785_v15  ;;  %v1599_v11 = vpop.permute.xlu2 %1598  ;;  %v1203_v57 = vpop.f32.mrf.mxu1 }
 0x15d   : > { %1413 = vmatmul.bf16.gmra.mxu3 %v810_v14  ;;  %v1511_v27 = vld [vmem:[#allocation2 + $0x20] sm:$0xff] }
 0x15e   : > { %1477 = vst.msk [vmem:[#allocation2 + $0x28] sm:$0xff] %vm410_vm1, %v1444_v19  ;;  %3252 = vmatmul.msk.f32.gmra.mxu1 %vm410_vm1, %v2080_v20  ;;  %v1735_v10 = vmul.f32 %v1594_v48, %v1511_v27  ;;  %v813_v20 = vpack.c.bf16 %v737_v2, %v733_v34  ;;  %v814_v27 = vpack.c.bf16 %v738_v8, %v734_v25 }
 0x15f   : > { %v1285_v33 = vpop.f32.mrf.mxu2 }
 0x160   : > { %v1374_v39 = vpop.f32.mrf.mxu3  ;;  %v1286_v49 = vadd.f32 %v1285_v33, %v1197_v41  ;;  %v2013_v55 = vadd.f32 %v4048_v5, %v1735_v10  ;;  %v1199_v5 = vadd.f32 %v4061_v28, %v3871_v16  ;;  %v450_v41 = vld [vmem:[#allocation2 + $0x38] sm:$0xff]  ;;  %v1787_v33 = vld [vmem:[%s3808_s26 + $0xc0] sm:$0xff] }
 0x161   : > { %v4094_v44 = vpop.f32.mrf.mxu0 }
 0x162   : > { %v1375_v58 = vadd.f32 %v1374_v39, %v1286_v49  ;;  %v2049_v63 = vadd.f32 %v4029_v53, %v2013_v55  ;;  %v1202_v55 = vadd.f32 %v1201_v61, %v3877_v30  ;;  %v614_v30 = vunpack.c.2.s8 %v4081_v59 }
 0x163   : > { %v618_v61 = vunpack.c.3.s8 %v4081_v59 }
 0x164   : > { %v1445_v29 = vadd.f32 %v1375_v58, %v449_v45  ;;  %v2081_v36 = vmax.f32 %v2049_v63, 0.0  ;;  %3240 = vmatmul.msk.f32.gmra.mxu0 %vm1799_vm0, %v1786_v17  ;;  %v613_v45 = vunpack.c.2.s8 %v4078_v22  ;;  %v617_v58 = vunpack.c.3.s8 %v4078_v22  ;;  %v1206_v63 = vpop.f32.mrf.mxu1  ;;  %v451_v17 = vld [vmem:[#allocation2 + $0x40] sm:$0xff] }
 0x165   : > { %v1512_v14 = vld [vmem:[#allocation2 + $0x28] sm:$0xff]  ;;  %v742_v22 = vcvt.s32.f32 %v614_v30 }
 0x166   : > { %1478 = vst.msk [vmem:[#allocation2 + $0x30] sm:$0xff] %vm410_vm1, %v1445_v29  ;;  %3253 = vmatmul.msk.f32.gmra.mxu1 %vm410_vm1, %v2081_v36  ;;  %v1736_v3 = vmul.f32 %v1599_v11, %v1512_v14  ;;  %v741_v25 = vcvt.s32.f32 %v613_v45  ;;  %v745_v8 = vcvt.s32.f32 %v617_v58  ;;  %v1788_v14 = vld [vmem:[%s3808_s26 + $0xc8] sm:$0xff]  ;;  %v1207_v45 = vadd.f32 %v1206_v63, %v3889_v54  ;;  %v453_v63 = vld [vmem:[#allocation2 + $0x50] sm:$0xff] }
 0x167   : > { %v1287_v51 = vpop.f32.mrf.mxu2 }
 0x168   : > { %v1376_v48 = vpop.f32.mrf.mxu3  ;;  %v1288_v15 = vadd.f32 %v1287_v51, %v1199_v5  ;;  %v2014_v19 = vadd.f32 %v4064_v47, %v1736_v3  ;;  %v746_v51 = vcvt.s32.f32 %v618_v61 }
 0x169   : > { %v4104_v28 = vpop.f32.mrf.mxu0 }
 0x16a   : > { %v1377_v10 = vadd.f32 %v1376_v48, %v1288_v15  ;;  %v2050_v16 = vadd.f32 %v4029_v53, %v2014_v19  ;;  %v1609_v48 = vpop.permute.xlu1 %1608 }
 0x16c   : > { %v1446_v39 = vadd.f32 %v1377_v10, %v450_v41  ;;  %1329 = vmatmul.bf16.gmra.mxu2 %v813_v20  ;;  %v2082_v42 = vmax.f32 %v2050_v16, 0.0  ;;  %3241 = vmatmul.msk.f32.gmra.mxu0 %vm1799_vm0, %v1787_v33  ;;  %v817_v10 = vpack.c.bf16 %v745_v8, %v741_v25  ;;  %v818_v16 = vpack.c.bf16 %v746_v51, %v742_v22  ;;  %v452_v33 = vld [vmem:[#allocation2 + $0x48] sm:$0xff]  ;;  %v1790_v22 = vld [vmem:[%s3808_s26 + $0xd8] sm:$0xff] }
 0x16d   : > { %1418 = vmatmul.bf16.gmra.mxu3 %v814_v27  ;;  %v1513_v49 = vld [vmem:[#allocation2 + $0x30] sm:$0xff] }
 0x16e   : > { %1479 = vst.msk [vmem:[#allocation2 + $0x38] sm:$0xff] %vm410_vm1, %v1446_v39  ;;  %3254 = vmatmul.msk.f32.gmra.mxu1 %vm410_vm1, %v2082_v42  ;;  %v1737_v47 = vmul.f32 %v1604_v43, %v1513_v49  ;;  %v1208_v39 = vpop.f32.mrf.mxu1  ;;  %v1789_v43 = vld [vmem:[%s3808_s26 + $0xd0] sm:$0xff] }
 0x16f   : > { %v1290_v4 = vpop.f32.mrf.mxu2 }
 0x170   : > { %v1379_v1 = vpop.f32.mrf.mxu3  ;;  %v1291_v34 = vadd.f32 %v1290_v4, %v1202_v55  ;;  %v2015_v2 = vadd.f32 %v4074_v23, %v1737_v47  ;;  %v1204_v23 = vadd.f32 %v1203_v57, %v3883_v40  ;;  %v4130_v47 = vld [vmem:[%s3650_s16 + $0xf0] sm:$0xff]  ;;  %v1614_v4 = vpop.permute.xlu2 %1613 }
 0x171   : > { %v4117_v11 = vpop.f32.mrf.mxu0  ;;  %v621_v30 = vunpack.c.0.s8 %v4130_v47  ;;  %v625_v61 = vunpack.c.1.s8 %v4130_v47 }
 0x172   : > { %v1380_v29 = vadd.f32 %v1379_v1, %v1291_v34  ;;  %v2051_v36 = vadd.f32 %v4029_v53, %v2015_v2 }
 0x174   : > { %v1447_v5 = vadd.f32 %v1380_v29, %v451_v17  ;;  %v2083_v3 = vmax.f32 %v2051_v36, 0.0  ;;  %3242 = vmatmul.msk.f32.gmra.mxu0 %vm1799_vm0, %v1788_v14  ;;  %v749_v14 = vcvt.s32.f32 %v621_v30 }
 0x175   : > { %v1514_v15 = vld [vmem:[#allocation2 + $0x38] sm:$0xff] }
 0x176   : > { %1480 = vst.msk [vmem:[#allocation2 + $0x40] sm:$0xff] %vm410_vm1, %v1447_v5  ;;  %3255 = vmatmul.msk.f32.gmra.mxu1 %vm410_vm1, %v2083_v3  ;;  %v1738_v59 = vmul.f32 %v1609_v48, %v1514_v15  ;;  %v753_v5 = vcvt.s32.f32 %v625_v61  ;;  %v1211_v51 = vpop.f32.mrf.mxu1 }
 0x177   : > { %v1292_v19 = vpop.f32.mrf.mxu2 }
 0x178   : > { %v1381_v20 = vpop.f32.mrf.mxu3  ;;  %v1293_v27 = vadd.f32 %v1292_v19, %v1204_v23  ;;  %v2016_v41 = vadd.f32 %v4094_v44, %v1738_v59  ;;  %v4133_v44 = vld [vmem:[%s3650_s16 + $0xf8] sm:$0xff]  ;;  %v1619_v19 = vpop.permute.xlu0 %1618 }
 0x179   : > { %v4126_v42 = vpop.f32.mrf.mxu0  ;;  %v622_v36 = vunpack.c.0.s8 %v4133_v44  ;;  %v626_v54 = vunpack.c.1.s8 %v4133_v44 }
 0x17a   : > { %v1382_v40 = vadd.f32 %v1381_v20, %v1293_v27  ;;  %v2052_v57 = vadd.f32 %v4029_v53, %v2016_v41  ;;  %v1209_v20 = vadd.f32 %v1208_v39, %v3897_v6  ;;  %v1791_v6 = vld [vmem:[%s3808_s26 + $0xe0] sm:$0xff] }
 0x17b   : > { %v750_v23 = vcvt.s32.f32 %v622_v36  ;;  %v754_v59 = vcvt.s32.f32 %v626_v54 }
 0x17c   : > { %v1448_v49 = vadd.f32 %v1382_v40, %v452_v33  ;;  %1334 = vmatmul.bf16.gmra.mxu2 %v817_v10  ;;  %v2084_v55 = vmax.f32 %v2052_v57, 0.0  ;;  %3243 = vmatmul.msk.f32.gmra.mxu0 %vm1799_vm0, %v1789_v43  ;;  %v821_v40 = vpack.c.bf16 %v753_v5, %v749_v14  ;;  %v454_v43 = vld [vmem:[#allocation2 + $0x58] sm:$0xff] }
 0x17d   : > { %1423 = vmatmul.bf16.gmra.mxu3 %v818_v16  ;;  %v1515_v1 = vld [vmem:[#allocation2 + $0x40] sm:$0xff]  ;;  %v822_v57 = vpack.c.bf16 %v754_v59, %v750_v23 }
 0x17e   : > { %1481 = vst.msk [vmem:[#allocation2 + $0x48] sm:$0xff] %vm410_vm1, %v1448_v49  ;;  %3256 = vmatmul.msk.f32.gmra.mxu1 %vm410_vm1, %v2084_v55  ;;  %v1739_v58 = vmul.f32 %v1614_v4, %v1515_v1 }
 0x17f   : > { %v1295_v34 = vpop.f32.mrf.mxu2 }
 0x180   : > { %v1384_v2 = vpop.f32.mrf.mxu3  ;;  %v1296_v17 = vadd.f32 %v1295_v34, %v1207_v45  ;;  %v2017_v29 = vadd.f32 %v4104_v28, %v1739_v58  ;;  %v1624_v45 = vpop.permute.xlu1 %1623  ;;  %v1212_v34 = vadd.f32 %v1211_v51, %v3903_v21  ;;  %v630_v21 = vunpack.c.2.s8 %v4133_v44 }
 0x181   : > { %v4145_v3 = vpop.f32.mrf.mxu0 }
 0x182   : > { %v1385_v25 = vadd.f32 %v1384_v2, %v1296_v17  ;;  %v2053_v8 = vadd.f32 %v4029_v53, %v2017_v29  ;;  %v1213_v2 = vpop.f32.mrf.mxu1  ;;  %v629_v17 = vunpack.c.2.s8 %v4130_v47  ;;  %v633_v29 = vunpack.c.3.s8 %v4130_v47  ;;  %v1629_v47 = vpop.permute.xlu2 %1628 }
 0x183   : > { %v758_v59 = vcvt.s32.f32 %v630_v21  ;;  %v1794_v21 = vld [vmem:[%s3808_s26 + $0xf8] sm:$0xff] }
 0x184   : > { %v1449_v48 = vadd.f32 %v1385_v25, %v453_v63  ;;  %v2085_v15 = vmax.f32 %v2053_v8, 0.0  ;;  %3244 = vmatmul.msk.f32.gmra.mxu0 %vm1799_vm0, %v1790_v22  ;;  %v634_v63 = vunpack.c.3.s8 %v4133_v44  ;;  %v455_v25 = vld [vmem:[#allocation2 + $0x60] sm:$0xff]  ;;  %v757_v5 = vcvt.s32.f32 %v629_v17 }
 0x185   : > { %v1516_v28 = vld [vmem:[#allocation2 + $0x48] sm:$0xff]  ;;  %v761_v22 = vcvt.s32.f32 %v633_v29 }
 0x186   : > { %1482 = vst.msk [vmem:[#allocation2 + $0x50] sm:$0xff] %vm410_vm1, %v1449_v48  ;;  %3257 = vmatmul.msk.f32.gmra.mxu1 %vm410_vm1, %v2085_v15  ;;  %v1740_v27 = vmul.f32 %v1619_v19, %v1516_v28  ;;  %v1792_v48 = vld [vmem:[%s3808_s26 + $0xe8] sm:$0xff]  ;;  %v762_v19 = vcvt.s32.f32 %v634_v63 }
 0x187   : > { %v1297_v41 = vpop.f32.mrf.mxu2 }
 0x188   : > { %v1386_v10 = vpop.f32.mrf.mxu3  ;;  %v1298_v16 = vadd.f32 %v1297_v41, %v1209_v20  ;;  %v2018_v33 = vadd.f32 %v4117_v11, %v1740_v27 }
 0x189   : > { %v4154_v4 = vpop.f32.mrf.mxu0 }
 0x18a   : > { %v1387_v49 = vadd.f32 %v1386_v10, %v1298_v16  ;;  %v2054_v55 = vadd.f32 %v4029_v53, %v2018_v33  ;;  %v825_v16 = vpack.c.bf16 %v761_v22, %v757_v5  ;;  %v826_v33 = vpack.c.bf16 %v762_v19, %v758_v59 }
 0x18c   : > { %v1450_v39 = vadd.f32 %v1387_v49, %v454_v43  ;;  %v2086_v1 = vmax.f32 %v2054_v55, 0.0  ;;  %1339 = vmatmul.bf16.gmra.mxu2 %v821_v40  ;;  %3245 = vmatmul.msk.f32.gmra.mxu0 %vm1799_vm0, %v1791_v6  ;;  %v1216_v40 = vpop.f32.mrf.mxu1  ;;  %v1793_v55 = vld [vmem:[%s3808_s26 + $0xf0] sm:$0xff] }
 0x18d   : > { %1428 = vmatmul.bf16.gmra.mxu3 %v822_v57  ;;  %v1517_v58 = vld [vmem:[#allocation2 + $0x50] sm:$0xff]  ;;  %v456_v57 = vld [vmem:[#allocation2 + $0x68] sm:$0xff] }
 0x18e   : > { %1483 = vst.msk [vmem:[#allocation2 + $0x58] sm:$0xff] %vm410_vm1, %v1450_v39  ;;  %3258 = vmatmul.msk.f32.gmra.mxu1 %vm410_vm1, %v2086_v1  ;;  %v1741_v11 = vmul.f32 %v1624_v45, %v1517_v58  ;;  %v1634_v1 = vpop.permute.xlu0 %1633  ;;  %v1217_v58 = vadd.f32 %v1216_v40, %v3949_v56 }
 0x18f   : > { %v1300_v30 = vpop.f32.mrf.mxu2 }
 0x190   : > { %v1389_v61 = vpop.f32.mrf.mxu3  ;;  %v1301_v36 = vadd.f32 %v1300_v30, %v1212_v34  ;;  %v2019_v54 = vadd.f32 %v4126_v42, %v1741_v11  ;;  %v1214_v42 = vadd.f32 %v1213_v2, %v3925_v38 }
 0x191   : > { %v1952_v51 = vpop.f32.mrf.mxu0 }
 0x192   : > { %v1390_v8 = vadd.f32 %v1389_v61, %v1301_v36  ;;  %v2055_v14 = vadd.f32 %v4029_v53, %v2019_v54  ;;  %v457_v61 = vld [vmem:[#allocation2 + $0x70] sm:$0xff] }
 0x194   : > { %v1451_v15 = vadd.f32 %v1390_v8, %v455_v25  ;;  %v2087_v23 = vmax.f32 %v2055_v14, 0.0  ;;  %3246 = vmatmul.msk.f32.gmra.mxu0 %vm1799_vm0, %v1792_v48  ;;  %v1218_v36 = vpop.f32.mrf.mxu1  ;;  %v1639_v25 = vpop.permute.xlu1 %1638 }
 0x195   : > { %v1518_v28 = vld [vmem:[#allocation2 + $0x58] sm:$0xff]  ;;  %v1219_v14 = vadd.f32 %v1218_v36, %v3975_v13 }
 0x196   : > { %1484 = vst.msk [vmem:[#allocation2 + $0x60] sm:$0xff] %vm410_vm1, %v1451_v15  ;;  %3259 = vmatmul.msk.f32.gmra.mxu1 %vm410_vm1, %v2087_v23  ;;  %v1742_v44 = vmul.f32 %v1629_v47, %v1518_v28  ;;  %v458_v23 = vld [vmem:[#allocation2 + $0x78] sm:$0xff] }
 0x197   : > { %v1302_v20 = vpop.f32.mrf.mxu2 }
 0x198   : > { %v1391_v27 = vpop.f32.mrf.mxu3  ;;  %v1303_v41 = vadd.f32 %v1302_v20, %v1214_v42  ;;  %v2020_v10 = vadd.f32 %v4145_v3, %v1742_v44  ;;  %v1644_v44 = vpop.permute.xlu2 %1643 }
 0x199   : > { %v1955_v49 = vpop.f32.mrf.mxu0 }
 0x19a   : > { %v1392_v43 = vadd.f32 %v1391_v27, %v1303_v41  ;;  %v2056_v38 = vadd.f32 %v4029_v53, %v2020_v10 }
 0x19c   : > { %v1452_v6 = vadd.f32 %v1392_v43, %v456_v57  ;;  %v2088_v39 = vmax.f32 %v2056_v38, 0.0  ;;  %1344 = vmatmul.bf16.gmra.mxu2 %v825_v16  ;;  %3247 = vmatmul.msk.f32.gmra.mxu0 %vm1799_vm0, %v1793_v55  ;;  %v1649_v55 = vpop.permute.xlu0 %1648 }
 0x19d   : > { %1433 = vmatmul.bf16.gmra.mxu3 %v826_v33  ;;  %v1519_v45 = vld [vmem:[#allocation2 + $0x60] sm:$0xff] }
 0x19e   : > { %1485 = vst.msk [vmem:[#allocation2 + $0x68] sm:$0xff] %vm410_vm1, %v1452_v6  ;;  %3260 = vmatmul.msk.f32.gmra.mxu1 %vm410_vm1, %v2088_v39  ;;  %v1743_v3 = vmul.f32 %v1634_v1, %v1519_v45 }
 0x19f   : > { %v1305_v34 = vpop.f32.mrf.mxu2 }
 0x1a0   : > { %v1394_v2 = vpop.f32.mrf.mxu3  ;;  %v1306_v11 = vadd.f32 %v1305_v34, %v1217_v58  ;;  %v2021_v30 = vadd.f32 %v4154_v4, %v1743_v3 }
 0x1a1   : > { %v1958_v54 = vpop.f32.mrf.mxu0 }
 0x1a2   : > { %v1395_v17 = vadd.f32 %v1394_v2, %v1306_v11  ;;  %v2057_v29 = vadd.f32 %v4029_v53, %v2021_v30 }
 0x1a4   : > { %v1453_v56 = vadd.f32 %v1395_v17, %v457_v61  ;;  %v2089_v63 = vmax.f32 %v2057_v29, 0.0  ;;  %3248 = vmatmul.msk.f32.gmra.mxu0 %vm1799_vm0, %v1794_v21  ;;  %v1654_v61 = vpop.permute.xlu1 %1653 }
 0x1a5   : > { %v1520_v8 = vld [vmem:[#allocation2 + $0x68] sm:$0xff] }
 0x1a6   : > { %1486 = vst.msk [vmem:[#allocation2 + $0x70] sm:$0xff] %vm410_vm1, %v1453_v56  ;;  %3261 = vmatmul.msk.f32.gmra.mxu1 %vm410_vm1, %v2089_v63  ;;  %v1744_v5 = vmul.f32 %v1639_v25, %v1520_v8  ;;  %v461_v63 = vld [vmem:[#allocation2 + $0x90] sm:$0xff] }
 0x1a7   : > { %v1307_v4 = vpop.f32.mrf.mxu2 }
 0x1a8   : > { %v1396_v22 = vpop.f32.mrf.mxu3  ;;  %v1308_v48 = vadd.f32 %v1307_v4, %v1219_v14  ;;  %v2022_v15 = vadd.f32 %v1952_v51, %v1744_v5  ;;  %v459_v51 = vld [vmem:[#allocation2 + $0x80] sm:$0xff] }
 0x1a9   : > { %v1961_v47 = vpop.f32.mrf.mxu0 }
 0x1aa   : > { %v1397_v59 = vadd.f32 %v1396_v22, %v1308_v48  ;;  %v2058_v19 = vadd.f32 %v4029_v53, %v2022_v15  ;;  %v1659_v15 = vpop.permute.xlu2 %1658 }
 0x1ac   : > { %v1454_v28 = vadd.f32 %v1397_v59, %v458_v23  ;;  %v2090_v42 = vmax.f32 %v2058_v19, 0.0 }
 0x1ad   : > { %v1521_v13 = vld [vmem:[#allocation2 + $0x70] sm:$0xff] }
 0x1ae   : > { %1487 = vst.msk [vmem:[#allocation2 + $0x78] sm:$0xff] %vm410_vm1, %v1454_v28  ;;  %3262 = vmatmul.msk.f32.gmra.mxu1 %vm410_vm1, %v2090_v42  ;;  %v1745_v20 = vmul.f32 %v1644_v44, %v1521_v13  ;;  %v462_v44 = vld [vmem:[#allocation2 + $0x98] sm:$0xff] }
 0x1af   : > { %v1310_v27 = vpop.f32.mrf.mxu2 }
 0x1b0   : > { %v1399_v41 = vpop.f32.mrf.mxu3  ;;  %v1311_v10 = vadd.f32 %v1310_v27, %v3817_v62  ;;  %v2023_v16 = vadd.f32 %v1955_v49, %v1745_v20  ;;  %v460_v49 = vld [vmem:[#allocation2 + $0x88] sm:$0xff] }
 0x1b1   : > { %v1964_v57 = vpop.f32.mrf.mxu0 }
 0x1b2   : > { %v1400_v33 = vadd.f32 %v1399_v41, %v1311_v10  ;;  %v2059_v40 = vadd.f32 %v4029_v53, %v2023_v16 }
 0x1b4   : > { %v1455_v43 = vadd.f32 %v1400_v33, %v459_v51  ;;  %v2091_v38 = vmax.f32 %v2059_v40, 0.0  ;;  %v1664_v33 = vpop.permute.xlu0 %1663 }
 0x1b5   : > { %v1522_v6 = vld [vmem:[#allocation2 + $0x78] sm:$0xff] }
 0x1b6   : > { %1488 = vst.msk [vmem:[#allocation2 + $0x80] sm:$0xff] %vm410_vm1, %v1455_v43  ;;  %3263 = vmatmul.msk.f32.gmra.mxu1 %vm410_vm1, %v2091_v38  ;;  %v1746_v39 = vmul.f32 %v1649_v55, %v1522_v6 }
 0x1b7   : > { %v1312_v1 = vpop.f32.mrf.mxu2 }
 0x1b8   : > { %v1401_v45 = vpop.f32.mrf.mxu3  ;;  %v1313_v58 = vadd.f32 %v1312_v1, %v3825_v12  ;;  %v2024_v62 = vadd.f32 %v1958_v54, %v1746_v39  ;;  %v4201_v54 = vld [vmem:[%s4463_s7] ss:$0 sm:$0xff] }
 0x1b9   : > { %v1967_v2 = vpop.f32.mrf.mxu0 }
 0x1ba   : > { %v1402_v3 = vadd.f32 %v1401_v45, %v1313_v58  ;;  %v2060_v34 = vadd.f32 %v4029_v53, %v2024_v62  ;;  %v463_v45 = vld [vmem:[#allocation2 + $0xa0] sm:$0xff] }
 0x1bc   : > { %v1456_v11 = vadd.f32 %v1402_v3, %v460_v49  ;;  %v2092_v30 = vmax.f32 %v2060_v34, 0.0 }
 0x1bd   : > { %v1523_v17 = vld [vmem:[#allocation2 + $0x80] sm:$0xff] }
 0x1be   : > { %1489 = vst.msk [vmem:[#allocation2 + $0x88] sm:$0xff] %vm410_vm1, %v1456_v11  ;;  %3264 = vmatmul.msk.f32.gmra.mxu1 %vm410_vm1, %v2092_v30  ;;  %v1747_v29 = vmul.f32 %v1654_v61, %v1523_v17  ;;  %v1669_v61 = vpop.permute.xlu1 %1668 }
 0x1bf   : > { %v1315_v36 = vpop.f32.mrf.mxu2 }
 0x1c0   : > { %v1404_v21 = vpop.f32.mrf.mxu3  ;;  %v1316_v56 = vadd.f32 %v1315_v36, %v3835_v24  ;;  %v2025_v12 = vadd.f32 %v1961_v47, %v1747_v29 }
 0x1c1   : > { %v4204_v5 = vpop.f32.mrf.mxu0 }
 0x1c2   : > { %v1405_v25 = vadd.f32 %v1404_v21, %v1316_v56  ;;  %v2061_v8 = vadd.f32 %v4029_v53, %v2025_v12 }
 0x1c3   : > { %v2228_v14 = vpop.f32.mrf.mxu1 }
 0x1c4   : > { %v1457_v4 = vadd.f32 %v1405_v25, %v461_v63  ;;  %v2093_v22 = vmax.f32 %v2061_v8, 0.0  ;;  %v2229_v48 = vadd.f32 %v4201_v54, %v2228_v14  ;;  %v464_v8 = vld [vmem:[#allocation2 + $0xa8] sm:$0xff] }
 0x1c5   : > { %v1524_v23 = vld [vmem:[#allocation2 + $0x88] sm:$0xff] }
 0x1c6   : > { %1490 = vst.msk [vmem:[#allocation2 + $0x90] sm:$0xff] %vm410_vm1, %v1457_v4  ;;  %v3281_v24 = vmul.f32 -1.442695, %v2229_v48  ;;  %3265 = vmatmul.msk.f32.gmra.mxu1 %vm410_vm1, %v2093_v22  ;;  %v1748_v59 = vmul.f32 %v1659_v15, %v1524_v23 }
 0x1c7   : > { %v1317_v19 = vpop.f32.mrf.mxu2 }
 0x1c8   : > { %v1406_v47 = vpop.f32.mrf.mxu3  ;;  %3395 = vpow2.f32 %v3281_v24  ;;  %v1318_v28 = vadd.f32 %v1317_v19, %v3842_v37  ;;  %v2026_v42 = vadd.f32 %v1964_v57, %v1748_v59 }
 0x1c9   : > { %v4211_v41 = vpop.f32.mrf.mxu0 }
 0x1ca   : > { %v1407_v13 = vadd.f32 %v1406_v47, %v1318_v28  ;;  %v2062_v20 = vadd.f32 %v4029_v53, %v2026_v42  ;;  %v1674_v28 = vpop.permute.xlu2 %1673 }
 0x1cb   : > { %v2231_v27 = vpop.f32.mrf.mxu1 }
 0x1cc   : > { %v1458_v10 = vadd.f32 %v1407_v13, %v462_v44  ;;  %v2094_v16 = vmax.f32 %v2062_v20, 0.0  ;;  %v2232_v51 = vadd.f32 %v4201_v54, %v2231_v27 }
 0x1cd   : > { %v1525_v40 = vld [vmem:[#allocation2 + $0x90] sm:$0xff] }
 0x1ce   : > { %v3396_v43 = vpop.eup %3395  ;;  %1491 = vst.msk [vmem:[#allocation2 + $0x98] sm:$0xff] %vm410_vm1, %v1458_v10  ;;  %v3282_v38 = vmul.f32 -1.442695, %v2232_v51  ;;  %3266 = vmatmul.msk.f32.gmra.mxu1 %vm410_vm1, %v2094_v16  ;;  %v1749_v37 = vmul.f32 %v1664_v33, %v1525_v40 }
 0x1cf   : > { %v2420_v57 = vadd.f32 1.0, %v3396_v43  ;;  %v1320_v55 = vpop.f32.mrf.mxu2 }
 0x1d0   : > { %v1409_v6 = vpop.f32.mrf.mxu3  ;;  %3397 = vpow2.f32 %v3282_v38  ;;  %v1321_v39 = vadd.f32 %v1320_v55, %v3849_v46  ;;  %v2027_v1 = vadd.f32 %v1967_v2, %v1749_v37 }
 0x1d1   : > { %3399 = vrcp.f32 %v2420_v57  ;;  %v4219_v30 = vpop.f32.mrf.mxu0  ;;  %v2461_v48 = vand.u32 2147483647, %v2420_v57  ;;  %v2463_v15 = vand.u32 2147483648, %v2420_v57  ;;  %vm2457_vm3 = vweird.f32 %v2420_v57 }
 0x1d2   : > { %v1410_v58 = vadd.f32 %v1409_v6, %v1321_v39  ;;  %v2063_v62 = vadd.f32 %v4029_v53, %v2027_v1 }
 0x1d3   : > { %v2234_v49 = vpop.f32.mrf.mxu1  ;;  %v2464_v16 = vor.u32 1.1754944e-38, %v2463_v15  ;;  %vm2462_vm5 = vcmp.eq.f32.partialorder %v2461_v48, 8.507059e+37 }
 0x1d4   : > { %v1459_v3 = vadd.f32 %v1410_v58, %v463_v45  ;;  %v2095_v34 = vmax.f32 %v2063_v62, 0.0  ;;  %v2235_v11 = vadd.f32 %v4201_v54, %v2234_v49  ;;  %v465_v45 = vld [vmem:[#allocation2 + $0xb0] sm:$0xff] }
 0x1d5   : > { %v1526_v17 = vld [vmem:[#allocation2 + $0x98] sm:$0xff] }
 0x1d6   : > { %v3398_v29 = vpop.eup %3397  ;;  %1492 = vst.msk [vmem:[#allocation2 + $0xa0] sm:$0xff] %vm410_vm1, %v1459_v3  ;;  %v3283_v36 = vmul.f32 -1.442695, %v2235_v11  ;;  %3267 = vmatmul.msk.f32.gmra.mxu1 %vm410_vm1, %v2095_v34  ;;  %v1750_v46 = vmul.f32 %v1669_v61, %v1526_v17  ;;  %v1679_v17 = vpop.permute.xlu0 %1678 }
 0x1d7   : > { %v3400_v2 = vpop.eup %3399  ;;  %v4223_v21 = vadd.f32 1.0, %v3398_v29  ;;  %v1322_v56 = vpop.f32.mrf.mxu2 }
 0x1d8   : > { %v1411_v12 = vpop.f32.mrf.mxu3  ;;  %v2453_v63 = vmul.f32 %v3400_v2, %v2420_v57  ;;  %3401 = vpow2.f32 %v3283_v36  ;;  %v1323_v25 = vadd.f32 %v1322_v56, %v3856_v60  ;;  %v2028_v22 = vadd.f32 %v4204_v5, %v1750_v46 }
 0x1d9   : > { %3403 = vrcp.f32 %v4223_v21  ;;  %vm2458_vm2 = vweird.f32 %v3400_v2  ;;  %v4231_v27 = vpop.f32.mrf.mxu0  ;;  %v2476_v39 = vand.u32 2147483647, %v4223_v21  ;;  %v2478_v1 = vand.u32 2147483648, %v4223_v21 }
 0x1da   : > { %v2454_v14 = vsub.f32 1.0, %v2453_v63  ;;  %v1412_v4 = vadd.f32 %v1411_v12, %v1323_v25  ;;  %v2064_v19 = vadd.f32 %v4029_v53, %v2028_v22  ;;  %vm2459_vm4 = vmor %vm2457_vm3, %vm2458_vm2  ;;  %vm2472_vm7 = vweird.f32 %v4223_v21  ;;  %v466_v22 = vld [vmem:[#allocation2 + $0xb8] sm:$0xff] }
 0x1db   : > { %v2237_v23 = vpop.f32.mrf.mxu1  ;;  %v2479_v46 = vor.u32 1.1754944e-38, %v2478_v1  ;;  %vm2477_vm9 = vcmp.eq.f32.partialorder %v2476_v39, 8.507059e+37 }
 0x1dc   : > { %v2455_v24 = vmul.f32 %v3400_v2, %v2454_v14  ;;  %v1460_v59 = vadd.f32 %v1412_v4, %v464_v8  ;;  %v2238_v47 = vadd.f32 %v4201_v54, %v2237_v23  ;;  %v2096_v13 = vmax.f32 %v2064_v19, 0.0 }
 0x1dd   : > { %v1527_v60 = vld [vmem:[#allocation2 + $0xa0] sm:$0xff] }
 0x1de   : > { %v3402_v42 = vpop.eup %3401  ;;  %v2456_v44 = vadd.f32 %v3400_v2, %v2455_v24  ;;  %1493 = vst.msk [vmem:[#allocation2 + $0xa8] sm:$0xff] %vm410_vm1, %v1460_v59  ;;  %v3284_v5 = vmul.f32 -1.442695, %v2238_v47  ;;  %v1751_v20 = vmul.f32 %v1674_v28, %v1527_v60  ;;  %3268 = vmatmul.msk.f32.gmra.mxu1 %vm410_vm1, %v2096_v13  ;;  %v4270_v60 = vld [vmem:[%s4461_s5] ss:$0 sm:$0xff] }
 0x1df   : > { %v3404_v10 = vpop.eup %3403  ;;  %v4240_v51 = vadd.f32 1.0, %v3402_v42  ;;  %v1325_v33 = vpop.f32.mrf.mxu2 }
 0x1e0   : > { %v1414_v40 = vpop.f32.mrf.mxu3  ;;  %v2460_v43 = vsel %vm2459_vm4, %v3400_v2, %v2456_v44  ;;  %v2468_v38 = vmul.f32 %v3404_v10, %v4223_v21  ;;  %3405 = vpow2.f32 %v3284_v5  ;;  %v1326_v55 = vadd.f32 %v1325_v33, %v3865_v9 }
 0x1e1   : > { %v2465_v37 = vsel %vm2462_vm5, %v2464_v16, %v2460_v43  ;;  %3407 = vrcp.f32 %v4240_v51  ;;  %v2029_v6 = vadd.f32 %v4211_v41, %v1751_v20  ;;  %vm2473_vm6 = vweird.f32 %v3404_v10  ;;  %v4259_v14 = vpop.f32.mrf.mxu0  ;;  %v1684_v43 = vpop.permute.xlu1 %1683 }
 0x1e2   : > { %2932 = vst [vmem:[%s4237_s17] sm:$0xff] %v2465_v37  ;;  %v2469_v57 = vsub.f32 1.0, %v2468_v38  ;;  %v1415_v49 = vadd.f32 %v1414_v40, %v1326_v55  ;;  %vm2474_vm8 = vmor %vm2472_vm7, %vm2473_vm6  ;;  %v2491_v23 = vand.u32 2147483647, %v4240_v51  ;;  %v2493_v24 = vand.u32 2147483648, %v4240_v51 }
 0x1e3   : > { %v2240_v58 = vpop.f32.mrf.mxu1  ;;  %v2065_v3 = vadd.f32 %v4029_v53, %v2029_v6  ;;  %vm2487_vm11 = vweird.f32 %v4240_v51 }
 0x1e4   : > { %v2470_v62 = vmul.f32 %v3404_v10, %v2469_v57  ;;  %v2241_v34 = vadd.f32 %v4201_v54, %v2240_v58  ;;  %v1461_v9 = vadd.f32 %v1415_v49, %v465_v45  ;;  %v2494_v5 = vor.u32 1.1754944e-38, %v2493_v24 }
 0x1e5   : > { %v1528_v11 = vld [vmem:[#allocation2 + $0xa8] sm:$0xff]  ;;  %v2097_v41 = vmax.f32 %v2065_v3, 0.0  ;;  %vm2492_vm13 = vcmp.eq.f32.partialorder %v2491_v23, 8.507059e+37 }
 0x1e6   : > { %v3406_v61 = vpop.eup %3405  ;;  %v2471_v29 = vadd.f32 %v3404_v10, %v2470_v62  ;;  %v3285_v56 = vmul.f32 -1.442695, %v2241_v34  ;;  %v1752_v53 = vmul.f32 %v1679_v17, %v1528_v11  ;;  %1494 = vst.msk [vmem:[#allocation2 + $0xb0] sm:$0xff] %vm410_vm1, %v1461_v9  ;;  %v467_v62 = vld [vmem:[#allocation2 + $0xc0] sm:$0xff] }
 0x1e7   : > { %v3408_v36 = vpop.eup %3407  ;;  %v4253_v2 = vadd.f32 1.0, %v3406_v61  ;;  %v1327_v12 = vpop.f32.mrf.mxu2  ;;  %3269 = vmatmul.msk.f32.gmra.mxu1 %vm410_vm1, %v2097_v41 }
 0x1e8   : > { %v1416_v63 = vpop.f32.mrf.mxu3  ;;  %v2475_v25 = vsel %vm2474_vm8, %v3404_v10, %v2471_v29  ;;  %v2483_v8 = vmul.f32 %v3408_v36, %v4240_v51  ;;  %v1328_v21 = vadd.f32 %v1327_v12, %v3875_v26  ;;  %v2030_v59 = vadd.f32 %v4219_v30, %v1752_v53  ;;  %v1689_v29 = vpop.permute.xlu2 %1688 }
 0x1e9   : > { %v2480_v4 = vsel %vm2477_vm9, %v2479_v46, %v2475_v25  ;;  %3409 = vrcp.f32 %v4253_v2  ;;  %vm2488_vm10 = vweird.f32 %v3408_v36  ;;  %v4281_v1 = vpop.f32.mrf.mxu0  ;;  %v2506_v45 = vand.u32 2147483647, %v4253_v2 }
 0x1ea   : > { %2933 = vst [vmem:[%s4237_s17 + $0x8] sm:$0xff] %v2480_v4  ;;  %v2484_v48 = vsub.f32 1.0, %v2483_v8  ;;  %3411 = vpow2.f32 %v3285_v56  ;;  %v1417_v15 = vadd.f32 %v1416_v63, %v1328_v21  ;;  %v2066_v42 = vadd.f32 %v4270_v60, %v2030_v59  ;;  %vm2489_vm12 = vmor %vm2487_vm11, %vm2488_vm10 }
 0x1eb   : > { %v2243_v19 = vpop.f32.mrf.mxu1  ;;  %v2508_v58 = vand.u32 2147483648, %v4253_v2  ;;  %vm2502_vm15 = vweird.f32 %v4253_v2  ;;  %vm2507_vm2 = vcmp.eq.f32.partialorder %v2506_v45, 8.507059e+37 }
 0x1ec   : > { %v2485_v47 = vmul.f32 %v3408_v36, %v2484_v48  ;;  %v1462_v26 = vadd.f32 %v1417_v15, %v466_v22  ;;  %v2244_v28 = vadd.f32 %v4201_v54, %v2243_v19  ;;  %v2098_v20 = vmax.f32 %v2066_v42, 0.0  ;;  %v468_v22 = vld [vmem:[#allocation2 + $0xc8] sm:$0xff] }
 0x1ed   : > { %v1529_v33 = vld [vmem:[#allocation2 + $0xb0] sm:$0xff]  ;;  %v2509_v56 = vor.u32 1.1754944e-38, %v2508_v58 }
 0x1ee   : > { %v2486_v44 = vadd.f32 %v3408_v36, %v2485_v47  ;;  %1495 = vst.msk [vmem:[#allocation2 + $0xb8] sm:$0xff] %vm410_vm1, %v1462_v26  ;;  %v3286_v13 = vmul.f32 -1.442695, %v2244_v28  ;;  %v1753_v6 = vmul.f32 %v1684_v43, %v1529_v33 }
 0x1ef   : > { %v3410_v30 = vpop.eup %3409  ;;  %v1330_v10 = vpop.f32.mrf.mxu2  ;;  %3270 = vmatmul.msk.f32.gmra.mxu1 %vm410_vm1, %v2098_v20 }
 0x1f0   : > { %v1419_v16 = vpop.f32.mrf.mxu3  ;;  %v3412_v40 = vpop.eup %3411  ;;  %v2490_v38 = vsel %vm2489_vm12, %v3408_v36, %v2486_v44  ;;  %v2498_v37 = vmul.f32 %v3410_v30, %v4253_v2  ;;  %3413 = vpow2.f32 %v3286_v13  ;;  %v1331_v55 = vadd.f32 %v1330_v10, %v3881_v35 }
 0x1f1   : > { %v2495_v57 = vsel %vm2492_vm13, %v2494_v5, %v2490_v38  ;;  %v4276_v51 = vadd.f32 1.0, %v3412_v40  ;;  %vm2503_vm14 = vweird.f32 %v3410_v30  ;;  %v2031_v11 = vadd.f32 %v4231_v27, %v1753_v6  ;;  %v4301_v26 = vpop.f32.mrf.mxu0  ;;  %v1694_v38 = vpop.permute.xlu0 %1693 }
 0x1f2   : > { %2934 = vst [vmem:[%s4237_s17 + $0x10] sm:$0xff] %v2495_v57  ;;  %v2499_v39 = vsub.f32 1.0, %v2498_v37  ;;  %v1420_v34 = vadd.f32 %v1419_v16, %v1331_v55  ;;  %vm2504_vm0 = vmor %vm2502_vm15, %vm2503_vm14 }
 0x1f3   : > { %3415 = vrcp.f32 %v4276_v51  ;;  %v2246_v49 = vpop.f32.mrf.mxu1  ;;  %v2067_v36 = vadd.f32 %v4270_v60, %v2031_v11  ;;  %v2523_v28 = vand.u32 2147483648, %v4276_v51  ;;  %vm2517_vm4 = vweird.f32 %v4276_v51 }
 0x1f4   : > { %v2500_v3 = vmul.f32 %v3410_v30, %v2499_v39  ;;  %v2247_v35 = vadd.f32 %v4201_v54, %v2246_v49  ;;  %v1463_v41 = vadd.f32 %v1420_v34, %v467_v62  ;;  %v469_v62 = vld [vmem:[#allocation2 + $0xd0] sm:$0xff] }
 0x1f5   : > { %v1530_v61 = vld [vmem:[#allocation2 + $0xb8] sm:$0xff]  ;;  %v2099_v2 = vmax.f32 %v2067_v36, 0.0  ;;  %v2524_v37 = vor.u32 1.1754944e-38, %v2523_v28 }
 0x1f6   : > { %v3414_v17 = vpop.eup %3413  ;;  %v2501_v9 = vadd.f32 %v3410_v30, %v2500_v3  ;;  %v3287_v46 = vmul.f32 -1.442695, %v2247_v35  ;;  %v1754_v53 = vmul.f32 %v1689_v29, %v1530_v61  ;;  %1496 = vst.msk [vmem:[#allocation2 + $0xc0] sm:$0xff] %vm410_vm1, %v1463_v41 }
 0x1f7   : > { %v4291_v12 = vadd.f32 1.0, %v3414_v17  ;;  %v1332_v27 = vpop.f32.mrf.mxu2  ;;  %3271 = vmatmul.msk.f32.gmra.mxu1 %vm410_vm1, %v2099_v2  ;;  %v1699_v17 = vpop.permute.xlu1 %1698 }
 0x1f8   : > { %v1421_v63 = vpop.f32.mrf.mxu3  ;;  %v2505_v25 = vsel %vm2504_vm0, %v3410_v30, %v2501_v9  ;;  %3417 = vpow2.f32 %v3287_v46  ;;  %v1333_v8 = vadd.f32 %v1332_v27, %v3887_v50  ;;  %v2032_v23 = vadd.f32 %v4259_v14, %v1754_v53 }
 0x1f9   : > { %v3416_v21 = vpop.eup %3415  ;;  %v2510_v4 = vsel %vm2507_vm2, %v2509_v56, %v2505_v25  ;;  %3419 = vrcp.f32 %v4291_v12  ;;  %v2521_v50 = vand.u32 2147483647, %v4276_v51  ;;  %v2538_v58 = vand.u32 2147483648, %v4291_v12  ;;  %v4321_v46 = vpop.f32.mrf.mxu0 }
 0x1fa   : > { %2935 = vst [vmem:[%s4237_s17 + $0x18] sm:$0xff] %v2510_v4  ;;  %v2513_v48 = vmul.f32 %v3416_v21, %v4276_v51  ;;  %v1422_v15 = vadd.f32 %v1421_v63, %v1333_v8  ;;  %v2068_v42 = vadd.f32 %v4270_v60, %v2032_v23  ;;  %vm2518_vm3 = vweird.f32 %v3416_v21  ;;  %v470_v23 = vld [vmem:[#allocation2 + $0xd8] sm:$0xff] }
 0x1fb   : > { %v2249_v24 = vpop.f32.mrf.mxu1  ;;  %vm2519_vm5 = vmor %vm2517_vm4, %vm2518_vm3  ;;  %vm2522_vm6 = vcmp.eq.f32.partialorder %v2521_v50, 8.507059e+37  ;;  %v2536_v51 = vand.u32 2147483647, %v4291_v12  ;;  %vm2532_vm8 = vweird.f32 %v4291_v12  ;;  %v2539_v27 = vor.u32 1.1754944e-38, %v2538_v58 }
 0x1fc   : > { %v2514_v59 = vsub.f32 1.0, %v2513_v48  ;;  %v1464_v19 = vadd.f32 %v1422_v15, %v468_v22  ;;  %v2250_v47 = vadd.f32 %v4201_v54, %v2249_v24  ;;  %v2100_v20 = vmax.f32 %v2068_v42, 0.0 }
 0x1fd   : > { %v1531_v33 = vld [vmem:[#allocation2 + $0xc0] sm:$0xff]  ;;  %vm2537_vm10 = vcmp.eq.f32.partialorder %v2536_v51, 8.507059e+37 }
 0x1fe   : > { %v3418_v44 = vpop.eup %3417  ;;  %v2515_v13 = vmul.f32 %v3416_v21, %v2514_v59  ;;  %1497 = vst.msk [vmem:[#allocation2 + $0xc8] sm:$0xff] %vm410_vm1, %v1464_v19  ;;  %v3288_v30 = vmul.f32 -1.442695, %v2250_v47  ;;  %v1755_v39 = vmul.f32 %v1694_v38, %v1531_v33  ;;  %v1704_v33 = vpop.permute.xlu2 %1703  ;;  %v471_v51 = vld [vmem:[#allocation2 + $0xe0] sm:$0xff] }
 0x1ff   : > { %v3420_v14 = vpop.eup %3419  ;;  %v4307_v5 = vadd.f32 1.0, %v3418_v44  ;;  %v1335_v10 = vpop.f32.mrf.mxu2  ;;  %3272 = vmatmul.msk.f32.gmra.mxu1 %vm410_vm1, %v2100_v20 }
 0x200   : > { %v1424_v16 = vpop.f32.mrf.mxu3  ;;  %v2516_v40 = vadd.f32 %v3416_v21, %v2515_v13  ;;  %v2528_v43 = vmul.f32 %v3420_v14, %v4291_v12  ;;  %3421 = vpow2.f32 %v3288_v30  ;;  %v1336_v6 = vadd.f32 %v1335_v10, %v3895_v0 }
 0x201   : > { %3423 = vrcp.f32 %v4307_v5  ;;  %vm2533_vm7 = vweird.f32 %v3420_v14  ;;  %v2033_v11 = vadd.f32 %v4281_v1, %v1755_v39  ;;  %v2551_v48 = vand.u32 2147483647, %v4307_v5 }
 0x202   : > { %v2520_v57 = vsel %vm2519_vm5, %v3416_v21, %v2516_v40  ;;  %v2529_v55 = vsub.f32 1.0, %v2528_v43  ;;  %v1425_v34 = vadd.f32 %v1424_v16, %v1336_v6  ;;  %vm2534_vm9 = vmor %vm2532_vm8, %vm2533_vm7  ;;  %v2553_v15 = vand.u32 2147483648, %v4307_v5 }
 0x203   : > { %v2525_v45 = vsel %vm2522_vm6, %v2524_v37, %v2520_v57  ;;  %v2252_v49 = vpop.f32.mrf.mxu1  ;;  %v2069_v41 = vadd.f32 %v4270_v60, %v2033_v11  ;;  %vm2547_vm12 = vweird.f32 %v4307_v5  ;;  %vm2552_vm14 = vcmp.eq.f32.partialorder %v2551_v48, 8.507059e+37 }
 0x204   : > { %2936 = vst [vmem:[%s4237_s17 + $0x20] sm:$0xff] %v2525_v45  ;;  %v2530_v3 = vmul.f32 %v3420_v14, %v2529_v55  ;;  %v2253_v35 = vadd.f32 %v4201_v54, %v2252_v49  ;;  %v1465_v9 = vadd.f32 %v1425_v34, %v469_v62  ;;  %v2554_v30 = vor.u32 1.1754944e-38, %v2553_v15  ;;  %v1994_v55 = vpop.f32.mrf.mxu0 }
 0x205   : > { %v1532_v61 = vld [vmem:[#allocation2 + $0xc8] sm:$0xff]  ;;  %v2101_v8 = vmax.f32 %v2069_v41, 0.0 }
 0x206   : > { %v3422_v0 = vpop.eup %3421  ;;  %v2531_v29 = vadd.f32 %v3420_v14, %v2530_v3  ;;  %v3289_v36 = vmul.f32 -1.442695, %v2253_v35  ;;  %v1756_v12 = vmul.f32 %v1699_v17, %v1532_v61  ;;  %1498 = vst.msk [vmem:[#allocation2 + $0xd0] sm:$0xff] %vm410_vm1, %v1465_v9 }
 0x207   : > { %v3424_v56 = vpop.eup %3423  ;;  %v4324_v1 = vadd.f32 1.0, %v3422_v0  ;;  %v1337_v63 = vpop.f32.mrf.mxu2  ;;  %3273 = vmatmul.msk.f32.gmra.mxu1 %vm410_vm1, %v2101_v8 }
 0x208   : > { %v1426_v53 = vpop.f32.mrf.mxu3  ;;  %v2535_v25 = vsel %vm2534_vm9, %v3420_v14, %v2531_v29  ;;  %v2543_v2 = vmul.f32 %v3424_v56, %v4307_v5  ;;  %v1338_v22 = vadd.f32 %v1337_v63, %v3901_v18  ;;  %v2034_v24 = vadd.f32 %v4301_v26, %v1756_v12  ;;  %v1709_v12 = vpop.permute.xlu0 %1708 }
 0x209   : > { %v2540_v21 = vsel %vm2537_vm10, %v2539_v27, %v2535_v25  ;;  %3425 = vrcp.f32 %v4324_v1  ;;  %vm2548_vm11 = vweird.f32 %v3424_v56  ;;  %v2566_v39 = vand.u32 2147483647, %v4324_v1 }
 0x20a   : > { %2937 = vst [vmem:[%s4237_s17 + $0x28] sm:$0xff] %v2540_v21  ;;  %v2544_v4 = vsub.f32 1.0, %v2543_v2  ;;  %3427 = vpow2.f32 %v3289_v36  ;;  %v1427_v47 = vadd.f32 %v1426_v53, %v1338_v22  ;;  %v2070_v28 = vadd.f32 %v4270_v60, %v2034_v24  ;;  %vm2549_vm13 = vmor %vm2547_vm12, %vm2548_vm11  ;;  %v472_v53 = vld [vmem:[#allocation2 + $0xe8] sm:$0xff] }
 0x20b   : > { %v2255_v59 = vpop.f32.mrf.mxu1  ;;  %v2568_v45 = vand.u32 2147483648, %v4324_v1  ;;  %vm2562_vm0 = vweird.f32 %v4324_v1  ;;  %vm2567_vm3 = vcmp.eq.f32.partialorder %v2566_v39, 8.507059e+37 }
 0x20c   : > { %v2545_v19 = vmul.f32 %v3424_v56, %v2544_v4  ;;  %v2256_v50 = vadd.f32 %v4201_v54, %v2255_v59  ;;  %v1466_v44 = vadd.f32 %v1427_v47, %v470_v23  ;;  %v2102_v14 = vmax.f32 %v2070_v28, 0.0  ;;  %v1997_v4 = vpop.f32.mrf.mxu0 }
 0x20d   : > { %v1533_v10 = vld [vmem:[#allocation2 + $0xd0] sm:$0xff]  ;;  %v2569_v17 = vor.u32 1.1754944e-38, %v2568_v45 }
 0x20e   : > { %v2546_v42 = vadd.f32 %v3424_v56, %v2545_v19  ;;  %v3290_v18 = vmul.f32 -1.442695, %v2256_v50  ;;  %1499 = vst.msk [vmem:[#allocation2 + $0xd8] sm:$0xff] %vm410_vm1, %v1466_v44  ;;  %v1757_v57 = vmul.f32 %v1704_v33, %v1533_v10 }
 0x20f   : > { %v3426_v13 = vpop.eup %3425  ;;  %v1340_v20 = vpop.f32.mrf.mxu2  ;;  %3274 = vmatmul.msk.f32.gmra.mxu1 %vm410_vm1, %v2102_v14 }
 0x210   : > { %v1429_v26 = vpop.f32.mrf.mxu3  ;;  %v3428_v16 = vpop.eup %3427  ;;  %v2550_v40 = vsel %vm2549_vm13, %v3424_v56, %v2546_v42  ;;  %v2558_v43 = vmul.f32 %v3426_v13, %v4324_v1  ;;  %3429 = vpow2.f32 %v3290_v18  ;;  %v1341_v37 = vadd.f32 %v1340_v20, %v3917_v32 }
 0x211   : > { %v2555_v5 = vsel %vm2552_vm14, %v2554_v30, %v2550_v40  ;;  %v4340_v38 = vadd.f32 1.0, %v3428_v16  ;;  %vm2563_vm15 = vweird.f32 %v3426_v13  ;;  %v2035_v3 = vadd.f32 %v4321_v46, %v1757_v57 }
 0x212   : > { %2938 = vst [vmem:[%s4237_s17 + $0x30] sm:$0xff] %v2555_v5  ;;  %v2559_v6 = vsub.f32 1.0, %v2558_v43  ;;  %v1430_v49 = vadd.f32 %v1429_v26, %v1341_v37  ;;  %vm2564_vm2 = vmor %vm2562_vm0, %vm2563_vm15  ;;  %v1714_v26 = vpop.permute.xlu1 %1713  ;;  %v473_v37 = vld [vmem:[#allocation2 + $0xf0] sm:$0xff] }
 0x213   : > { %3431 = vrcp.f32 %v4340_v38  ;;  %v2258_v58 = vpop.f32.mrf.mxu1  ;;  %v2071_v61 = vadd.f32 %v4270_v60, %v2035_v3  ;;  %v2581_v15 = vand.u32 2147483647, %v4340_v38  ;;  %v2583_v23 = vand.u32 2147483648, %v4340_v38 }
 0x214   : > { %v2560_v62 = vmul.f32 %v3426_v13, %v2559_v6  ;;  %v2259_v32 = vadd.f32 %v4201_v54, %v2258_v58  ;;  %v1467_v35 = vadd.f32 %v1430_v49, %v471_v51  ;;  %vm2577_vm5 = vweird.f32 %v4340_v38  ;;  %v1719_v49 = vpop.permute.xlu2 %1718 }
 0x215   : > { %v2103_v46 = vmax.f32 %v2071_v61, 0.0  ;;  %v1534_v27 = vld [vmem:[#allocation2 + $0xd8] sm:$0xff]  ;;  %vm2582_vm7 = vcmp.eq.f32.partialorder %v2581_v15, 8.507059e+37  ;;  %v2584_v14 = vor.u32 1.1754944e-38, %v2583_v23 }
 0x216   : > { %v3430_v34 = vpop.eup %3429  ;;  %v2561_v11 = vadd.f32 %v3426_v13, %v2560_v62  ;;  %v3291_v0 = vmul.f32 -1.442695, %v2259_v32  ;;  %1500 = vst.msk [vmem:[#allocation2 + $0xe0] sm:$0xff] %vm410_vm1, %v1467_v35  ;;  %v1758_v8 = vmul.f32 %v1709_v12, %v1534_v27  ;;  %v2000_v62 = vpop.f32.mrf.mxu0 }
 0x217   : > { %v4353_v29 = vadd.f32 1.0, %v3430_v34  ;;  %v1342_v9 = vpop.f32.mrf.mxu2  ;;  %3275 = vmatmul.msk.f32.gmra.mxu1 %vm410_vm1, %v2103_v46 }
 0x218   : > { %v1431_v41 = vpop.f32.mrf.mxu3  ;;  %v2565_v36 = vsel %vm2564_vm2, %v3426_v13, %v2561_v11  ;;  %3433 = vpow2.f32 %v3291_v0  ;;  %v1343_v56 = vadd.f32 %v1342_v9, %v3941_v52  ;;  %v2036_v24 = vadd.f32 %v1994_v55, %v1758_v8 }
 0x219   : > { %v3432_v1 = vpop.eup %3431  ;;  %v2570_v63 = vsel %vm2567_vm3, %v2569_v17, %v2565_v36  ;;  %3435 = vrcp.f32 %v4353_v29  ;;  %v2596_v5 = vand.u32 2147483647, %v4353_v29  ;;  %vm2592_vm9 = vweird.f32 %v4353_v29 }
 0x21a   : > { %2939 = vst [vmem:[%s4237_s17 + $0x38] sm:$0xff] %v2570_v63  ;;  %v2573_v25 = vmul.f32 %v3432_v1, %v4340_v38  ;;  %v1432_v2 = vadd.f32 %v1431_v41, %v1343_v56  ;;  %vm2578_vm4 = vweird.f32 %v3432_v1  ;;  %v2072_v42 = vadd.f32 %v4270_v60, %v2036_v24 }
 0x21b   : > { %v2261_v21 = vpop.f32.mrf.mxu1  ;;  %vm2579_vm6 = vmor %vm2577_vm5, %vm2578_vm4  ;;  %v2598_v38 = vand.u32 2147483648, %v4353_v29  ;;  %vm2597_vm11 = vcmp.eq.f32.partialorder %v2596_v5, 8.507059e+37 }
 0x21c   : > { %v2574_v22 = vsub.f32 1.0, %v2573_v25  ;;  %v1468_v48 = vadd.f32 %v1432_v2, %v472_v53  ;;  %v2262_v52 = vadd.f32 %v4201_v54, %v2261_v21  ;;  %v2104_v33 = vmax.f32 %v2072_v42, 0.0  ;;  %v474_v53 = vld [vmem:[#allocation2 + $0xf8] sm:$0xff] }
 0x21d   : > { %v1535_v30 = vld [vmem:[#allocation2 + $0xe0] sm:$0xff]  ;;  %v2599_v35 = vor.u32 1.1754944e-38, %v2598_v38 }
 0x21e   : > { %v3434_v59 = vpop.eup %3433  ;;  %v2575_v19 = vmul.f32 %v3432_v1, %v2574_v22  ;;  %1501 = vst.msk [vmem:[#allocation2 + $0xe8] sm:$0xff] %vm410_vm1, %v1468_v48  ;;  %v3292_v47 = vmul.f32 -1.442695, %v2262_v52  ;;  %v1759_v57 = vmul.f32 %v1714_v26, %v1535_v30 }
 0x21f   : > { %v3436_v50 = vpop.eup %3435  ;;  %v4365_v28 = vadd.f32 1.0, %v3434_v59  ;;  %v1345_v44 = vpop.f32.mrf.mxu2  ;;  %3276 = vmatmul.msk.f32.gmra.mxu1 %vm410_vm1, %v2104_v33 }
 0x220   : > { %v2576_v18 = vadd.f32 %v3432_v1, %v2575_v19  ;;  %v2588_v13 = vmul.f32 %v3436_v50, %v4353_v29  ;;  %3437 = vpow2.f32 %v3292_v47  ;;  %v1434_v20 = vpop.f32.mrf.mxu3  ;;  %v1346_v40 = vadd.f32 %v1345_v44, %v3967_v7  ;;  %v2003_v47 = vpop.f32.mrf.mxu0 }
 0x221   : > { %3439 = vrcp.f32 %v4365_v28  ;;  %vm2593_vm8 = vweird.f32 %v3436_v50  ;;  %v2037_v51 = vadd.f32 %v1997_v4, %v1759_v57  ;;  %v2613_v63 = vand.u32 2147483648, %v4365_v28 }
 0x222   : > { %v2580_v10 = vsel %vm2579_vm6, %v3432_v1, %v2576_v18  ;;  %v2589_v16 = vsub.f32 1.0, %v2588_v13  ;;  %v1435_v39 = vadd.f32 %v1434_v20, %v1346_v40  ;;  %vm2594_vm10 = vmor %vm2592_vm9, %vm2593_vm8  ;;  %v2611_v1 = vand.u32 2147483647, %v4365_v28  ;;  %v1724_v18 = vpop.permute.xlu0 %1723 }
 0x223   : > { %v2585_v43 = vsel %vm2582_vm7, %v2584_v14, %v2580_v10  ;;  %v2264_v55 = vpop.f32.mrf.mxu1  ;;  %v2073_v0 = vadd.f32 %v4270_v60, %v2037_v51  ;;  %vm2607_vm13 = vweird.f32 %v4365_v28  ;;  %v2614_v24 = vor.u32 1.1754944e-38, %v2613_v63 }
 0x224   : > { %2940 = vst [vmem:[%s4237_s17 + $0x40] sm:$0xff] %v2585_v43  ;;  %v2590_v6 = vmul.f32 %v3436_v50, %v2589_v16  ;;  %v2265_v45 = vadd.f32 %v4201_v54, %v2264_v55  ;;  %v1469_v32 = vadd.f32 %v1435_v39, %v473_v37  ;;  %vm2612_vm15 = vcmp.eq.f32.partialorder %v2611_v1, 8.507059e+37 }
 0x225   : > { %v1536_v58 = vld [vmem:[#allocation2 + $0xe8] sm:$0xff]  ;;  %v2105_v56 = vmax.f32 %v2073_v0, 0.0 }
 0x226   : > { %v3438_v7 = vpop.eup %3437  ;;  %v2591_v3 = vadd.f32 %v3436_v50, %v2590_v6  ;;  %v3293_v34 = vmul.f32 -1.442695, %v2265_v45  ;;  %v1760_v9 = vmul.f32 %v1719_v49, %v1536_v58  ;;  %1502 = vst.msk [vmem:[#allocation2 + $0xf0] sm:$0xff] %vm410_vm1, %v1469_v32  ;;  %v1729_v58 = vpop.permute.xlu1 %1728 }
 0x227   : > { %v3440_v11 = vpop.eup %3439  ;;  %v4378_v61 = vadd.f32 1.0, %v3438_v7  ;;  %v1347_v17 = vpop.f32.mrf.mxu2  ;;  %3277 = vmatmul.msk.f32.gmra.mxu1 %vm410_vm1, %v2105_v56 }
 0x228   : > { %v2595_v41 = vsel %vm2594_vm10, %v3436_v50, %v2591_v3  ;;  %v2603_v36 = vmul.f32 %v3440_v11, %v4365_v28  ;;  %3441 = vpow2.f32 %v3293_v34  ;;  %v1348_v27 = vadd.f32 %v1347_v17, %v3989_v31  ;;  %v1436_v12 = vpop.f32.mrf.mxu3  ;;  %v2006_v7 = vpop.f32.mrf.mxu0 }
 0x229   : > { %v2600_v29 = vsel %vm2597_vm11, %v2599_v35, %v2595_v41  ;;  %3443 = vrcp.f32 %v4378_v61  ;;  %v2038_v25 = vadd.f32 %v2000_v62, %v1760_v9  ;;  %vm2608_vm12 = vweird.f32 %v3440_v11 }
 0x22a   : > { %2941 = vst [vmem:[%s4237_s17 + $0x48] sm:$0xff] %v2600_v29  ;;  %v2604_v46 = vsub.f32 1.0, %v2603_v36  ;;  %v1437_v21 = vadd.f32 %v1436_v12, %v1348_v27  ;;  %vm2609_vm14 = vmor %vm2607_vm13, %vm2608_vm12  ;;  %v2626_v14 = vand.u32 2147483647, %v4378_v61  ;;  %v2628_v20 = vand.u32 2147483648, %v4378_v61 }
 0x22b   : > { %v2267_v2 = vpop.f32.mrf.mxu1  ;;  %v2074_v22 = vadd.f32 %v4270_v60, %v2038_v25  ;;  %vm2622_vm2 = vweird.f32 %v4378_v61 }
 0x22c   : > { %v2605_v8 = vmul.f32 %v3440_v11, %v2604_v46  ;;  %v2268_v4 = vadd.f32 %v4201_v54, %v2267_v2  ;;  %v1470_v31 = vadd.f32 %v1437_v21, %v474_v53  ;;  %v2629_v57 = vor.u32 1.1754944e-38, %v2628_v20 }
 0x22d   : > { %v1537_v19 = vld [vmem:[#allocation2 + $0xf0] sm:$0xff]  ;;  %v2106_v44 = vmax.f32 %v2074_v22, 0.0  ;;  %vm2627_vm4 = vcmp.eq.f32.partialorder %v2626_v14, 8.507059e+37 }
 0x22e   : > { %v3442_v48 = vpop.eup %3441  ;;  %v2606_v52 = vadd.f32 %v3440_v11, %v2605_v8  ;;  %v3294_v15 = vmul.f32 -1.442695, %v2268_v4  ;;  %1503 = vst.msk [vmem:[#allocation2 + $0xf8] sm:$0xff] %vm410_vm1, %v1470_v31  ;;  %v1761_v30 = vmul.f32 %v1724_v18, %v1537_v19  ;;  %v4410_v8 = vld [vmem:[%s4463_s7] ss:$0 sm:$0xff] }
 0x22f   : > { %v3444_v23 = vpop.eup %3443  ;;  %v2432_v59 = vadd.f32 1.0, %v3442_v48  ;;  %3278 = vmatmul.msk.f32.gmra.mxu1 %vm410_vm1, %v2106_v44 }
 0x230   : > { %v2610_v50 = vsel %vm2609_vm14, %v3440_v11, %v2606_v52  ;;  %v2618_v42 = vmul.f32 %v3444_v23, %v4378_v61  ;;  %3445 = vpow2.f32 %v3294_v15  ;;  %vm2623_vm0 = vweird.f32 %v3444_v23 }
 0x231   : > { %v2615_v13 = vsel %vm2612_vm15, %v2614_v24, %v2610_v50  ;;  %3447 = vrcp.f32 %v2432_v59  ;;  %v2039_v16 = vadd.f32 %v2003_v47, %v1761_v30  ;;  %vm2624_vm3 = vmor %vm2622_vm2, %vm2623_vm0  ;;  %v2641_v32 = vand.u32 2147483647, %v2432_v59 }
 0x232   : > { %2942 = vst [vmem:[%s4237_s17 + $0x50] sm:$0xff] %v2615_v13  ;;  %v2619_v28 = vsub.f32 1.0, %v2618_v42  ;;  %v2643_v34 = vand.u32 2147483648, %v2432_v59  ;;  %vm2637_vm6 = vweird.f32 %v2432_v59 }
 0x233   : > { %v2270_v26 = vpop.f32.mrf.mxu1  ;;  %v2075_v5 = vadd.f32 %v4270_v60, %v2039_v16  ;;  %vm2642_vm8 = vcmp.eq.f32.partialorder %v2641_v32, 8.507059e+37 }
 0x234   : > { %v2620_v10 = vmul.f32 %v3444_v23, %v2619_v28  ;;  %v2271_v33 = vadd.f32 %v4201_v54, %v2270_v26  ;;  %v2644_v29 = vor.u32 1.1754944e-38, %v2643_v34 }
 0x235   : > { %v1538_v6 = vld [vmem:[#allocation2 + $0xf8] sm:$0xff]  ;;  %v2107_v51 = vmax.f32 %v2075_v5, 0.0 }
 0x236   : > { %v3446_v40 = vpop.eup %3445  ;;  %v2621_v43 = vadd.f32 %v3444_v23, %v2620_v10  ;;  %v3295_v38 = vmul.f32 -1.442695, %v2271_v33  ;;  %v1762_v3 = vmul.f32 %v1729_v58, %v1538_v6 }
 0x237   : > { %v3448_v37 = vpop.eup %3447  ;;  %v2433_v55 = vadd.f32 1.0, %v3446_v40  ;;  %3279 = vmatmul.msk.f32.gmra.mxu1 %vm410_vm1, %v2107_v51 }
 0x238   : > { %v2625_v39 = vsel %vm2624_vm3, %v3444_v23, %v2621_v43  ;;  %v2633_v45 = vmul.f32 %v3448_v37, %v2432_v59  ;;  %vm2638_vm5 = vweird.f32 %v3448_v37  ;;  %v2040_v61 = vadd.f32 %v2006_v7, %v1762_v3 }
 0x239   : > { %v2630_v62 = vsel %vm2627_vm4, %v2629_v57, %v2625_v39  ;;  %3449 = vrcp.f32 %v2433_v55  ;;  %vm2639_vm7 = vmor %vm2637_vm6, %vm2638_vm5  ;;  %vm2652_vm10 = vweird.f32 %v2433_v55 }
 0x23a   : > { %2943 = vst [vmem:[%s4237_s17 + $0x58] sm:$0xff] %v2630_v62  ;;  %v2634_v49 = vsub.f32 1.0, %v2633_v45  ;;  %3451 = vpow2.f32 %v3295_v38  ;;  %v2076_v9 = vadd.f32 %v4270_v60, %v2040_v61  ;;  %v2656_v60 = vand.u32 2147483647, %v2433_v55 }
 0x23b   : > { %v2273_v11 = vpop.f32.mrf.mxu1 }
 0x23c   : > { %v2635_v35 = vmul.f32 %v3448_v37, %v2634_v49  ;;  %v2274_v0 = vadd.f32 %v4201_v54, %v2273_v11  ;;  %v2108_v1 = vmax.f32 %v2076_v9, 0.0  ;;  %v2658_v54 = vand.u32 2147483648, %v2433_v55 }
 0x23d   : > { %vm2657_vm12 = vcmp.eq.f32.partialorder %v2656_v60, 8.507059e+37 }
 0x23e   : > { %v2636_v17 = vadd.f32 %v3448_v37, %v2635_v35  ;;  %v3296_v41 = vmul.f32 -1.442695, %v2274_v0  ;;  %v2659_v52 = vor.u32 1.1754944e-38, %v2658_v54 }
 0x23f   : > { %v3450_v36 = vpop.eup %3449  ;;  %3280 = vmatmul.msk.f32.gmra.mxu1 %vm410_vm1, %v2108_v1 }
 0x240   : > { %v3452_v46 = vpop.eup %3451  ;;  %v2640_v56 = vsel %vm2639_vm7, %v3448_v37, %v2636_v17  ;;  %v2648_v27 = vmul.f32 %v3450_v36, %v2433_v55  ;;  %3453 = vpow2.f32 %v3296_v41  ;;  %vm2653_vm9 = vweird.f32 %v3450_v36 }
 0x241   : > { %v2645_v63 = vsel %vm2642_vm8, %v2644_v29, %v2640_v56  ;;  %v2434_v53 = vadd.f32 1.0, %v3452_v46  ;;  %vm2654_vm11 = vmor %vm2652_vm10, %vm2653_vm9 }
 0x242   : > { %2944 = vst [vmem:[%s4237_s17 + $0x60] sm:$0xff] %v2645_v63  ;;  %v2649_v12 = vsub.f32 1.0, %v2648_v27 }
 0x243   : > { %3455 = vrcp.f32 %v2434_v53  ;;  %v2276_v25 = vpop.f32.mrf.mxu1  ;;  %v2673_v42 = vand.u32 2147483648, %v2434_v53  ;;  %v2671_v13 = vand.u32 2147483647, %v2434_v53  ;;  %vm2667_vm13 = vweird.f32 %v2434_v53 }
 0x244   : > { %v2650_v2 = vmul.f32 %v3450_v36, %v2649_v12  ;;  %v2277_v21 = vadd.f32 %v4410_v8, %v2276_v25 }
 0x245   : > { %v2674_v26 = vor.u32 1.1754944e-38, %v2673_v42  ;;  %vm2672_vm15 = vcmp.eq.f32.partialorder %v2671_v13, 8.507059e+37 }
 0x246   : > { %v2651_v4 = vadd.f32 %v3450_v36, %v2650_v2  ;;  %v3297_v22 = vmul.f32 -1.442695, %v2277_v21  ;;  %v3454_v48 = vpop.eup %3453 }
 0x247   : > { %v2435_v15 = vadd.f32 1.0, %v3454_v48 }
 0x248   : > { %v2655_v31 = vsel %vm2654_vm11, %v3450_v36, %v2651_v4  ;;  %3457 = vpow2.f32 %v3297_v22 }
 0x249   : > { %v3456_v23 = vpop.eup %3455  ;;  %v2660_v24 = vsel %vm2657_vm12, %v2659_v52, %v2655_v31  ;;  %3459 = vrcp.f32 %v2435_v15  ;;  %v2688_v5 = vand.u32 2147483648, %v2435_v15  ;;  %v2686_v57 = vand.u32 2147483647, %v2435_v15 }
 0x24a   : > { %2945 = vst [vmem:[%s4237_s17 + $0x68] sm:$0xff] %v2660_v24  ;;  %v2663_v59 = vmul.f32 %v3456_v23, %v2434_v53  ;;  %vm2668_vm1 = vweird.f32 %v3456_v23  ;;  %vm2682_vm2 = vweird.f32 %v2435_v15 }
 0x24b   : > { %v2279_v19 = vpop.f32.mrf.mxu1  ;;  %vm2669_vm14 = vmor %vm2667_vm13, %vm2668_vm1  ;;  %v2689_v58 = vor.u32 1.1754944e-38, %v2688_v5  ;;  %vm2687_vm4 = vcmp.eq.f32.partialorder %v2686_v57, 8.507059e+37 }
 0x24c   : > { %v2664_v47 = vsub.f32 1.0, %v2663_v59  ;;  %v2280_v50 = vadd.f32 %v4410_v8, %v2279_v19 }
 0x24e   : > { %v3458_v44 = vpop.eup %3457  ;;  %v2665_v18 = vmul.f32 %v3456_v23, %v2664_v47  ;;  %v3298_v28 = vmul.f32 -1.442695, %v2280_v50 }
 0x24f   : > { %v2436_v30 = vadd.f32 1.0, %v3458_v44  ;;  %v3460_v14 = vpop.eup %3459 }
 0x250   : > { %v2666_v20 = vadd.f32 %v3456_v23, %v2665_v18  ;;  %3461 = vpow2.f32 %v3298_v28  ;;  %v2678_v10 = vmul.f32 %v3460_v14, %v2435_v15  ;;  %vm2683_vm0 = vweird.f32 %v3460_v14 }
 0x251   : > { %3463 = vrcp.f32 %v2436_v30  ;;  %vm2684_vm3 = vmor %vm2682_vm2, %vm2683_vm0  ;;  %v2703_v32 = vand.u32 2147483648, %v2436_v30  ;;  %v2701_v11 = vand.u32 2147483647, %v2436_v30  ;;  %vm2697_vm6 = vweird.f32 %v2436_v30 }
 0x252   : > { %v2670_v16 = vsel %vm2669_vm14, %v3456_v23, %v2666_v20  ;;  %v2679_v40 = vsub.f32 1.0, %v2678_v10 }
 0x253   : > { %v2675_v33 = vsel %vm2672_vm15, %v2674_v26, %v2670_v16  ;;  %v2282_v43 = vpop.f32.mrf.mxu1  ;;  %v2704_v41 = vor.u32 1.1754944e-38, %v2703_v32  ;;  %vm2702_vm8 = vcmp.eq.f32.partialorder %v2701_v11, 8.507059e+37 }
 0x254   : > { %2946 = vst [vmem:[%s4237_s17 + $0x70] sm:$0xff] %v2675_v33  ;;  %v2283_v38 = vadd.f32 %v4410_v8, %v2282_v43  ;;  %v2680_v37 = vmul.f32 %v3460_v14, %v2679_v40 }
 0x256   : > { %v3462_v55 = vpop.eup %3461  ;;  %v3299_v6 = vmul.f32 -1.442695, %v2283_v38  ;;  %v2681_v45 = vadd.f32 %v3460_v14, %v2680_v37 }
 0x257   : > { %v3464_v39 = vpop.eup %3463  ;;  %v2437_v51 = vadd.f32 1.0, %v3462_v55 }
 0x258   : > { %v2693_v62 = vmul.f32 %v3464_v39, %v2436_v30  ;;  %3465 = vpow2.f32 %v3299_v6  ;;  %v2685_v7 = vsel %vm2684_vm3, %v3460_v14, %v2681_v45  ;;  %vm2698_vm5 = vweird.f32 %v3464_v39 }
 0x259   : > { %3467 = vrcp.f32 %v2437_v51  ;;  %v2690_v49 = vsel %vm2687_vm4, %v2689_v58, %v2685_v7  ;;  %vm2699_vm7 = vmor %vm2697_vm6, %vm2698_vm5  ;;  %v2718_v63 = vand.u32 2147483648, %v2437_v51  ;;  %v2716_v12 = vand.u32 2147483647, %v2437_v51 }
 0x25a   : > { %v2694_v3 = vsub.f32 1.0, %v2693_v62  ;;  %2947 = vst [vmem:[%s4237_s17 + $0x78] sm:$0xff] %v2690_v49  ;;  %vm2712_vm10 = vweird.f32 %v2437_v51 }
 0x25b   : > { %v2285_v35 = vpop.f32.mrf.mxu1  ;;  %v2719_v21 = vor.u32 1.1754944e-38, %v2718_v63  ;;  %vm2717_vm12 = vcmp.eq.f32.partialorder %v2716_v12, 8.507059e+37 }
 0x25c   : > { %v2695_v34 = vmul.f32 %v3464_v39, %v2694_v3  ;;  %v2286_v17 = vadd.f32 %v4410_v8, %v2285_v35 }
 0x25e   : > { %v3466_v61 = vpop.eup %3465  ;;  %v2696_v0 = vadd.f32 %v3464_v39, %v2695_v34  ;;  %v3300_v56 = vmul.f32 -1.442695, %v2286_v17 }
 0x25f   : > { %v3468_v9 = vpop.eup %3467  ;;  %v2438_v36 = vadd.f32 1.0, %v3466_v61 }
 0x260   : > { %v2700_v29 = vsel %vm2699_vm7, %v3464_v39, %v2696_v0  ;;  %v2708_v46 = vmul.f32 %v3468_v9, %v2437_v51  ;;  %vm2713_vm9 = vweird.f32 %v3468_v9 }
 0x261   : > { %v2705_v27 = vsel %vm2702_vm8, %v2704_v41, %v2700_v29  ;;  %3469 = vrcp.f32 %v2438_v36  ;;  %vm2714_vm11 = vmor %vm2712_vm10, %vm2713_vm9  ;;  %v2733_v24 = vand.u32 2147483648, %v2438_v36  ;;  %v2731_v19 = vand.u32 2147483647, %v2438_v36 }
 0x262   : > { %2948 = vst [vmem:[%s4237_s17 + $0x80] sm:$0xff] %v2705_v27  ;;  %v2709_v1 = vsub.f32 1.0, %v2708_v46  ;;  %3471 = vpow2.f32 %v3300_v56  ;;  %vm2727_vm13 = vweird.f32 %v2438_v36 }
 0x263   : > { %v2734_v42 = vor.u32 1.1754944e-38, %v2733_v24  ;;  %vm2732_vm15 = vcmp.eq.f32.partialorder %v2731_v19, 8.507059e+37 }
 0x264   : > { %v2710_v53 = vmul.f32 %v3468_v9, %v2709_v1  ;;  %v2288_v54 = vpop.f32.mrf.mxu1 }
 0x265   : > { %v2289_v2 = vadd.f32 %v4410_v8, %v2288_v54 }
 0x266   : > { %v2711_v25 = vadd.f32 %v3468_v9, %v2710_v53 }
 0x267   : > { %v3470_v60 = vpop.eup %3469  ;;  %v3301_v52 = vmul.f32 -1.442695, %v2289_v2 }
 0x268   : > { %v3472_v4 = vpop.eup %3471  ;;  %v2715_v22 = vsel %vm2714_vm11, %v3468_v9, %v2711_v25  ;;  %v2723_v48 = vmul.f32 %v3470_v60, %v2438_v36  ;;  %vm2728_vm1 = vweird.f32 %v3470_v60 }
 0x269   : > { %v2720_v31 = vsel %vm2717_vm12, %v2719_v21, %v2715_v22  ;;  %v2439_v15 = vadd.f32 1.0, %v3472_v4  ;;  %3473 = vpow2.f32 %v3301_v52  ;;  %vm2729_vm14 = vmor %vm2727_vm13, %vm2728_vm1 }
 0x26a   : > { %2949 = vst [vmem:[%s4237_s17 + $0x88] sm:$0xff] %v2720_v31  ;;  %v2724_v23 = vsub.f32 1.0, %v2723_v48 }
 0x26b   : > { %3475 = vrcp.f32 %v2439_v15  ;;  %v2748_v16 = vand.u32 2147483648, %v2439_v15  ;;  %v2746_v40 = vand.u32 2147483647, %v2439_v15  ;;  %vm2742_vm2 = vweird.f32 %v2439_v15 }
 0x26c   : > { %v2725_v59 = vmul.f32 %v3470_v60, %v2724_v23  ;;  %v2291_v50 = vpop.f32.mrf.mxu1 }
 0x26d   : > { %v2292_v44 = vadd.f32 %v4410_v8, %v2291_v50  ;;  %v2749_v57 = vor.u32 1.1754944e-38, %v2748_v16  ;;  %vm2747_vm4 = vcmp.eq.f32.partialorder %v2746_v40, 8.507059e+37 }
 0x26e   : > { %v2726_v47 = vadd.f32 %v3470_v60, %v2725_v59 }
 0x26f   : > { %v3474_v18 = vpop.eup %3473  ;;  %v3302_v20 = vmul.f32 -1.442695, %v2292_v44 }
 0x270   : > { %v2730_v13 = vsel %vm2729_vm14, %v3470_v60, %v2726_v47  ;;  %v2440_v14 = vadd.f32 1.0, %v3474_v18 }
 0x271   : > { %v3476_v28 = vpop.eup %3475  ;;  %v2735_v30 = vsel %vm2732_vm15, %v2734_v42, %v2730_v13 }
 0x272   : > { %2950 = vst [vmem:[%s4237_s17 + $0x90] sm:$0xff] %v2735_v30  ;;  %v2738_v26 = vmul.f32 %v3476_v28, %v2439_v15  ;;  %3477 = vrcp.f32 %v2440_v14  ;;  %vm2743_vm0 = vweird.f32 %v3476_v28  ;;  %v2763_v7 = vand.u32 2147483648, %v2440_v14 }
 0x273   : > { %3479 = vpow2.f32 %v3302_v20  ;;  %vm2744_vm3 = vmor %vm2742_vm2, %vm2743_vm0  ;;  %v2761_v3 = vand.u32 2147483647, %v2440_v14  ;;  %vm2757_vm6 = vweird.f32 %v2440_v14 }
 0x274   : > { %v2739_v10 = vsub.f32 1.0, %v2738_v26  ;;  %v2294_v43 = vpop.f32.mrf.mxu1  ;;  %v2764_v35 = vor.u32 1.1754944e-38, %v2763_v7 }
 0x275   : > { %v2295_v38 = vadd.f32 %v4410_v8, %v2294_v43  ;;  %vm2762_vm8 = vcmp.eq.f32.partialorder %v2761_v3, 8.507059e+37 }
 0x276   : > { %v2740_v33 = vmul.f32 %v3476_v28, %v2739_v10 }
 0x277   : > { %v3303_v45 = vmul.f32 -1.442695, %v2295_v38 }
 0x278   : > { %v2741_v5 = vadd.f32 %v3476_v28, %v2740_v33  ;;  %v3478_v37 = vpop.eup %3477 }
 0x279   : > { %v3480_v55 = vpop.eup %3479  ;;  %v2753_v39 = vmul.f32 %v3478_v37, %v2440_v14  ;;  %3481 = vpow2.f32 %v3303_v45  ;;  %vm2758_vm5 = vweird.f32 %v3478_v37 }
 0x27a   : > { %v2745_v6 = vsel %vm2744_vm3, %v3476_v28, %v2741_v5  ;;  %v2441_v58 = vadd.f32 1.0, %v3480_v55  ;;  %vm2759_vm7 = vmor %vm2757_vm6, %vm2758_vm5 }
 0x27b   : > { %v2750_v51 = vsel %vm2747_vm4, %v2749_v57, %v2745_v6  ;;  %v2754_v62 = vsub.f32 1.0, %v2753_v39 }
 0x27c   : > { %2951 = vst [vmem:[%s4237_s17 + $0x98] sm:$0xff] %v2750_v51  ;;  %3483 = vrcp.f32 %v2441_v58  ;;  %v2297_v32 = vpop.f32.mrf.mxu1  ;;  %v2778_v56 = vand.u32 2147483648, %v2441_v58  ;;  %v2776_v63 = vand.u32 2147483647, %v2441_v58  ;;  %vm2772_vm10 = vweird.f32 %v2441_v58 }
 0x27d   : > { %v2755_v49 = vmul.f32 %v3478_v37, %v2754_v62  ;;  %v2298_v11 = vadd.f32 %v4410_v8, %v2297_v32 }
 0x27e   : > { %v2779_v60 = vor.u32 1.1754944e-38, %v2778_v56  ;;  %vm2777_vm12 = vcmp.eq.f32.partialorder %v2776_v63, 8.507059e+37 }
 0x27f   : > { %v2756_v34 = vadd.f32 %v3478_v37, %v2755_v49  ;;  %v3482_v61 = vpop.eup %3481  ;;  %v3304_v17 = vmul.f32 -1.442695, %v2298_v11 }
 0x280   : > { %v2442_v36 = vadd.f32 1.0, %v3482_v61 }
 0x281   : > { %v2760_v0 = vsel %vm2759_vm7, %v3478_v37, %v2756_v34  ;;  %3485 = vpow2.f32 %v3304_v17 }
 0x282   : > { %v3484_v9 = vpop.eup %3483  ;;  %v2765_v41 = vsel %vm2762_vm8, %v2764_v35, %v2760_v0  ;;  %3487 = vrcp.f32 %v2442_v36  ;;  %v2793_v31 = vand.u32 2147483648, %v2442_v36  ;;  %v2791_v24 = vand.u32 2147483647, %v2442_v36 }
 0x283   : > { %2952 = vst [vmem:[%s4237_s17 + $0xa0] sm:$0xff] %v2765_v41  ;;  %v2768_v29 = vmul.f32 %v3484_v9, %v2441_v58  ;;  %vm2773_vm9 = vweird.f32 %v3484_v9  ;;  %vm2787_vm13 = vweird.f32 %v2442_v36 }
 0x284   : > { %v2300_v27 = vpop.f32.mrf.mxu1  ;;  %vm2774_vm11 = vmor %vm2772_vm10, %vm2773_vm9  ;;  %v2794_v44 = vor.u32 1.1754944e-38, %v2793_v31  ;;  %vm2792_vm15 = vcmp.eq.f32.partialorder %v2791_v24, 8.507059e+37 }
 0x285   : > { %v2769_v46 = vsub.f32 1.0, %v2768_v29  ;;  %v2301_v53 = vadd.f32 %v4410_v8, %v2300_v27 }
 0x287   : > { %v2770_v1 = vmul.f32 %v3484_v9, %v2769_v46  ;;  %v3486_v12 = vpop.eup %3485  ;;  %v3305_v25 = vmul.f32 -1.442695, %v2301_v53 }
 0x288   : > { %v3488_v2 = vpop.eup %3487  ;;  %v2443_v21 = vadd.f32 1.0, %v3486_v12 }
 0x289   : > { %v2771_v54 = vadd.f32 %v3484_v9, %v2770_v1  ;;  %v2783_v22 = vmul.f32 %v3488_v2, %v2442_v36  ;;  %3489 = vpow2.f32 %v3305_v25  ;;  %vm2788_vm1 = vweird.f32 %v3488_v2 }
 0x28a   : > { %3491 = vrcp.f32 %v2443_v21  ;;  %vm2789_vm14 = vmor %vm2787_vm13, %vm2788_vm1  ;;  %v2808_v20 = vand.u32 2147483648, %v2443_v21  ;;  %v2806_v16 = vand.u32 2147483647, %v2443_v21  ;;  %vm2802_vm2 = vweird.f32 %v2443_v21 }
 0x28b   : > { %v2775_v4 = vsel %vm2774_vm11, %v3484_v9, %v2771_v54  ;;  %v2784_v52 = vsub.f32 1.0, %v2783_v22 }
 0x28c   : > { %v2780_v48 = vsel %vm2777_vm12, %v2779_v60, %v2775_v4  ;;  %v2303_v15 = vpop.f32.mrf.mxu1  ;;  %v2809_v37 = vor.u32 1.1754944e-38, %v2808_v20  ;;  %vm2807_vm4 = vcmp.eq.f32.partialorder %v2806_v16, 8.507059e+37 }
 0x28d   : > { %2953 = vst [vmem:[%s4237_s17 + $0xa8] sm:$0xff] %v2780_v48  ;;  %v2785_v23 = vmul.f32 %v3488_v2, %v2784_v52  ;;  %v2304_v59 = vadd.f32 %v4410_v8, %v2303_v15 }
 0x28f   : > { %v3490_v19 = vpop.eup %3489  ;;  %v2786_v47 = vadd.f32 %v3488_v2, %v2785_v23  ;;  %v3306_v50 = vmul.f32 -1.442695, %v2304_v59 }
 0x290   : > { %v3492_v42 = vpop.eup %3491  ;;  %v2444_v18 = vadd.f32 1.0, %v3490_v19 }
 0x291   : > { %v2790_v13 = vsel %vm2789_vm14, %v3488_v2, %v2786_v47  ;;  %v2798_v28 = vmul.f32 %v3492_v42, %v2443_v21  ;;  %3493 = vpow2.f32 %v3306_v50  ;;  %vm2803_vm0 = vweird.f32 %v3492_v42 }
 0x292   : > { %v2795_v30 = vsel %vm2792_vm15, %v2794_v44, %v2790_v13  ;;  %3495 = vrcp.f32 %v2444_v18  ;;  %vm2804_vm3 = vmor %vm2802_vm2, %vm2803_vm0  ;;  %v2823_v51 = vand.u32 2147483648, %v2444_v18  ;;  %v2821_v62 = vand.u32 2147483647, %v2444_v18 }
 0x293   : > { %2954 = vst [vmem:[%s4237_s17 + $0xb0] sm:$0xff] %v2795_v30  ;;  %v2799_v14 = vsub.f32 1.0, %v2798_v28  ;;  %vm2817_vm6 = vweird.f32 %v2444_v18 }
 0x294   : > { %v2306_v26 = vpop.f32.mrf.mxu1  ;;  %v2824_v11 = vor.u32 1.1754944e-38, %v2823_v51  ;;  %vm2822_vm8 = vcmp.eq.f32.partialorder %v2821_v62, 8.507059e+37 }
 0x295   : > { %v2800_v10 = vmul.f32 %v3492_v42, %v2799_v14  ;;  %v2307_v33 = vadd.f32 %v4410_v8, %v2306_v26 }
 0x297   : > { %v3494_v40 = vpop.eup %3493  ;;  %v2801_v43 = vadd.f32 %v3492_v42, %v2800_v10  ;;  %v3307_v5 = vmul.f32 -1.442695, %v2307_v33 }
 0x298   : > { %v3496_v38 = vpop.eup %3495  ;;  %v2445_v57 = vadd.f32 1.0, %v3494_v40 }
 0x299   : > { %v2805_v55 = vsel %vm2804_vm3, %v3492_v42, %v2801_v43  ;;  %v2813_v6 = vmul.f32 %v3496_v38, %v2444_v18  ;;  %3497 = vpow2.f32 %v3307_v5  ;;  %vm2818_vm5 = vweird.f32 %v3496_v38 }
 0x29a   : > { %v2810_v39 = vsel %vm2807_vm4, %v2809_v37, %v2805_v55  ;;  %3499 = vrcp.f32 %v2445_v57  ;;  %vm2819_vm7 = vmor %vm2817_vm6, %vm2818_vm5  ;;  %v2838_v36 = vand.u32 2147483648, %v2445_v57  ;;  %v2836_v46 = vand.u32 2147483647, %v2445_v57 }
 0x29b   : > { %2955 = vst [vmem:[%s4237_s17 + $0xb8] sm:$0xff] %v2810_v39  ;;  %v2814_v45 = vsub.f32 1.0, %v2813_v6  ;;  %vm2832_vm10 = vweird.f32 %v2445_v57 }
 0x29c   : > { %v2309_v7 = vpop.f32.mrf.mxu1  ;;  %v2839_v53 = vor.u32 1.1754944e-38, %v2838_v36  ;;  %vm2837_vm12 = vcmp.eq.f32.partialorder %v2836_v46, 8.507059e+37 }
 0x29d   : > { %v2815_v58 = vmul.f32 %v3496_v38, %v2814_v45  ;;  %v2310_v32 = vadd.f32 %v4410_v8, %v2309_v7 }
 0x29f   : > { %v3498_v49 = vpop.eup %3497  ;;  %v2816_v3 = vadd.f32 %v3496_v38, %v2815_v58  ;;  %v3308_v17 = vmul.f32 -1.442695, %v2310_v32 }
 0x2a0   : > { %v3500_v34 = vpop.eup %3499  ;;  %v2446_v35 = vadd.f32 1.0, %v3498_v49 }
 0x2a1   : > { %v2820_v61 = vsel %vm2819_vm7, %v3496_v38, %v2816_v3  ;;  %v2828_v0 = vmul.f32 %v3500_v34, %v2445_v57  ;;  %vm2833_vm9 = vweird.f32 %v3500_v34 }
 0x2a2   : > { %v2825_v9 = vsel %vm2822_vm8, %v2824_v11, %v2820_v61  ;;  %3501 = vrcp.f32 %v2446_v35  ;;  %vm2834_vm11 = vmor %vm2832_vm10, %vm2833_vm9  ;;  %v2853_v22 = vand.u32 2147483648, %v2446_v35  ;;  %v2851_v52 = vand.u32 2147483647, %v2446_v35 }
 0x2a3   : > { %2956 = vst [vmem:[%s4237_s17 + $0xc0] sm:$0xff] %v2825_v9  ;;  %v2829_v41 = vsub.f32 1.0, %v2828_v0  ;;  %3503 = vpow2.f32 %v3308_v17  ;;  %vm2847_vm13 = vweird.f32 %v2446_v35 }
 0x2a4   : > { %v2312_v56 = vpop.f32.mrf.mxu1  ;;  %v2854_v24 = vor.u32 1.1754944e-38, %v2853_v22  ;;  %vm2852_vm15 = vcmp.eq.f32.partialorder %v2851_v52, 8.507059e+37 }
 0x2a5   : > { %v2830_v29 = vmul.f32 %v3500_v34, %v2829_v41  ;;  %v2313_v1 = vadd.f32 %v4410_v8, %v2312_v56 }
 0x2a7   : > { %v2831_v27 = vadd.f32 %v3500_v34, %v2830_v29  ;;  %v3309_v2 = vmul.f32 -1.442695, %v2313_v1 }
 0x2a8   : > { %v3502_v63 = vpop.eup %3501 }
 0x2a9   : > { %v3504_v12 = vpop.eup %3503  ;;  %v2835_v54 = vsel %vm2834_vm11, %v3500_v34, %v2831_v27  ;;  %v2843_v25 = vmul.f32 %v3502_v63, %v2446_v35  ;;  %3505 = vpow2.f32 %v3309_v2  ;;  %vm2848_vm1 = vweird.f32 %v3502_v63 }
 0x2aa   : > { %v2840_v60 = vsel %vm2837_vm12, %v2839_v53, %v2835_v54  ;;  %v2447_v21 = vadd.f32 1.0, %v3504_v12  ;;  %vm2849_vm14 = vmor %vm2847_vm13, %vm2848_vm1 }
 0x2ab   : > { %2957 = vst [vmem:[%s4237_s17 + $0xc8] sm:$0xff] %v2840_v60  ;;  %v2844_v4 = vsub.f32 1.0, %v2843_v25 }
 0x2ac   : > { %3507 = vrcp.f32 %v2447_v21  ;;  %v2315_v31 = vpop.f32.mrf.mxu1  ;;  %v2868_v28 = vand.u32 2147483648, %v2447_v21  ;;  %v2866_v20 = vand.u32 2147483647, %v2447_v21  ;;  %vm2862_vm2 = vweird.f32 %v2447_v21 }
 0x2ad   : > { %v2845_v48 = vmul.f32 %v3502_v63, %v2844_v4  ;;  %v2316_v23 = vadd.f32 %v4410_v8, %v2315_v31 }
 0x2ae   : > { %v2869_v43 = vor.u32 1.1754944e-38, %v2868_v28  ;;  %vm2867_vm4 = vcmp.eq.f32.partialorder %v2866_v20, 8.507059e+37 }
 0x2af   : > { %v2846_v15 = vadd.f32 %v3502_v63, %v2845_v48  ;;  %v3506_v59 = vpop.eup %3505  ;;  %v3310_v47 = vmul.f32 -1.442695, %v2316_v23 }
 0x2b0   : > { %v2448_v44 = vadd.f32 1.0, %v3506_v59 }
 0x2b1   : > { %v2850_v19 = vsel %vm2849_vm14, %v3502_v63, %v2846_v15  ;;  %3509 = vpow2.f32 %v3310_v47 }
 0x2b2   : > { %v3508_v50 = vpop.eup %3507  ;;  %v2855_v42 = vsel %vm2852_vm15, %v2854_v24, %v2850_v19  ;;  %3511 = vrcp.f32 %v2448_v44  ;;  %v2883_v6 = vand.u32 2147483648, %v2448_v44  ;;  %v2881_v51 = vand.u32 2147483647, %v2448_v44 }
 0x2b3   : > { %2958 = vst [vmem:[%s4237_s17 + $0xd0] sm:$0xff] %v2855_v42  ;;  %v2858_v18 = vmul.f32 %v3508_v50, %v2447_v21  ;;  %vm2863_vm0 = vweird.f32 %v3508_v50  ;;  %vm2877_vm6 = vweird.f32 %v2448_v44 }
 0x2b4   : > { %v2318_v30 = vpop.f32.mrf.mxu1  ;;  %vm2864_vm3 = vmor %vm2862_vm2, %vm2863_vm0  ;;  %v2884_v32 = vor.u32 1.1754944e-38, %v2883_v6  ;;  %vm2882_vm8 = vcmp.eq.f32.partialorder %v2881_v51, 8.507059e+37 }
 0x2b5   : > { %v2859_v13 = vsub.f32 1.0, %v2858_v18  ;;  %v2319_v26 = vadd.f32 %v4410_v8, %v2318_v30 }
 0x2b7   : > { %v2860_v14 = vmul.f32 %v3508_v50, %v2859_v13  ;;  %v3510_v10 = vpop.eup %3509  ;;  %v3311_v33 = vmul.f32 -1.442695, %v2319_v26 }
 0x2b8   : > { %v3512_v40 = vpop.eup %3511  ;;  %v2449_v5 = vadd.f32 1.0, %v3510_v10 }
 0x2b9   : > { %v2861_v16 = vadd.f32 %v3508_v50, %v2860_v14  ;;  %v2873_v37 = vmul.f32 %v3512_v40, %v2448_v44  ;;  %3513 = vpow2.f32 %v3311_v33  ;;  %vm2878_vm5 = vweird.f32 %v3512_v40 }
 0x2ba   : > { %3515 = vrcp.f32 %v2449_v5  ;;  %vm2879_vm7 = vmor %vm2877_vm6, %vm2878_vm5  ;;  %v2898_v17 = vand.u32 2147483648, %v2449_v5  ;;  %vm2892_vm10 = vweird.f32 %v2449_v5 }
 0x2bb   : > { %v2865_v38 = vsel %vm2864_vm3, %v3508_v50, %v2861_v16  ;;  %v2874_v55 = vsub.f32 1.0, %v2873_v37 }
 0x2bc   : > { %v2870_v57 = vsel %vm2867_vm4, %v2869_v43, %v2865_v38  ;;  %v2321_v39 = vpop.f32.mrf.mxu1  ;;  %v2899_v46 = vor.u32 1.1754944e-38, %v2898_v17 }
 0x2bd   : > { %2959 = vst [vmem:[%s4237_s17 + $0xd8] sm:$0xff] %v2870_v57  ;;  %v2875_v45 = vmul.f32 %v3512_v40, %v2874_v55  ;;  %v2322_v58 = vadd.f32 %v4410_v8, %v2321_v39  ;;  %v2896_v8 = vand.u32 2147483647, %v2449_v5 }
 0x2bf   : > { %v3514_v62 = vpop.eup %3513  ;;  %v2876_v7 = vadd.f32 %v3512_v40, %v2875_v45  ;;  %v3312_v49 = vmul.f32 -1.442695, %v2322_v58  ;;  %vm2897_vm12 = vcmp.eq.f32.partialorder %v2896_v8, 8.507059e+37 }
 0x2c0   : > { %v3516_v3 = vpop.eup %3515  ;;  %v2450_v34 = vadd.f32 1.0, %v3514_v62 }
 0x2c1   : > { %v2880_v11 = vsel %vm2879_vm7, %v3512_v40, %v2876_v7  ;;  %v2888_v35 = vmul.f32 %v3516_v3, %v2449_v5  ;;  %3517 = vpow2.f32 %v3312_v49  ;;  %vm2893_vm9 = vweird.f32 %v3516_v3 }
 0x2c2   : > { %v2885_v61 = vsel %vm2882_vm8, %v2884_v32, %v2880_v11  ;;  %3519 = vrcp.f32 %v2450_v34  ;;  %vm2894_vm11 = vmor %vm2892_vm10, %vm2893_vm9  ;;  %v2913_v12 = vand.u32 2147483648, %v2450_v34  ;;  %v2911_v25 = vand.u32 2147483647, %v2450_v34 }
 0x2c3   : > { %2960 = vst [vmem:[%s4237_s17 + $0xe0] sm:$0xff] %v2885_v61  ;;  %v2889_v0 = vsub.f32 1.0, %v2888_v35  ;;  %vm2907_vm13 = vweird.f32 %v2450_v34 }
 0x2c4   : > { %v2914_v21 = vor.u32 1.1754944e-38, %v2913_v12  ;;  %vm2912_vm15 = vcmp.eq.f32.partialorder %v2911_v25, 8.507059e+37 }
 0x2c5   : > { %v2890_v9 = vmul.f32 %v3516_v3, %v2889_v0 }
 0x2c7   : > { %v3518_v41 = vpop.eup %3517  ;;  %v2891_v36 = vadd.f32 %v3516_v3, %v2890_v9 }
 0x2c8   : > { %v3520_v29 = vpop.eup %3519  ;;  %v2451_v56 = vadd.f32 1.0, %v3518_v41 }
 0x2c9   : > { %v2895_v27 = vsel %vm2894_vm11, %v3516_v3, %v2891_v36  ;;  %v2903_v1 = vmul.f32 %v3520_v29, %v2450_v34  ;;  %vm2908_vm1 = vweird.f32 %v3520_v29 }
 0x2ca   : > { %v2900_v63 = vsel %vm2897_vm12, %v2899_v46, %v2895_v27  ;;  %3521 = vrcp.f32 %v2451_v56  ;;  %vm2909_vm14 = vmor %vm2907_vm13, %vm2908_vm1  ;;  %v2928_v31 = vand.u32 2147483648, %v2451_v56  ;;  %v2926_v23 = vand.u32 2147483647, %v2451_v56 }
 0x2cb   : > { %2961 = vst [vmem:[%s4237_s17 + $0xe8] sm:$0xff] %v2900_v63  ;;  %v2904_v53 = vsub.f32 1.0, %v2903_v1  ;;  %vm2922_vm2 = vweird.f32 %v2451_v56 }
 0x2cc   : > { %v2929_v59 = vor.u32 1.1754944e-38, %v2928_v31  ;;  %vm2927_vm4 = vcmp.eq.f32.partialorder %v2926_v23, 8.507059e+37 }
 0x2cd   : > { %v2905_v54 = vmul.f32 %v3520_v29, %v2904_v53 }
 0x2cf   : > { %v2906_v2 = vadd.f32 %v3520_v29, %v2905_v54 }
 0x2d0   : > { %v3522_v60 = vpop.eup %3521 }
 0x2d1   : > { %v2910_v4 = vsel %vm2909_vm14, %v3520_v29, %v2906_v2  ;;  %v2918_v22 = vmul.f32 %v3522_v60, %v2451_v56  ;;  %vm2923_vm0 = vweird.f32 %v3522_v60 }
 0x2d2   : > { %v2915_v48 = vsel %vm2912_vm15, %v2914_v21, %v2910_v4  ;;  %vm2924_vm3 = vmor %vm2922_vm2, %vm2923_vm0 }
 0x2d3   : > { %2962 = vst [vmem:[%s4237_s17 + $0xf0] sm:$0xff] %v2915_v48  ;;  %v2919_v52 = vsub.f32 1.0, %v2918_v22 }
 0x2d5   : > { %v2920_v15 = vmul.f32 %v3522_v60, %v2919_v52 }
 0x2d7   : > { %v2921_v24 = vadd.f32 %v3522_v60, %v2920_v15 }
 0x2d9   : > { %v2925_v19 = vsel %vm2924_vm3, %v3522_v60, %v2921_v24 }
 0x2da   : > { %v2930_v47 = vsel %vm2927_vm4, %v2929_v59, %v2925_v19 }
 0x2db   : > { %2963 = vst [vmem:[%s4237_s17 + $0xf8] sm:$0xff] %v2930_v47 }
 0x2dc PF: > { %s18_s29 = sadd.s32 1, %s3547_s29   ;;  %s4465_s27 = smov %s3543_s28 }
 0x2dd   : > { %p15_p6 = scmp.ge.s32.totalorder %s18_s29, 4   ;;  %s4466_s28 = smov %s4468_s30 }
 0x2df   :  { %17 = sbr.rel (!%p15_p6) target bundleno = 2 (0x2), region = 99 }

</bundles_post_ra>
